<compile_context>
chip_gen: v6e
topology: v6e:2x2x1
jax: 0.10.0
libtpu: 0.0.40
codegen_flags: <defaults>
</compile_context>

<pallas_src>
import jax
import jax.numpy as jnp
from jax.experimental import pallas as pl
from jax.experimental.pallas import tpu as pltpu

BN_EPS = 1e-3


def _fused_kernel(se_ref, x_ref, w1_ref, b1_ref, w2_ref, gamma_ref, beta_ref, o_ref):
    # se_ref:    [N, 40]     squeeze vectors (native flatten of [N,40,1,1], no transpose)
    # x_ref:     [N, 960, S] channel-major activations (f32 or bf16), S = H*W
    # w1_ref:    [960, 40]   conv2d72 weight, native (out, in) layout
    # b1_ref:    [960, 1]    conv2d72 bias
    # w2_ref:    [160, 960]  conv2d73 weight, native (out, in) layout, PRE-CAST to bf16
    # gamma_ref: [160, 1]    BN weight
    # beta_ref:  [160, 1]    BN bias
    # o_ref:     [N, 160, S] f32 output
    nb, _, s_sp = x_ref.shape
    c_out = w2_ref.shape[0]

    w1 = w1_ref[...]                                   # [960, 40] f32
    b1 = b1_ref[...]                                   # [960, 1]  f32
    w2 = w2_ref[...]                                   # [160, 960] bf16 (read from HBM in bf16)

    # ---- Pass 1: SE scale + 1x1 conv; write un-normalized y into o_ref, accumulate channel sums.
    csum = jnp.zeros((c_out, 1), jnp.float32)
    for n in range(nb):                                # static Python loop; module spec has N == 1
        se_n = se_ref[pl.ds(n, 1), :]                  # [1, 40]
        # SE squeeze on VPU/XLU (lane reduce over 40) + EUP sigmoid; no tiny serial MXU matmul.
        s_col = jax.nn.sigmoid(jnp.sum(w1 * se_n, axis=1, keepdims=True) + b1)   # [960, 1] f32
        # Per-channel scale of x, cast to bf16 for the MXU. Keeping W2 fixed (not folded per batch)
        # shares the weight across all batches and removes N redundant 160x960 VPU folds for N>1.
        xs = (x_ref[n] * s_col).astype(jnp.bfloat16)   # [960, S]
        y = jnp.dot(w2, xs, preferred_element_type=jnp.float32)                  # [160, S] f32 MXU
        o_ref[n] = y                                   # park y in VMEM; nothing held in vregs
        csum = csum + jnp.sum(y, axis=1, keepdims=True)

    inv_cnt = 1.0 / float(nb * s_sp)
    mean = csum * inv_cnt                              # [160, 1]

    # ---- Pass 2: centered (two-pass) variance over the VMEM-resident output — numerically safer
    # than the one-pass E[y^2]-E[y]^2 form, and essentially free at this size.
    csq = jnp.zeros((c_out, 1), jnp.float32)
    for n in range(nb):
        d = o_ref[n] - mean
        csq = csq + jnp.sum(d * d, axis=1, keepdims=True)
    var = csq * inv_cnt                                # biased batch variance (PyTorch train fwd)

    scale = jax.lax.rsqrt(var + BN_EPS) * gamma_ref[...]
    shift = beta_ref[...] - mean * scale

    # ---- Pass 3: fused BN affine, applied in place.
    for n in range(nb):
        o_ref[n] = o_ref[n] * scale + shift


def prepare_params(w1, b1, w2, gamma, beta):
    """One-time (per-model) parameter prep. Hoisted out of the per-step path so these tiny
    reshape/cast dispatches are not paid on every forward call."""
    c_mid, c_se = w1.shape[0], w1.shape[1]
    c_out = w2.shape[0]
    w1_mat = w1.reshape(c_mid, c_se).astype(jnp.float32)        # [960, 40]  native layout
    b1_col = b1.reshape(c_mid, 1).astype(jnp.float32)           # [960, 1]
    w2_bf16 = w2.reshape(c_out, c_mid).astype(jnp.bfloat16)     # [160, 960] bf16: halves HBM read
    gamma_col = gamma.reshape(c_out, 1).astype(jnp.float32)     # [160, 1]
    beta_col = beta.reshape(c_out, 1).astype(jnp.float32)       # [160, 1]
    return w1_mat, b1_col, w2_bf16, gamma_col, beta_col


@jax.jit
def fused_se_conv_bn(x227, x230, w1_mat, b1_col, w2_bf16, gamma_col, beta_col):
    """x227: [N, 960, H, W] (f32 or bf16), x230: [N, 40, 1, 1] -> [N, 160, H, W] f32 (NCHW)."""
    N, C_in, H, W = x227.shape
    C_out = w2_bf16.shape[0]
    S = H * W

    # Metadata-only reshapes (free under jit); NO dtype conversion pass on the big activation —
    # it is cast to bf16 inside the kernel (pass bf16 x directly if the producer can emit it).
    x_flat = x227.reshape(N, C_in, S)                            # [N, 960, S]
    se_rows = x230.reshape(N, -1)                                # [N, 40]

    itemsize = lambda a: jnp.dtype(a.dtype).itemsize
    flops = N * (2 * C_out * C_in * S          # 1x1 conv matmul
                 + 2 * C_in * S                # SE scale of x + BN affine
                 + 2 * C_in * se_rows.shape[1])  # SE squeeze
    transcendentals = N * C_in + C_out         # sigmoid per mid channel + rsqrt per out channel
    bytes_accessed = (x_flat.size * itemsize(x_flat)
                      + se_rows.size * itemsize(se_rows)
                      + w1_mat.size * itemsize(w1_mat)
                      + b1_col.size * itemsize(b1_col)
                      + w2_bf16.size * itemsize(w2_bf16)
                      + gamma_col.size * itemsize(gamma_col)
                      + beta_col.size * itemsize(beta_col)
                      + N * C_out * S * 4)

    out_flat = pl.pallas_call(
        _fused_kernel,
        out_shape=jax.ShapeDtypeStruct((N, C_out, S), jnp.float32),
        grid=(1,),   # single step: launch/HBM-bound at this size; more steps only add overhead
        in_specs=[
            pl.BlockSpec(se_rows.shape, lambda i: (0, 0)),
            pl.BlockSpec(x_flat.shape, lambda i: (0, 0, 0)),
            pl.BlockSpec(w1_mat.shape, lambda i: (0, 0)),
            pl.BlockSpec(b1_col.shape, lambda i: (0, 0)),
            pl.BlockSpec(w2_bf16.shape, lambda i: (0, 0)),
            pl.BlockSpec(gamma_col.shape, lambda i: (0, 0)),
            pl.BlockSpec(beta_col.shape, lambda i: (0, 0)),
        ],
        out_specs=pl.BlockSpec((N, C_out, S), lambda i: (0, 0, 0)),
        compiler_params=pltpu.CompilerParams(
            dimension_semantics=("arbitrary",)),
        cost_estimate=pl.CostEstimate(flops=flops,
                                      transcendentals=transcendentals,
                                      bytes_accessed=bytes_accessed),
    )(se_rows, x_flat, w1_mat, b1_col, w2_bf16, gamma_col, beta_col)

    # [N, 160, S] -> NCHW: metadata-only reshape, no transpose kernel.
    return out_flat.reshape(N, C_out, H, W)


def _reference(x227, x230, w1, b1, w2, gamma, beta):
    """Pure-JAX f32 reference of the PyTorch forward (training-mode BN, biased batch stats)."""
    N = x227.shape[0]
    s = jax.nn.sigmoid(
        jnp.einsum("ck,nk->nc", w1.reshape(w1.shape[0], -1), x230.reshape(N, -1))
        + b1[None, :])                                            # [N, 960]
    xs = x227 * s[:, :, None, None]
    y = jnp.einsum("oc,nchw->nohw", w2.reshape(w2.shape[0], -1), xs)
    mean = jnp.mean(y, axis=(0, 2, 3), keepdims=True)
    var = jnp.mean((y - mean) ** 2, axis=(0, 2, 3), keepdims=True)
    return ((y - mean) * jax.lax.rsqrt(var + BN_EPS)
            * gamma[None, :, None, None] + beta[None, :, None, None])


if __name__ == "__main__":
    key = jax.random.PRNGKey(0)
    ks = jax.random.split(key, 7)

    # Shapes implied by the module: N=1, 960->160 channels, 14x14 spatial, SE dim 40.
    N, H, W = 1, 14, 14
    C_SE, C_MID, C_OUT = 40, 960, 160

    x227 = jax.random.normal(ks[0], (N, C_MID, H, W), dtype=jnp.float32)
    x230 = jax.random.normal(ks[1], (N, C_SE, 1, 1), dtype=jnp.float32)

    # Deterministic synthetic parameters (not a checkpoint load).
    w1 = jax.random.normal(ks[2], (C_MID, C_SE, 1, 1), dtype=jnp.float32) * 0.05
    b1 = jax.random.normal(ks[3], (C_MID,), dtype=jnp.float32) * 0.05
    w2 = jax.random.normal(ks[4], (C_OUT, C_MID, 1, 1), dtype=jnp.float32) * 0.02
    gamma = jnp.ones((C_OUT,), dtype=jnp.float32)
    beta = jnp.zeros((C_OUT,), dtype=jnp.float32)

    # One-time parameter prep (reshapes + bf16 W2), outside the per-step path.
    params = prepare_params(w1, b1, w2, gamma, beta)

    out = fused_se_conv_bn(x227, x230, *params)
    jax.block_until_ready(out)
    assert out.shape == (N, C_OUT, H, W), out.shape

    ref = _reference(x227, x230, w1, b1, w2, gamma, beta)
    err = float(jnp.max(jnp.abs(out - ref)))
    # Deliberate bf16-MXU precision tradeoff (f32 accumulation): expected max abs err ~1e-2.
    assert err < 1e-1, f"max abs error {err}"

    # Small N>1 sanity check: exercises the batched loop and cross-batch (two-pass) BN stats.
    N2, Hs, Ws = 2, 7, 7
    x227b = jax.random.normal(ks[5], (N2, C_MID, Hs, Ws), dtype=jnp.float32)
    x230b = jax.random.normal(ks[6], (N2, C_SE, 1, 1), dtype=jnp.float32)
    outb = fused_se_conv_bn(x227b, x230b, *params)
    jax.block_until_ready(outb)
    refb = _reference(x227b, x230b, w1, b1, w2, gamma, beta)
    errb = float(jnp.max(jnp.abs(outb - refb)))
    assert errb < 1e-1, f"max abs error (N=2) {errb}"

    print("KERNEL_OK")
</pallas_src>

<mosaic_0001>
module attributes {stable_mosaic.version = 11 : i64} {
  func.func @_fused_kernel(%arg0: i32, %arg1: memref<1x40xf32, #tpu.memory_space<vmem>>, %arg2: memref<1x960x196xf32, #tpu.memory_space<vmem>>, %arg3: memref<960x40xf32, #tpu.memory_space<vmem>>, %arg4: memref<960x1xf32, #tpu.memory_space<vmem>>, %arg5: memref<160x960xbf16, #tpu.memory_space<vmem>>, %arg6: memref<160x1xf32, #tpu.memory_space<vmem>>, %arg7: memref<160x1xf32, #tpu.memory_space<vmem>>, %arg8: memref<1x160x196xf32, #tpu.memory_space<vmem>>) attributes {dimension_semantics = [#tpu.dimension_semantics<arbitrary>], iteration_bounds = array<i64: 1>, scalar_prefetch = 0 : i64, scratch_operands = 0 : i64, tpu.core_type = #tpu.core_type<tc>, window_params = [{pipeline_mode = #tpu.pipeline_mode<synchronous>, transform_indices = @transform_0, window_bounds = array<i64: 1, 40>}, {pipeline_mode = #tpu.pipeline_mode<synchronous>, transform_indices = @transform_1, window_bounds = array<i64: 1, 960, 196>}, {pipeline_mode = #tpu.pipeline_mode<synchronous>, transform_indices = @transform_2, window_bounds = array<i64: 960, 40>}, {pipeline_mode = #tpu.pipeline_mode<synchronous>, transform_indices = @transform_3, window_bounds = array<i64: 960, 1>}, {pipeline_mode = #tpu.pipeline_mode<synchronous>, transform_indices = @transform_4, window_bounds = array<i64: 160, 960>}, {pipeline_mode = #tpu.pipeline_mode<synchronous>, transform_indices = @transform_5, window_bounds = array<i64: 160, 1>}, {pipeline_mode = #tpu.pipeline_mode<synchronous>, transform_indices = @transform_6, window_bounds = array<i64: 160, 1>}, {pipeline_mode = #tpu.pipeline_mode<synchronous>, transform_indices = @transform_7, window_bounds = array<i64: 1, 160, 196>}]} {
    %c0 = arith.constant 0 : index
    %c0_0 = arith.constant 0 : index
    %0 = vector.load %arg3[%c0, %c0_0] : memref<960x40xf32, #tpu.memory_space<vmem>>, vector<960x40xf32>
    %c0_1 = arith.constant 0 : index
    %c0_2 = arith.constant 0 : index
    %1 = vector.load %arg4[%c0_1, %c0_2] : memref<960x1xf32, #tpu.memory_space<vmem>>, vector<960x1xf32>
    %c0_3 = arith.constant 0 : index
    %c0_4 = arith.constant 0 : index
    %2 = vector.load %arg5[%c0_3, %c0_4] : memref<160x960xbf16, #tpu.memory_space<vmem>>, vector<160x960xbf16>
    %cst = arith.constant 0.000000e+00 : f32
    %3 = vector.broadcast %cst : f32 to vector<160x1xf32>
    %c0_5 = arith.constant 0 : index
    %c0_6 = arith.constant 0 : index
    %4 = vector.load %arg1[%c0_5, %c0_6] : memref<1x40xf32, #tpu.memory_space<vmem>>, vector<1x40xf32>
    %5 = vector.broadcast %4 : vector<1x40xf32> to vector<960x40xf32>
    %6 = arith.mulf %0, %5 : vector<960x40xf32>
    %cst_7 = arith.constant dense<0.000000e+00> : vector<960xf32>
    %7 = vector.multi_reduction <add>, %6, %cst_7 [1] : vector<960x40xf32> to vector<960xf32>
    %8 = vector.shape_cast %7 : vector<960xf32> to vector<960x1xf32>
    %9 = arith.addf %8, %1 : vector<960x1xf32>
    %10 = arith.negf %9 : vector<960x1xf32>
    %11 = math.exp %10 : vector<960x1xf32>
    %cst_8 = arith.constant 1.000000e+00 : f32
    %12 = vector.broadcast %cst_8 : f32 to vector<960x1xf32>
    %13 = arith.addf %12, %11 : vector<960x1xf32>
    %14 = arith.divf %12, %13 : vector<960x1xf32>
    %c0_9 = arith.constant 0 : index
    %c0_10 = arith.constant 0 : index
    %c0_11 = arith.constant 0 : index
    %15 = vector.load %arg2[%c0_9, %c0_10, %c0_11] : memref<1x960x196xf32, #tpu.memory_space<vmem>>, vector<1x960x196xf32>
    %16 = vector.shape_cast %15 : vector<1x960x196xf32> to vector<960x196xf32>
    %17 = vector.broadcast %14 : vector<960x1xf32> to vector<960x196xf32>
    %18 = arith.mulf %16, %17 : vector<960x196xf32>
    %19 = arith.truncf %18 : vector<960x196xf32> to vector<960x196xbf16>
    %cst_12 = arith.constant dense<0.000000e+00> : vector<160x196xf32>
    %20 = tpu.matmul %2, %19, %cst_12 {dimension_numbers = #tpu.dot_dimension_numbers<[1], [0], [0], [1], [0, 0, 1, 1], [], []>} : vector<160x960xbf16>, vector<960x196xbf16>, vector<160x196xf32> -> vector<160x196xf32>
    %c0_13 = arith.constant 0 : index
    %c0_14 = arith.constant 0 : index
    %c0_15 = arith.constant 0 : index
    %21 = vector.load %arg8[%c0_13, %c0_14, %c0_15] : memref<1x160x196xf32, #tpu.memory_space<vmem>>, vector<1x160x196xf32>
    %22 = vector.shape_cast %21 : vector<1x160x196xf32> to vector<160x196xf32>
    %23 = vector.shape_cast %20 : vector<160x196xf32> to vector<1x160x196xf32>
    tpu.vector_store %arg8[%c0_13, %c0_14, %c0_15], %23 {strides = array<i32>} : memref<1x160x196xf32, #tpu.memory_space<vmem>>, vector<1x160x196xf32>,
    %cst_16 = arith.constant dense<0.000000e+00> : vector<160xf32>
    %24 = vector.multi_reduction <add>, %20, %cst_16 [1] : vector<160x196xf32> to vector<160xf32>
    %25 = vector.shape_cast %24 : vector<160xf32> to vector<160x1xf32>
    %26 = arith.addf %3, %25 : vector<160x1xf32>
    %cst_17 = arith.constant 0.00510204071 : f32
    %27 = vector.broadcast %cst_17 : f32 to vector<160x1xf32>
    %28 = arith.mulf %26, %27 : vector<160x1xf32>
    %cst_18 = arith.constant 0.000000e+00 : f32
    %29 = vector.broadcast %cst_18 : f32 to vector<160x1xf32>
    %c0_19 = arith.constant 0 : index
    %c0_20 = arith.constant 0 : index
    %c0_21 = arith.constant 0 : index
    %30 = vector.load %arg8[%c0_19, %c0_20, %c0_21] : memref<1x160x196xf32, #tpu.memory_space<vmem>>, vector<1x160x196xf32>
    %31 = vector.shape_cast %30 : vector<1x160x196xf32> to vector<160x196xf32>
    %32 = vector.broadcast %28 : vector<160x1xf32> to vector<160x196xf32>
    %33 = arith.subf %31, %32 : vector<160x196xf32>
    %34 = arith.mulf %33, %33 : vector<160x196xf32>
    %cst_22 = arith.constant dense<0.000000e+00> : vector<160xf32>
    %35 = vector.multi_reduction <add>, %34, %cst_22 [1] : vector<160x196xf32> to vector<160xf32>
    %36 = vector.shape_cast %35 : vector<160xf32> to vector<160x1xf32>
    %37 = arith.addf %29, %36 : vector<160x1xf32>
    %cst_23 = arith.constant 0.00510204071 : f32
    %38 = vector.broadcast %cst_23 : f32 to vector<160x1xf32>
    %39 = arith.mulf %37, %38 : vector<160x1xf32>
    %cst_24 = arith.constant 1.000000e-03 : f32
    %40 = vector.broadcast %cst_24 : f32 to vector<160x1xf32>
    %41 = arith.addf %39, %40 : vector<160x1xf32>
    %42 = math.rsqrt %41 : vector<160x1xf32>
    %c0_25 = arith.constant 0 : index
    %c0_26 = arith.constant 0 : index
    %43 = vector.load %arg6[%c0_25, %c0_26] : memref<160x1xf32, #tpu.memory_space<vmem>>, vector<160x1xf32>
    %44 = arith.mulf %42, %43 : vector<160x1xf32>
    %c0_27 = arith.constant 0 : index
    %c0_28 = arith.constant 0 : index
    %45 = vector.load %arg7[%c0_27, %c0_28] : memref<160x1xf32, #tpu.memory_space<vmem>>, vector<160x1xf32>
    %46 = arith.mulf %28, %44 : vector<160x1xf32>
    %47 = arith.subf %45, %46 : vector<160x1xf32>
    %c0_29 = arith.constant 0 : index
    %c0_30 = arith.constant 0 : index
    %c0_31 = arith.constant 0 : index
    %48 = vector.load %arg8[%c0_29, %c0_30, %c0_31] : memref<1x160x196xf32, #tpu.memory_space<vmem>>, vector<1x160x196xf32>
    %49 = vector.shape_cast %48 : vector<1x160x196xf32> to vector<160x196xf32>
    %50 = vector.broadcast %44 : vector<160x1xf32> to vector<160x196xf32>
    %51 = arith.mulf %49, %50 : vector<160x196xf32>
    %52 = vector.broadcast %47 : vector<160x1xf32> to vector<160x196xf32>
    %53 = arith.addf %51, %52 : vector<160x196xf32>
    %c0_32 = arith.constant 0 : index
    %c0_33 = arith.constant 0 : index
    %c0_34 = arith.constant 0 : index
    %54 = vector.load %arg8[%c0_32, %c0_33, %c0_34] : memref<1x160x196xf32, #tpu.memory_space<vmem>>, vector<1x160x196xf32>
    %55 = vector.shape_cast %54 : vector<1x160x196xf32> to vector<160x196xf32>
    %56 = vector.shape_cast %53 : vector<160x196xf32> to vector<1x160x196xf32>
    tpu.vector_store %arg8[%c0_32, %c0_33, %c0_34], %56 {strides = array<i32>} : memref<1x160x196xf32, #tpu.memory_space<vmem>>, vector<1x160x196xf32>,
    return
  }
  func.func @transform_0(%arg0: i32) -> (i32, i32) {
    %c0_i32 = arith.constant 0 : i32
    %c0_i32_0 = arith.constant 0 : i32
    %c0_i32_1 = arith.constant 0 : i32
    return %c0_i32, %c0_i32_0 : i32, i32
  }
  func.func @transform_1(%arg0: i32) -> (i32, i32, i32) {
    %c0_i32 = arith.constant 0 : i32
    %c0_i32_0 = arith.constant 0 : i32
    %c0_i32_1 = arith.constant 0 : i32
    %c0_i32_2 = arith.constant 0 : i32
    return %c0_i32, %c0_i32_0, %c0_i32_1 : i32, i32, i32
  }
  func.func @transform_2(%arg0: i32) -> (i32, i32) {
    %c0_i32 = arith.constant 0 : i32
    %c0_i32_0 = arith.constant 0 : i32
    %c0_i32_1 = arith.constant 0 : i32
    return %c0_i32, %c0_i32_0 : i32, i32
  }
  func.func @transform_3(%arg0: i32) -> (i32, i32) {
    %c0_i32 = arith.constant 0 : i32
    %c0_i32_0 = arith.constant 0 : i32
    %c0_i32_1 = arith.constant 0 : i32
    return %c0_i32, %c0_i32_0 : i32, i32
  }
  func.func @transform_4(%arg0: i32) -> (i32, i32) {
    %c0_i32 = arith.constant 0 : i32
    %c0_i32_0 = arith.constant 0 : i32
    %c0_i32_1 = arith.constant 0 : i32
    return %c0_i32, %c0_i32_0 : i32, i32
  }
  func.func @transform_5(%arg0: i32) -> (i32, i32) {
    %c0_i32 = arith.constant 0 : i32
    %c0_i32_0 = arith.constant 0 : i32
    %c0_i32_1 = arith.constant 0 : i32
    return %c0_i32, %c0_i32_0 : i32, i32
  }
  func.func @transform_6(%arg0: i32) -> (i32, i32) {
    %c0_i32 = arith.constant 0 : i32
    %c0_i32_0 = arith.constant 0 : i32
    %c0_i32_1 = arith.constant 0 : i32
    return %c0_i32, %c0_i32_0 : i32, i32
  }
  func.func @transform_7(%arg0: i32) -> (i32, i32, i32) {
    %c0_i32 = arith.constant 0 : i32
    %c0_i32_0 = arith.constant 0 : i32
    %c0_i32_1 = arith.constant 0 : i32
    %c0_i32_2 = arith.constant 0 : i32
    return %c0_i32, %c0_i32_0, %c0_i32_1 : i32, i32, i32
  }
}

</mosaic_0001>

<bundles_post_ra>
// kernel: fused_se_conv_bn.1
= control target key start
LH: loop header
LB: loop body
LE: loop exit
PB: predicated region body
PF: predicated region fallthrough
CT: control target
= control target key end

     0   :  { %vm474_vm0 = vcmask 326656   ;;  %vm3265_vm1 = vcmask 523264   ;;  %vm3829_vm2 = vcmask 556032   ;;  %s9194_s0 = inlined_call_operand.vmem [shape: f32[1,40], index: 0, kind: input, shape index: {}]   ;;  %s9195_s2 = inlined_call_operand.vmem [shape: f32[960,40], index: 2, kind: input, shape index: {}]   ;;  %s9196_s3 = inlined_call_operand.vmem [shape: f32[960,1], index: 3, kind: input, shape index: {}]   ;;  %s9197_s4 = inlined_call_operand.vmem [shape: bf16[160,960], index: 4, kind: input, shape index: {}]   ;;  %s9198_s1 = inlined_call_operand.vmem [shape: f32[1,960,196], index: 1, kind: input, shape index: {}]   ;;  %s9199_s7 = inlined_call_operand.vmem [shape: f32[1,160,196], index: 7, kind: output, shape index: {}]   ;;  %s9200_s5 = inlined_call_operand.vmem [shape: f32[160,1], index: 5, kind: input, shape index: {}]   ;;  %s9201_s6 = inlined_call_operand.vmem [shape: f32[160,1], index: 6, kind: input, shape index: {}]  }
   0x1   :  { %v29_v0 = vld [vmem:[%s9195_s2 + $0x10] sm:$0xff]  ;;  %v5475_v1 = vld [vmem:[%s9194_s0] ss:$0 sm:$0xff]  ;;  %v30_v5 = vld [vmem:[%s9195_s2 + $0x18] sm:$0xff] }
   0x2   :  { %v27_v2 = vld [vmem:[%s9195_s2] sm:$0xff]  ;;  %v356_v3 = vmul.f32 %v5475_v1, %v29_v0  ;;  %v28_v6 = vld [vmem:[%s9195_s2 + $0x8] sm:$0xff]  ;;  %v357_v7 = vmul.f32 %v5475_v1, %v30_v5  ;;  %v34_v17 = vld [vmem:[%s9195_s2 + $0x38] sm:$0xff] }
   0x3   :  { %v354_v4 = vmul.f32 %v5475_v1, %v27_v2  ;;  %v355_v8 = vmul.f32 %v5475_v1, %v28_v6  ;;  %v32_v9 = vld [vmem:[%s9195_s2 + $0x28] sm:$0xff]  ;;  %v31_v10 = vld [vmem:[%s9195_s2 + $0x20] sm:$0xff]  ;;  %v33_v18 = vld [vmem:[%s9195_s2 + $0x30] sm:$0xff]  ;;  %v361_v21 = vmul.f32 %v5475_v1, %v34_v17 }
   0x4   :  { %v481_v11 = vsel %vm474_vm0, %v356_v3, 0.0  ;;  %v484_v13 = vsel %vm474_vm0, %v357_v7, 0.0  ;;  %v359_v15 = vmul.f32 %v5475_v1, %v32_v9  ;;  %v358_v16 = vmul.f32 %v5475_v1, %v31_v10  ;;  %v36_v23 = vld [vmem:[%s9195_s2 + $0x48] sm:$0xff]  ;;  %v35_v24 = vld [vmem:[%s9195_s2 + $0x40] sm:$0xff]  ;;  %v38_v29 = vld [vmem:[%s9195_s2 + $0x58] sm:$0xff] }
   0x5   :  { %v475_v12 = vsel %vm474_vm0, %v354_v4, 0.0  ;;  %482 = vadd.xlane.f32.xlu1 %v481_v11  ;;  %v478_v14 = vsel %vm474_vm0, %v355_v8, 0.0  ;;  %v360_v22 = vmul.f32 %v5475_v1, %v33_v18  ;;  %v496_v25 = vsel %vm474_vm0, %v361_v21, 0.0  ;;  %v37_v30 = vld [vmem:[%s9195_s2 + $0x50] sm:$0xff]  ;;  %v40_v35 = vld [vmem:[%s9195_s2 + $0x68] sm:$0xff]  ;;  %v39_v36 = vld [vmem:[%s9195_s2 + $0x60] sm:$0xff] }
   0x6   :  { %476 = vadd.xlane.f32.xlu0 %v475_v12  ;;  %v490_v19 = vsel %vm474_vm0, %v359_v15, 0.0  ;;  %v487_v20 = vsel %vm474_vm0, %v358_v16, 0.0  ;;  %v363_v27 = vmul.f32 %v5475_v1, %v36_v23  ;;  %v362_v28 = vmul.f32 %v5475_v1, %v35_v24  ;;  %v42_v41 = vld [vmem:[%s9195_s2 + $0x78] sm:$0xff]  ;;  %v41_v42 = vld [vmem:[%s9195_s2 + $0x70] sm:$0xff]  ;;  %v44_v47 = vld [vmem:[%s9195_s2 + $0x88] sm:$0xff] }
   0x7   :  { %v493_v26 = vsel %vm474_vm0, %v360_v22, 0.0  ;;  %v365_v33 = vmul.f32 %v5475_v1, %v38_v29  ;;  %v364_v34 = vmul.f32 %v5475_v1, %v37_v30  ;;  %v367_v39 = vmul.f32 %v5475_v1, %v40_v35  ;;  %v43_v48 = vld [vmem:[%s9195_s2 + $0x80] sm:$0xff]  ;;  %v46_v53 = vld [vmem:[%s9195_s2 + $0x98] sm:$0xff]  ;;  %v45_v54 = vld [vmem:[%s9195_s2 + $0x90] sm:$0xff] }
   0x8   :  { %v502_v31 = vsel %vm474_vm0, %v363_v27, 0.0  ;;  %v499_v32 = vsel %vm474_vm0, %v362_v28, 0.0  ;;  %v366_v40 = vmul.f32 %v5475_v1, %v39_v36  ;;  %v369_v45 = vmul.f32 %v5475_v1, %v42_v41  ;;  %v48_v59 = vld [vmem:[%s9195_s2 + $0xa8] sm:$0xff]  ;;  %v47_v60 = vld [vmem:[%s9195_s2 + $0xa0] sm:$0xff]  ;;  %v50_v2 = vld [vmem:[%s9195_s2 + $0xb8] sm:$0xff] }
   0x9   :  { %485 = vadd.xlane.f32.xlu1 %v484_v13  ;;  %v508_v37 = vsel %vm474_vm0, %v365_v33, 0.0  ;;  %v505_v38 = vsel %vm474_vm0, %v364_v34, 0.0  ;;  %v514_v43 = vsel %vm474_vm0, %v367_v39, 0.0  ;;  %v368_v46 = vmul.f32 %v5475_v1, %v41_v42  ;;  %v49_v3 = vld [vmem:[%s9195_s2 + $0xb0] sm:$0xff]  ;;  %v52_v8 = vld [vmem:[%s9195_s2 + $0xc8] sm:$0xff]  ;;  %v51_v9 = vld [vmem:[%s9195_s2 + $0xc0] sm:$0xff] }
   0xa   :  { %479 = vadd.xlane.f32.xlu0 %v478_v14  ;;  %v511_v44 = vsel %vm474_vm0, %v366_v40, 0.0  ;;  %v520_v49 = vsel %vm474_vm0, %v369_v45, 0.0  ;;  %v371_v51 = vmul.f32 %v5475_v1, %v44_v47  ;;  %v370_v52 = vmul.f32 %v5475_v1, %v43_v48  ;;  %v54_v14 = vld [vmem:[%s9195_s2 + $0xd8] sm:$0xff]  ;;  %v53_v15 = vld [vmem:[%s9195_s2 + $0xd0] sm:$0xff]  ;;  %v55_v21 = vld [vmem:[%s9195_s2 + $0xe0] sm:$0xff] }
   0xb   :  { %v517_v50 = vsel %vm474_vm0, %v368_v46, 0.0  ;;  %v373_v57 = vmul.f32 %v5475_v1, %v46_v53  ;;  %v372_v58 = vmul.f32 %v5475_v1, %v45_v54  ;;  %v375_v63 = vmul.f32 %v5475_v1, %v48_v59  ;;  %v57_v27 = vld [vmem:[%s9195_s2 + $0xf0] sm:$0xff]  ;;  %v59_v33 = vld [vmem:[%s9195_s2 + $0x100] sm:$0xff] }
   0xc   :  { %v526_v55 = vsel %vm474_vm0, %v371_v51, 0.0  ;;  %v523_v56 = vsel %vm474_vm0, %v370_v52, 0.0  ;;  %v374_v0 = vmul.f32 %v5475_v1, %v47_v60  ;;  %v377_v6 = vmul.f32 %v5475_v1, %v50_v2  ;;  %v61_v39 = vld [vmem:[%s9195_s2 + $0x110] sm:$0xff]  ;;  %v63_v45 = vld [vmem:[%s9195_s2 + $0x120] sm:$0xff] }
   0xd   :  { %491 = vadd.xlane.f32.xlu1 %v490_v19  ;;  %v532_v61 = vsel %vm474_vm0, %v373_v57, 0.0  ;;  %v529_v62 = vsel %vm474_vm0, %v372_v58, 0.0  ;;  %v538_v4 = vsel %vm474_vm0, %v375_v63, 0.0  ;;  %v376_v7 = vmul.f32 %v5475_v1, %v49_v3  ;;  %v65_v51 = vld [vmem:[%s9195_s2 + $0x130] sm:$0xff]  ;;  %v67_v57 = vld [vmem:[%s9195_s2 + $0x140] sm:$0xff] }
   0xe   :  { %488 = vadd.xlane.f32.xlu0 %v487_v20  ;;  %v535_v5 = vsel %vm474_vm0, %v374_v0, 0.0  ;;  %v544_v10 = vsel %vm474_vm0, %v377_v6, 0.0  ;;  %v379_v12 = vmul.f32 %v5475_v1, %v52_v8  ;;  %v378_v13 = vmul.f32 %v5475_v1, %v51_v9  ;;  %v56_v20 = vld [vmem:[%s9195_s2 + $0xe8] sm:$0xff]  ;;  %v69_v63 = vld [vmem:[%s9195_s2 + $0x150] sm:$0xff]  ;;  %v71_v6 = vld [vmem:[%s9195_s2 + $0x160] sm:$0xff] }
   0xf   :  { %v541_v11 = vsel %vm474_vm0, %v376_v7, 0.0  ;;  %v381_v18 = vmul.f32 %v5475_v1, %v54_v14  ;;  %v380_v19 = vmul.f32 %v5475_v1, %v53_v15  ;;  %v383_v24 = vmul.f32 %v5475_v1, %v56_v20 }
  0x10   :  { %v550_v16 = vsel %vm474_vm0, %v379_v12, 0.0  ;;  %v547_v17 = vsel %vm474_vm0, %v378_v13, 0.0  ;;  %v73_v12 = vld [vmem:[%s9195_s2 + $0x170] sm:$0xff] }
  0x11   :  { %497 = vadd.xlane.f32.xlu1 %v496_v25  ;;  %v556_v22 = vsel %vm474_vm0, %v381_v18, 0.0  ;;  %v553_v23 = vsel %vm474_vm0, %v380_v19, 0.0  ;;  %v382_v25 = vmul.f32 %v5475_v1, %v55_v21  ;;  %v562_v28 = vsel %vm474_vm0, %v383_v24, 0.0  ;;  %v75_v18 = vld [vmem:[%s9195_s2 + $0x180] sm:$0xff]  ;;  %v77_v24 = vld [vmem:[%s9195_s2 + $0x190] sm:$0xff] }
  0x12   :  { %494 = vadd.xlane.f32.xlu0 %v493_v26  ;;  %v58_v26 = vld [vmem:[%s9195_s2 + $0xf8] sm:$0xff] }
  0x13   :  { %v559_v29 = vsel %vm474_vm0, %v382_v25, 0.0  ;;  %v385_v30 = vmul.f32 %v5475_v1, %v58_v26 }
  0x15   :  { %503 = vadd.xlane.f32.xlu1 %v502_v31  ;;  %v384_v31 = vmul.f32 %v5475_v1, %v57_v27  ;;  %v568_v34 = vsel %vm474_vm0, %v385_v30, 0.0  ;;  %v79_v30 = vld [vmem:[%s9195_s2 + $0x1a0] sm:$0xff] }
  0x16   :  { %500 = vadd.xlane.f32.xlu0 %v499_v32  ;;  %v60_v32 = vld [vmem:[%s9195_s2 + $0x108] sm:$0xff] }
  0x17   :  { %v565_v35 = vsel %vm474_vm0, %v384_v31, 0.0  ;;  %v387_v36 = vmul.f32 %v5475_v1, %v60_v32 }
  0x19   :  { %509 = vadd.xlane.f32.xlu1 %v508_v37  ;;  %v386_v37 = vmul.f32 %v5475_v1, %v59_v33  ;;  %v574_v40 = vsel %vm474_vm0, %v387_v36, 0.0  ;;  %v81_v36 = vld [vmem:[%s9195_s2 + $0x1b0] sm:$0xff] }
  0x1a   :  { %506 = vadd.xlane.f32.xlu0 %v505_v38  ;;  %v62_v38 = vld [vmem:[%s9195_s2 + $0x118] sm:$0xff] }
  0x1b   :  { %v571_v41 = vsel %vm474_vm0, %v386_v37, 0.0  ;;  %v389_v42 = vmul.f32 %v5475_v1, %v62_v38 }
  0x1d   :  { %515 = vadd.xlane.f32.xlu1 %v514_v43  ;;  %v388_v43 = vmul.f32 %v5475_v1, %v61_v39  ;;  %v580_v46 = vsel %vm474_vm0, %v389_v42, 0.0  ;;  %v83_v42 = vld [vmem:[%s9195_s2 + $0x1c0] sm:$0xff] }
  0x1e   :  { %512 = vadd.xlane.f32.xlu0 %v511_v44  ;;  %v64_v44 = vld [vmem:[%s9195_s2 + $0x128] sm:$0xff] }
  0x1f   :  { %v577_v47 = vsel %vm474_vm0, %v388_v43, 0.0  ;;  %v391_v48 = vmul.f32 %v5475_v1, %v64_v44 }
  0x21   :  { %521 = vadd.xlane.f32.xlu1 %v520_v49  ;;  %v390_v49 = vmul.f32 %v5475_v1, %v63_v45  ;;  %v586_v52 = vsel %vm474_vm0, %v391_v48, 0.0  ;;  %v85_v48 = vld [vmem:[%s9195_s2 + $0x1d0] sm:$0xff] }
  0x22   :  { %518 = vadd.xlane.f32.xlu0 %v517_v50  ;;  %v66_v50 = vld [vmem:[%s9195_s2 + $0x138] sm:$0xff] }
  0x23   :  { %v583_v53 = vsel %vm474_vm0, %v390_v49, 0.0  ;;  %v393_v54 = vmul.f32 %v5475_v1, %v66_v50 }
  0x25   :  { %527 = vadd.xlane.f32.xlu1 %v526_v55  ;;  %v392_v55 = vmul.f32 %v5475_v1, %v65_v51  ;;  %v592_v58 = vsel %vm474_vm0, %v393_v54, 0.0  ;;  %v87_v54 = vld [vmem:[%s9195_s2 + $0x1e0] sm:$0xff] }
  0x26   :  { %524 = vadd.xlane.f32.xlu0 %v523_v56  ;;  %v68_v56 = vld [vmem:[%s9195_s2 + $0x148] sm:$0xff] }
  0x27   :  { %v589_v59 = vsel %vm474_vm0, %v392_v55, 0.0  ;;  %v395_v60 = vmul.f32 %v5475_v1, %v68_v56 }
  0x29   :  { %533 = vadd.xlane.f32.xlu1 %v532_v61  ;;  %v394_v61 = vmul.f32 %v5475_v1, %v67_v57  ;;  %v598_v0 = vsel %vm474_vm0, %v395_v60, 0.0  ;;  %v89_v60 = vld [vmem:[%s9195_s2 + $0x1f0] sm:$0xff] }
  0x2a   :  { %530 = vadd.xlane.f32.xlu0 %v529_v62  ;;  %v70_v62 = vld [vmem:[%s9195_s2 + $0x158] sm:$0xff] }
  0x2b   :  { %v595_v2 = vsel %vm474_vm0, %v394_v61, 0.0  ;;  %v397_v3 = vmul.f32 %v5475_v1, %v70_v62 }
  0x2d   :  { %539 = vadd.xlane.f32.xlu1 %v538_v4  ;;  %v396_v4 = vmul.f32 %v5475_v1, %v69_v63  ;;  %v604_v7 = vsel %vm474_vm0, %v397_v3, 0.0  ;;  %v91_v3 = vld [vmem:[%s9195_s2 + $0x200] sm:$0xff] }
  0x2e   :  { %536 = vadd.xlane.f32.xlu0 %v535_v5  ;;  %v72_v5 = vld [vmem:[%s9195_s2 + $0x168] sm:$0xff] }
  0x2f   :  { %v601_v8 = vsel %vm474_vm0, %v396_v4, 0.0  ;;  %v399_v9 = vmul.f32 %v5475_v1, %v72_v5 }
  0x31   :  { %545 = vadd.xlane.f32.xlu1 %v544_v10  ;;  %v398_v10 = vmul.f32 %v5475_v1, %v71_v6  ;;  %v610_v13 = vsel %vm474_vm0, %v399_v9, 0.0  ;;  %v93_v9 = vld [vmem:[%s9195_s2 + $0x210] sm:$0xff] }
  0x32   :  { %542 = vadd.xlane.f32.xlu0 %v541_v11  ;;  %v74_v11 = vld [vmem:[%s9195_s2 + $0x178] sm:$0xff] }
  0x33   :  { %v607_v14 = vsel %vm474_vm0, %v398_v10, 0.0  ;;  %v401_v15 = vmul.f32 %v5475_v1, %v74_v11 }
  0x35   :  { %551 = vadd.xlane.f32.xlu1 %v550_v16  ;;  %v400_v16 = vmul.f32 %v5475_v1, %v73_v12  ;;  %v616_v19 = vsel %vm474_vm0, %v401_v15, 0.0  ;;  %v95_v15 = vld [vmem:[%s9195_s2 + $0x220] sm:$0xff] }
  0x36   :  { %548 = vadd.xlane.f32.xlu0 %v547_v17  ;;  %v76_v17 = vld [vmem:[%s9195_s2 + $0x188] sm:$0xff] }
  0x37   :  { %v613_v20 = vsel %vm474_vm0, %v400_v16, 0.0  ;;  %v403_v21 = vmul.f32 %v5475_v1, %v76_v17  ;;  %v5428_v16 = vmov 0  }
  0x38   :  { %4906 = vset.pattern.permute.xlu1 %v5428_v16  ;;  %4905 = vset.pattern.permute.xlu0 %v5428_v16 }
  0x39   :  { %557 = vadd.xlane.f32.xlu1 %v556_v22  ;;  %v402_v22 = vmul.f32 %v5475_v1, %v75_v18  ;;  %v622_v25 = vsel %vm474_vm0, %v403_v21, 0.0  ;;  %v98_v21 = vld [vmem:[%s9195_s2 + $0x238] sm:$0xff] }
  0x3a   :  { %554 = vadd.xlane.f32.xlu0 %v553_v23  ;;  %v78_v23 = vld [vmem:[%s9195_s2 + $0x198] sm:$0xff] }
  0x3b   :  { %v619_v26 = vsel %vm474_vm0, %v402_v22, 0.0  ;;  %v405_v27 = vmul.f32 %v5475_v1, %v78_v23  ;;  %v97_v22 = vld [vmem:[%s9195_s2 + $0x230] sm:$0xff] }
  0x3d   :  { %563 = vadd.xlane.f32.xlu1 %v562_v28  ;;  %v404_v28 = vmul.f32 %v5475_v1, %v77_v24  ;;  %v628_v31 = vsel %vm474_vm0, %v405_v27, 0.0  ;;  %v100_v27 = vld [vmem:[%s9195_s2 + $0x248] sm:$0xff] }
  0x3e   :  { %560 = vadd.xlane.f32.xlu0 %v559_v29  ;;  %v80_v29 = vld [vmem:[%s9195_s2 + $0x1a8] sm:$0xff] }
  0x3f   :  { %v625_v32 = vsel %vm474_vm0, %v404_v28, 0.0  ;;  %v407_v33 = vmul.f32 %v5475_v1, %v80_v29  ;;  %v99_v28 = vld [vmem:[%s9195_s2 + $0x240] sm:$0xff] }
  0x41   :  { %569 = vadd.xlane.f32.xlu1 %v568_v34  ;;  %v406_v34 = vmul.f32 %v5475_v1, %v79_v30  ;;  %v634_v37 = vsel %vm474_vm0, %v407_v33, 0.0  ;;  %v427_v33 = vmul.f32 %v5475_v1, %v100_v27 }
  0x42   :  { %566 = vadd.xlane.f32.xlu0 %v565_v35  ;;  %v82_v35 = vld [vmem:[%s9195_s2 + $0x1b8] sm:$0xff] }
  0x43   :  { %v631_v38 = vsel %vm474_vm0, %v406_v34, 0.0  ;;  %v409_v39 = vmul.f32 %v5475_v1, %v82_v35  ;;  %v426_v34 = vmul.f32 %v5475_v1, %v99_v28  ;;  %v102_v35 = vld [vmem:[%s9195_s2 + $0x258] sm:$0xff]  ;;  %v116_v28 = vld [vmem:[%s9195_s2 + $0x2c8] sm:$0xff] }
  0x45   :  { %575 = vadd.xlane.f32.xlu1 %v574_v40  ;;  %v408_v40 = vmul.f32 %v5475_v1, %v81_v36  ;;  %v640_v43 = vsel %vm474_vm0, %v409_v39, 0.0  ;;  %v101_v36 = vld [vmem:[%s9195_s2 + $0x250] sm:$0xff]  ;;  %v694_v39 = vsel %vm474_vm0, %v427_v33, 0.0 }
  0x46   :  { %572 = vadd.xlane.f32.xlu0 %v571_v41  ;;  %v84_v41 = vld [vmem:[%s9195_s2 + $0x1c8] sm:$0xff] }
  0x47   :  { %v637_v44 = vsel %vm474_vm0, %v408_v40, 0.0  ;;  %v411_v45 = vmul.f32 %v5475_v1, %v84_v41  ;;  %v691_v40 = vsel %vm474_vm0, %v426_v34, 0.0  ;;  %v429_v41 = vmul.f32 %v5475_v1, %v102_v35 }
  0x49   :  { %581 = vadd.xlane.f32.xlu1 %v580_v46  ;;  %v410_v46 = vmul.f32 %v5475_v1, %v83_v42  ;;  %v646_v49 = vsel %vm474_vm0, %v411_v45, 0.0  ;;  %v428_v42 = vmul.f32 %v5475_v1, %v101_v36  ;;  %v443_v36 = vmul.f32 %v5475_v1, %v116_v28 }
  0x4a   :  { %578 = vadd.xlane.f32.xlu0 %v577_v47  ;;  %v86_v47 = vld [vmem:[%s9195_s2 + $0x1d8] sm:$0xff] }
  0x4b   :  { %v643_v50 = vsel %vm474_vm0, %v410_v46, 0.0  ;;  %v413_v51 = vmul.f32 %v5475_v1, %v86_v47  ;;  %v700_v47 = vsel %vm474_vm0, %v429_v41, 0.0  ;;  %v117_v41 = vld [vmem:[%s9195_s2 + $0x2d0] sm:$0xff] }
  0x4d   :  { %587 = vadd.xlane.f32.xlu1 %v586_v52  ;;  %v412_v52 = vmul.f32 %v5475_v1, %v85_v48  ;;  %v652_v55 = vsel %vm474_vm0, %v413_v51, 0.0  ;;  %v697_v48 = vsel %vm474_vm0, %v428_v42, 0.0  ;;  %v106_v51 = vld [vmem:[%s9195_s2 + $0x278] sm:$0xff] }
  0x4e   :  { %584 = vadd.xlane.f32.xlu0 %v583_v53  ;;  %v88_v53 = vld [vmem:[%s9195_s2 + $0x1e8] sm:$0xff] }
  0x4f   :  { %v649_v56 = vsel %vm474_vm0, %v412_v52, 0.0  ;;  %v415_v57 = vmul.f32 %v5475_v1, %v88_v53  ;;  %v105_v52 = vld [vmem:[%s9195_s2 + $0x270] sm:$0xff] }
  0x51   :  { %593 = vadd.xlane.f32.xlu1 %v592_v58  ;;  %v414_v58 = vmul.f32 %v5475_v1, %v87_v54  ;;  %v658_v61 = vsel %vm474_vm0, %v415_v57, 0.0  ;;  %v433_v57 = vmul.f32 %v5475_v1, %v106_v51  ;;  %v119_v51 = vld [vmem:[%s9195_s2 + $0x2e0] sm:$0xff] }
  0x52   :  { %590 = vadd.xlane.f32.xlu0 %v589_v59  ;;  %v90_v59 = vld [vmem:[%s9195_s2 + $0x1f8] sm:$0xff] }
  0x53   :  { %v655_v62 = vsel %vm474_vm0, %v414_v58, 0.0  ;;  %v417_v63 = vmul.f32 %v5475_v1, %v90_v59  ;;  %v432_v58 = vmul.f32 %v5475_v1, %v105_v52  ;;  %v108_v59 = vld [vmem:[%s9195_s2 + $0x288] sm:$0xff] }
  0x55   :  { %599 = vadd.xlane.f32.xlu1 %v598_v0  ;;  %v416_v0 = vmul.f32 %v5475_v1, %v89_v60  ;;  %v664_v4 = vsel %vm474_vm0, %v417_v63, 0.0  ;;  %v107_v60 = vld [vmem:[%s9195_s2 + $0x280] sm:$0xff]  ;;  %v712_v63 = vsel %vm474_vm0, %v433_v57, 0.0 }
  0x56   :  { %596 = vadd.xlane.f32.xlu0 %v595_v2  ;;  %v92_v2 = vld [vmem:[%s9195_s2 + $0x208] sm:$0xff] }
  0x57   :  { %v661_v5 = vsel %vm474_vm0, %v416_v0, 0.0  ;;  %v419_v6 = vmul.f32 %v5475_v1, %v92_v2  ;;  %v709_v0 = vsel %vm474_vm0, %v432_v58, 0.0  ;;  %v435_v2 = vmul.f32 %v5475_v1, %v108_v59 }
  0x58   :  { %v446_v59 = vmul.f32 %v5475_v1, %v119_v51 }
  0x59   :  { %605 = vadd.xlane.f32.xlu1 %v604_v7  ;;  %v418_v7 = vmul.f32 %v5475_v1, %v91_v3  ;;  %v670_v10 = vsel %vm474_vm0, %v419_v6, 0.0  ;;  %v434_v3 = vmul.f32 %v5475_v1, %v107_v60  ;;  %v122_v60 = vld [vmem:[%s9195_s2 + $0x2f8] sm:$0xff] }
  0x5a   :  { %602 = vadd.xlane.f32.xlu0 %v601_v8  ;;  %v94_v8 = vld [vmem:[%s9195_s2 + $0x218] sm:$0xff] }
  0x5b   :  { %v667_v11 = vsel %vm474_vm0, %v418_v7, 0.0  ;;  %v421_v12 = vmul.f32 %v5475_v1, %v94_v8  ;;  %v718_v8 = vsel %vm474_vm0, %v435_v2, 0.0 }
  0x5d   :  { %611 = vadd.xlane.f32.xlu1 %v610_v13  ;;  %v420_v13 = vmul.f32 %v5475_v1, %v93_v9  ;;  %v676_v17 = vsel %vm474_vm0, %v421_v12, 0.0  ;;  %v715_v9 = vsel %vm474_vm0, %v434_v3, 0.0  ;;  %v112_v12 = vld [vmem:[%s9195_s2 + $0x2a8] sm:$0xff] }
  0x5e   :  { %608 = vadd.xlane.f32.xlu0 %v607_v14  ;;  %v96_v14 = vld [vmem:[%s9195_s2 + $0x228] sm:$0xff] }
  0x5f   :  { %v673_v18 = vsel %vm474_vm0, %v420_v13, 0.0  ;;  %v111_v13 = vld [vmem:[%s9195_s2 + $0x2a0] sm:$0xff] }
  0x61   :  { %617 = vadd.xlane.f32.xlu1 %v616_v19  ;;  %v423_v19 = vmul.f32 %v5475_v1, %v96_v14 }
  0x62   :  { %614 = vadd.xlane.f32.xlu0 %v613_v20  ;;  %v422_v20 = vmul.f32 %v5475_v1, %v95_v15 }
  0x63   :  { %v682_v23 = vsel %vm474_vm0, %v423_v19, 0.0  ;;  %v438_v19 = vmul.f32 %v5475_v1, %v111_v13 }
  0x64   :  { %v679_v24 = vsel %vm474_vm0, %v422_v20, 0.0  ;;  %v114_v20 = vld [vmem:[%s9195_s2 + $0x2b8] sm:$0xff] }
  0x65   :  { %623 = vadd.xlane.f32.xlu1 %v622_v25  ;;  %v425_v25 = vmul.f32 %v5475_v1, %v98_v21  ;;  %v113_v21 = vld [vmem:[%s9195_s2 + $0x2b0] sm:$0xff] }
  0x66   :  { %620 = vadd.xlane.f32.xlu0 %v619_v26  ;;  %v424_v26 = vmul.f32 %v5475_v1, %v97_v22  ;;  %v440_v27 = vmul.f32 %v5475_v1, %v113_v21 }
  0x68   :  { %v733_v35 = vsel %vm474_vm0, %v440_v27, 0.0 }
  0x69   :  { %629 = vadd.xlane.f32.xlu1 %v628_v31  ;;  %v688_v31 = vsel %vm474_vm0, %v425_v25, 0.0  ;;  %v727_v25 = vsel %vm474_vm0, %v438_v19, 0.0  ;;  %v126_v19 = vld [vmem:[%s9195_s2 + $0x318] sm:$0xff] }
  0x6a   :  { %626 = vadd.xlane.f32.xlu0 %v625_v32  ;;  %v685_v32 = vsel %vm474_vm0, %v424_v26, 0.0  ;;  %v441_v26 = vmul.f32 %v5475_v1, %v114_v20  ;;  %v125_v20 = vld [vmem:[%s9195_s2 + $0x310] sm:$0xff]  ;;  %v453_v27 = vmul.f32 %v5475_v1, %v126_v19 }
  0x6b   :  { %v452_v28 = vmul.f32 %v5475_v1, %v125_v20 }
  0x6c   :  { %v736_v34 = vsel %vm474_vm0, %v441_v26, 0.0 }
  0x6d   :  { %635 = vadd.xlane.f32.xlu1 %v634_v37 }
  0x6e   :  { %632 = vadd.xlane.f32.xlu0 %v631_v38 }
  0x71   :  { %641 = vadd.xlane.f32.xlu1 %v640_v43  ;;  %v104_v43 = vld [vmem:[%s9195_s2 + $0x268] sm:$0xff] }
  0x72   :  { %638 = vadd.xlane.f32.xlu0 %v637_v44  ;;  %v103_v44 = vld [vmem:[%s9195_s2 + $0x260] sm:$0xff] }
  0x75   :  { %647 = vadd.xlane.f32.xlu1 %v646_v49  ;;  %v431_v49 = vmul.f32 %v5475_v1, %v104_v43 }
  0x76   :  { %644 = vadd.xlane.f32.xlu0 %v643_v50  ;;  %v430_v50 = vmul.f32 %v5475_v1, %v103_v44  ;;  %v742_v44 = vsel %vm474_vm0, %v443_v36, 0.0  ;;  %v147_v36 = vld [vmem:[%s9196_s3] sm:$0xff] }
  0x79   :  { %653 = vadd.xlane.f32.xlu1 %v652_v55  ;;  %v706_v55 = vsel %vm474_vm0, %v431_v49, 0.0  ;;  %v444_v49 = vmul.f32 %v5475_v1, %v117_v41  ;;  %v772_v41 = vsel %vm474_vm0, %v453_v27, 0.0  ;;  %v154_v27 = vld [vmem:[%s9196_s3 + $0x38] sm:$0xff] }
  0x7a   :  { %650 = vadd.xlane.f32.xlu0 %v649_v56  ;;  %v703_v56 = vsel %vm474_vm0, %v430_v50, 0.0  ;;  %v120_v50 = vld [vmem:[%s9195_s2 + $0x2e8] sm:$0xff] }
  0x7b   :  { %v745_v57 = vsel %vm474_vm0, %v444_v49, 0.0  ;;  %v447_v58 = vmul.f32 %v5475_v1, %v120_v50  ;;  %v130_v49 = vld [vmem:[%s9195_s2 + $0x338] sm:$0xff]  ;;  %v129_v50 = vld [vmem:[%s9195_s2 + $0x330] sm:$0xff] }
  0x7d   :  { %659 = vadd.xlane.f32.xlu1 %v658_v61  ;;  %v754_v3 = vsel %vm474_vm0, %v447_v58, 0.0  ;;  %v148_v58 = vld [vmem:[%s9196_s3 + $0x8] sm:$0xff] }
  0x7e   :  { %656 = vadd.xlane.f32.xlu0 %v655_v62 }
  0x81   :  { %665 = vadd.xlane.f32.xlu1 %v664_v4  ;;  %v110_v4 = vld [vmem:[%s9195_s2 + $0x298] sm:$0xff] }
  0x82   :  { %662 = vadd.xlane.f32.xlu0 %v661_v5  ;;  %v109_v5 = vld [vmem:[%s9195_s2 + $0x290] sm:$0xff] }
  0x85   :  { %671 = vadd.xlane.f32.xlu1 %v670_v10  ;;  %v437_v10 = vmul.f32 %v5475_v1, %v110_v4  ;;  %v751_v4 = vsel %vm474_vm0, %v446_v59, 0.0 }
  0x86   :  { %668 = vadd.xlane.f32.xlu0 %v667_v11  ;;  %v436_v11 = vmul.f32 %v5475_v1, %v109_v5  ;;  %v449_v5 = vmul.f32 %v5475_v1, %v122_v60 }
  0x87   :  { %v724_v16 = vsel %vm474_vm0, %v437_v10, 0.0  ;;  %v123_v10 = vld [vmem:[%s9195_s2 + $0x300] sm:$0xff] }
  0x88   :  { %v760_v13 = vsel %vm474_vm0, %v449_v5, 0.0  ;;  %v131_v5 = vld [vmem:[%s9195_s2 + $0x340] sm:$0xff] }
  0x89   :  { %677 = vadd.xlane.f32.xlu1 %v676_v17  ;;  %v721_v17 = vsel %vm474_vm0, %v436_v11, 0.0  ;;  %v458_v19 = vmul.f32 %v5475_v1, %v131_v5 }
  0x8a   :  { %674 = vadd.xlane.f32.xlu0 %v673_v18  ;;  %v439_v18 = vmul.f32 %v5475_v1, %v112_v12 }
  0x8d   :  { %683 = vadd.xlane.f32.xlu1 %v682_v23 }
  0x8e   :  { %680 = vadd.xlane.f32.xlu0 %v679_v24  ;;  %v5838_v29 = vpop.xlane.xlu1 %482  ;;  %v730_v24 = vsel %vm474_vm0, %v439_v18, 0.0  ;;  %v450_v18 = vmul.f32 %v5475_v1, %v123_v10 }
  0x8f   :  { %v5840_v30 = vpop.xlane.xlu0 %476 }
  0x90   :  { %v763_v26 = vsel %vm474_vm0, %v450_v18, 0.0 }
  0x91   :  { %689 = vadd.xlane.f32.xlu1 %v688_v31  ;;  %v115_v31 = vld [vmem:[%s9195_s2 + $0x2c0] sm:$0xff] }
  0x92   :  { %686 = vadd.xlane.f32.xlu0 %v685_v32  ;;  %v5852_v37 = vpop.xlane.xlu1 %485 }
  0x93   :  { %v5854_v38 = vpop.xlane.xlu0 %479 }
  0x95   :  { %695 = vadd.xlane.f32.xlu1 %v694_v39  ;;  %v442_v39 = vmul.f32 %v5475_v1, %v115_v31  ;;  %v128_v31 = vld [vmem:[%s9195_s2 + $0x328] sm:$0xff] }
  0x96   :  { %692 = vadd.xlane.f32.xlu0 %v691_v40  ;;  %v5866_v45 = vpop.xlane.xlu1 %491  ;;  %v118_v40 = vld [vmem:[%s9195_s2 + $0x2d8] sm:$0xff] }
  0x97   :  { %v5868_v46 = vpop.xlane.xlu0 %488 }
  0x99   :  { %701 = vadd.xlane.f32.xlu1 %v700_v47  ;;  %v739_v47 = vsel %vm474_vm0, %v442_v39, 0.0 }
  0x9a   :  { %698 = vadd.xlane.f32.xlu0 %v697_v48  ;;  %v5880_v53 = vpop.xlane.xlu1 %497  ;;  %v445_v48 = vmul.f32 %v5475_v1, %v118_v40 }
  0x9b   :  { %v5882_v54 = vpop.xlane.xlu0 %494 }
  0x9d   :  { %707 = vadd.xlane.f32.xlu1 %v706_v55 }
  0x9e   :  { %704 = vadd.xlane.f32.xlu0 %v703_v56  ;;  %v5894_v61 = vpop.xlane.xlu1 %503  ;;  %v748_v56 = vsel %vm474_vm0, %v445_v48, 0.0 }
  0x9f   :  { %v5896_v62 = vpop.xlane.xlu0 %500 }
  0xa1   :  { %713 = vadd.xlane.f32.xlu1 %v712_v63  ;;  %v121_v63 = vld [vmem:[%s9195_s2 + $0x2f0] sm:$0xff] }
  0xa2   :  { %710 = vadd.xlane.f32.xlu0 %v709_v0  ;;  %v5908_v6 = vpop.xlane.xlu1 %509 }
  0xa3   :  { %v5910_v7 = vpop.xlane.xlu0 %506 }
  0xa5   :  { %719 = vadd.xlane.f32.xlu1 %v718_v8  ;;  %v448_v8 = vmul.f32 %v5475_v1, %v121_v63 }
  0xa6   :  { %716 = vadd.xlane.f32.xlu0 %v715_v9  ;;  %v5922_v14 = vpop.xlane.xlu1 %515  ;;  %v124_v9 = vld [vmem:[%s9195_s2 + $0x308] sm:$0xff] }
  0xa7   :  { %v5924_v15 = vpop.xlane.xlu0 %512 }
  0xa9   :  { %725 = vadd.xlane.f32.xlu1 %v724_v16  ;;  %v757_v16 = vsel %vm474_vm0, %v448_v8, 0.0  ;;  %v152_v8 = vld [vmem:[%s9196_s3 + $0x28] sm:$0xff] }
  0xaa   :  { %722 = vadd.xlane.f32.xlu0 %v721_v17  ;;  %v5936_v22 = vpop.xlane.xlu1 %521  ;;  %v451_v17 = vmul.f32 %v5475_v1, %v124_v9  ;;  %v840_v20 = vadd.f32 %v5866_v45, %v152_v8  ;;  %v133_v45 = vld [vmem:[%s9195_s2 + $0x350] sm:$0xff] }
  0xab   :  { %v5938_v23 = vpop.xlane.xlu0 %518 }
  0xad   :  { %731 = vadd.xlane.f32.xlu1 %v730_v24 }
  0xae   :  { %728 = vadd.xlane.f32.xlu0 %v727_v25  ;;  %v5950_v32 = vpop.xlane.xlu1 %527  ;;  %v766_v25 = vsel %vm474_vm0, %v451_v17, 0.0  ;;  %v151_v17 = vld [vmem:[%s9196_s3 + $0x20] sm:$0xff] }
  0xaf   :  { %v5952_v33 = vpop.xlane.xlu0 %524 }
  0xb1   :  { %737 = vadd.xlane.f32.xlu1 %v736_v34  ;;  %v127_v34 = vld [vmem:[%s9195_s2 + $0x320] sm:$0xff] }
  0xb2   :  { %734 = vadd.xlane.f32.xlu0 %v733_v35  ;;  %v5964_v42 = vpop.xlane.xlu1 %533  ;;  %v149_v35 = vld [vmem:[%s9196_s3 + $0x10] sm:$0xff]  ;;  %v454_v48 = vmul.f32 %v5475_v1, %v127_v34  ;;  %v839_v34 = vadd.f32 %v5868_v46, %v151_v17 }
  0xb3   :  { %v5966_v43 = vpop.xlane.xlu0 %530  ;;  %v837_v51 = vadd.f32 %v5838_v29, %v149_v35  ;;  %v153_v35 = vld [vmem:[%s9196_s3 + $0x30] sm:$0xff] }
  0xb4   :  { %v775_v29 = vsel %vm474_vm0, %v454_v48, 0.0  ;;  %v842_v48 = vadd.f32 %v5880_v53, %v154_v27  ;;  %v4698_v53 = vmul.f32 -1.442695, %v839_v34  ;;  %v157_v34 = vld [vmem:[%s9196_s3 + $0x50] sm:$0xff] }
  0xb5   :  { %743 = vadd.xlane.f32.xlu1 %v742_v44  ;;  %v769_v44 = vsel %vm474_vm0, %v452_v28, 0.0  ;;  %v4696_v9 = vmul.f32 -1.442695, %v837_v51  ;;  %v134_v28 = vld [vmem:[%s9195_s2 + $0x358] sm:$0xff]  ;;  %v460_v51 = vmul.f32 %v5475_v1, %v133_v45 }
  0xb6   :  { %740 = vadd.xlane.f32.xlu0 %v739_v47  ;;  %v5978_v52 = vpop.xlane.xlu1 %539  ;;  %v455_v47 = vmul.f32 %v5475_v1, %v128_v31  ;;  %v461_v46 = vmul.f32 %v5475_v1, %v134_v28  ;;  %v140_v28 = vld [vmem:[%s9195_s2 + $0x388] sm:$0xff] }
  0xb7   :  { %v5980_v55 = vpop.xlane.xlu0 %536  ;;  %4907 = vpow2.f32 %v4696_v9  ;;  %v793_v8 = vsel %vm474_vm0, %v460_v51, 0.0  ;;  %v156_v9 = vld [vmem:[%s9196_s3 + $0x48] sm:$0xff] }
  0xb8   :  { %v778_v63 = vsel %vm474_vm0, %v455_v47, 0.0  ;;  %v4699_v47 = vmul.f32 -1.442695, %v840_v20  ;;  %v796_v5 = vsel %vm474_vm0, %v461_v46, 0.0 }
  0xb9   :  { %749 = vadd.xlane.f32.xlu1 %v748_v56  ;;  %v835_v56 = vadd.f32 %v5840_v30, %v147_v36  ;;  %v457_v30 = vmul.f32 %v5475_v1, %v130_v49 }
  0xba   :  { %746 = vadd.xlane.f32.xlu0 %v745_v57  ;;  %v5992_v0 = vpop.xlane.xlu1 %545  ;;  %v150_v57 = vld [vmem:[%s9196_s3 + $0x18] sm:$0xff] }
  0xbb   :  { %v5994_v2 = vpop.xlane.xlu0 %542  ;;  %v838_v10 = vadd.f32 %v5852_v37, %v150_v57  ;;  %v784_v37 = vsel %vm474_vm0, %v457_v30, 0.0  ;;  %v135_v57 = vld [vmem:[%s9195_s2 + $0x360] sm:$0xff]  ;;  %v4701_v30 = vmul.f32 -1.442695, %v842_v48 }
  0xbd   :  { %755 = vadd.xlane.f32.xlu1 %v754_v3  ;;  %v456_v3 = vmul.f32 %v5475_v1, %v129_v50  ;;  %v4697_v31 = vmul.f32 -1.442695, %v838_v10  ;;  %v138_v10 = vld [vmem:[%s9195_s2 + $0x378] sm:$0xff] }
  0xbe   :  { %752 = vadd.xlane.f32.xlu0 %v751_v4  ;;  %v6006_v11 = vpop.xlane.xlu1 %551  ;;  %v132_v4 = vld [vmem:[%s9195_s2 + $0x348] sm:$0xff] }
  0xbf   :  { %v6008_v12 = vpop.xlane.xlu0 %548  ;;  %v459_v18 = vmul.f32 %v5475_v1, %v132_v4 }
  0xc1   :  { %761 = vadd.xlane.f32.xlu1 %v760_v13  ;;  %v4694_v13 = vmul.f32 -1.442695, %v835_v56  ;;  %v136_v56 = vld [vmem:[%s9195_s2 + $0x368] sm:$0xff] }
  0xc2   :  { %758 = vadd.xlane.f32.xlu0 %v757_v16  ;;  %v6020_v21 = vpop.xlane.xlu1 %557  ;;  %v836_v16 = vadd.f32 %v5854_v38, %v148_v58  ;;  %v781_v38 = vsel %vm474_vm0, %v456_v3, 0.0  ;;  %v841_v58 = vadd.f32 %v5882_v54, %v153_v35 }
  0xc3   :  { %v6022_v24 = vpop.xlane.xlu0 %554  ;;  %4909 = vpow2.f32 %v4694_v13  ;;  %v155_v13 = vld [vmem:[%s9196_s3 + $0x40] sm:$0xff] }
  0xc4   :  { %v4695_v36 = vmul.f32 -1.442695, %v836_v16  ;;  %4911 = vpow2.f32 %v4697_v31  ;;  %v4700_v54 = vmul.f32 -1.442695, %v841_v58  ;;  %v843_v45 = vadd.f32 %v5896_v62, %v155_v13  ;;  %v158_v31 = vld [vmem:[%s9196_s3 + $0x58] sm:$0xff]  ;;  %v4908_v35 = vpop.eup %4907 }
  0xc5   :  { %767 = vadd.xlane.f32.xlu1 %v766_v25  ;;  %v846_v48 = vadd.f32 %v5908_v6, %v158_v31  ;;  %v845_v58 = vadd.f32 %v5910_v7, %v157_v34  ;;  %v1317_v6 = vadd.f32 1.0, %v4908_v35 }
  0xc6   :  { %764 = vadd.xlane.f32.xlu0 %v763_v26  ;;  %v6040_v39 = vpop.xlane.xlu1 %563  ;;  %4913 = vpow2.f32 %v4695_v36 }
  0xc7   :  { %v6042_v40 = vpop.xlane.xlu0 %560  ;;  %4915 = vpow2.f32 %v4699_v47 }
  0xc8   :  { %4917 = vpow2.f32 %v4698_v53  ;;  %v142_v53 = vld [vmem:[%s9195_s2 + $0x398] sm:$0xff] }
  0xc9   :  { %773 = vadd.xlane.f32.xlu1 %v772_v41  ;;  %v790_v41 = vsel %vm474_vm0, %v459_v18, 0.0  ;;  %4919 = vpow2.f32 %v4701_v30  ;;  %v844_v18 = vadd.f32 %v5894_v61, %v156_v9  ;;  %v139_v61 = vld [vmem:[%s9195_s2 + $0x380] sm:$0xff] }
  0xca   :  { %770 = vadd.xlane.f32.xlu0 %v769_v44  ;;  %v6062_v59 = vpop.xlane.xlu1 %569  ;;  %v787_v44 = vsel %vm474_vm0, %v458_v19, 0.0  ;;  %4921 = vpow2.f32 %v4700_v54  ;;  %v144_v54 = vld [vmem:[%s9195_s2 + $0x3a8] sm:$0xff] }
  0xcb   :  { %v6064_v60 = vpop.xlane.xlu0 %566  ;;  %v4703_v47 = vmul.f32 -1.442695, %v844_v18 }
  0xcd   :  { %779 = vadd.xlane.f32.xlu1 %v778_v63  ;;  %v463_v63 = vmul.f32 %v5475_v1, %v136_v56  ;;  %4923 = vpow2.f32 %v4703_v47 }
  0xce   :  { %776 = vadd.xlane.f32.xlu0 %v775_v29  ;;  %v6087_v25 = vpop.xlane.xlu1 %575  ;;  %v462_v29 = vmul.f32 %v5475_v1, %v135_v57  ;;  %v137_v1 = vld [vmem:[%s9195_s2 + $0x370] sm:$0xff]  ;;  %v4702_v57 = vmul.f32 -1.442695, %v843_v45 }
  0xcf   :  { %v6089_v26 = vpop.xlane.xlu0 %572  ;;  %v802_v16 = vsel %vm474_vm0, %v463_v63, 0.0  ;;  %v141_v63 = vld [vmem:[%s9195_s2 + $0x390] sm:$0xff] }
  0xd0   :  { %v799_v17 = vsel %vm474_vm0, %v462_v29, 0.0  ;;  %v160_v29 = vld [vmem:[%s9196_s3 + $0x68] sm:$0xff]  ;;  %4925 = vpow2.f32 %v4702_v57 }
  0xd1   :  { %785 = vadd.xlane.f32.xlu1 %v784_v37  ;;  %v6152_v37 = vld [vmem:[%s9194_s0] ss:$0 sm:$0xff]  ;;  %4927 = vrcp.f32 %v1317_v6 }
  0xd2   :  { %782 = vadd.xlane.f32.xlu0 %v781_v38  ;;  %v6109_v49 = vpop.xlane.xlu1 %581  ;;  %v465_v38 = vmul.f32 %v6152_v37, %v138_v10  ;;  %v464_v27 = vmul.f32 %v6152_v37, %v137_v1  ;;  %v467_v36 = vmul.f32 %v6152_v37, %v140_v28  ;;  %v4705_v10 = vmul.f32 -1.442695, %v846_v48  ;;  %v159_v1 = vld [vmem:[%s9196_s3 + $0x60] sm:$0xff] }
  0xd3   :  { %v6111_v50 = vpop.xlane.xlu0 %578  ;;  %v468_v18 = vmul.f32 %v6152_v37, %v141_v63  ;;  %v4704_v28 = vmul.f32 -1.442695, %v845_v58  ;;  %v471_v31 = vmul.f32 %v6152_v37, %v144_v54  ;;  %v145_v63 = vld [vmem:[%s9195_s2 + $0x3b0] sm:$0xff] }
  0xd4   :  { %v808_v51 = vsel %vm474_vm0, %v465_v38, 0.0  ;;  %v805_v56 = vsel %vm474_vm0, %v464_v27, 0.0  ;;  %v143_v38 = vld [vmem:[%s9195_s2 + $0x3a0] sm:$0xff] }
  0xd5   :  { %791 = vadd.xlane.f32.xlu1 %v790_v41  ;;  %v466_v41 = vmul.f32 %v6152_v37, %v139_v61  ;;  %v848_v61 = vadd.f32 %v5922_v14, %v160_v29  ;;  %v161_v14 = vld [vmem:[%s9196_s3 + $0x70] sm:$0xff] }
  0xd6   :  { %788 = vadd.xlane.f32.xlu0 %v787_v44  ;;  %v6124_v3 = vpop.xlane.xlu1 %587  ;;  %v4910_v44 = vpop.eup %4909 }
  0xd7   :  { %v6126_v4 = vpop.xlane.xlu0 %584  ;;  %v4912_v30 = vpop.eup %4911  ;;  %v811_v7 = vsel %vm474_vm0, %v466_v41, 0.0  ;;  %v162_v41 = vld [vmem:[%s9196_s3 + $0x78] sm:$0xff]  ;;  %v4707_v58 = vmul.f32 -1.442695, %v848_v61 }
  0xd8   :  { %v4914_v9 = vpop.eup %4913  ;;  %v1318_v45 = vadd.f32 1.0, %v4912_v30  ;;  %v850_v30 = vadd.f32 %v5936_v22, %v162_v41  ;;  %v166_v41 = vld [vmem:[%s9196_s3 + $0x98] sm:$0xff] }
  0xd9   :  { %797 = vadd.xlane.f32.xlu1 %v796_v5  ;;  %v1315_v5 = vadd.f32 1.0, %v4910_v44  ;;  %v4916_v27 = vpop.eup %4915  ;;  %v1316_v35 = vadd.f32 1.0, %v4914_v9  ;;  %v470_v44 = vmul.f32 %v6152_v37, %v143_v38  ;;  %v849_v9 = vadd.f32 %v5938_v23, %v161_v14 }
  0xda   :  { %794 = vadd.xlane.f32.xlu0 %v793_v8  ;;  %v6145_v19 = vpop.xlane.xlu1 %593  ;;  %v814_v8 = vsel %vm474_vm0, %v467_v36, 0.0  ;;  %v4918_v34 = vpop.eup %4917  ;;  %v847_v36 = vadd.f32 %v5924_v15, %v159_v1  ;;  %v1320_v47 = vadd.f32 1.0, %v4916_v27  ;;  %v817_v15 = vsel %vm474_vm0, %v468_v18, 0.0 }
  0xdb   :  { %v6147_v20 = vpop.xlane.xlu0 %590  ;;  %4929 = vrcp.f32 %v1315_v5  ;;  %v4920_v57 = vpop.eup %4919  ;;  %v1319_v29 = vadd.f32 1.0, %v4918_v34  ;;  %v164_v5 = vld [vmem:[%s9196_s3 + $0x88] sm:$0xff]  ;;  %v823_v22 = vsel %vm474_vm0, %v470_v44, 0.0  ;;  %v472_v23 = vmul.f32 %v6152_v37, %v145_v63 }
  0xdc   :  { %4931 = vpow2.f32 %v4705_v10  ;;  %v4922_v6 = vpop.eup %4921  ;;  %v4706_v54 = vmul.f32 -1.442695, %v847_v36  ;;  %v191_v10 = vld [vmem:[%s9196_s3 + $0x160] sm:$0xff]  ;;  %v1322_v1 = vadd.f32 1.0, %v4920_v57  ;;  %v852_v61 = vadd.f32 %v5950_v32, %v164_v5 }
  0xdd   :  { %803 = vadd.xlane.f32.xlu1 %v802_v16  ;;  %4933 = vpow2.f32 %v4704_v28  ;;  %v1321_v28 = vadd.f32 1.0, %v4922_v6  ;;  %v829_v14 = vsel %vm474_vm0, %v472_v23, 0.0  ;;  %v854_v57 = vadd.f32 %v5964_v42, %v166_v41  ;;  %v167_v42 = vld [vmem:[%s9196_s3 + $0xa0] sm:$0xff]  ;;  %v194_v23 = vld [vmem:[%s9196_s3 + $0x178] sm:$0xff] }
  0xde   :  { %800 = vadd.xlane.f32.xlu0 %v799_v17  ;;  %v6172_v62 = vpop.xlane.xlu1 %599  ;;  %v469_v17 = vmul.f32 %v6152_v37, %v142_v53  ;;  %v146_v53 = vld [vmem:[%s9195_s2 + $0x3b8] sm:$0xff]  ;;  %4935 = vrcp.f32 %v1318_v45 }
  0xdf   :  { %v6174_v46 = vpop.xlane.xlu0 %596  ;;  %4937 = vrcp.f32 %v1316_v35  ;;  %v473_v27 = vmul.f32 %v6152_v37, %v146_v53  ;;  %v4708_v35 = vmul.f32 -1.442695, %v849_v9  ;;  %v165_v37 = vld [vmem:[%s9196_s3 + $0x90] sm:$0xff]  ;;  %v170_v41 = vld [vmem:[%s9196_s3 + $0xb8] sm:$0xff] }
  0xe0   :  { %4939 = vrcp.f32 %v1320_v47  ;;  %v853_v6 = vadd.f32 %v5966_v43, %v165_v37  ;;  %v189_v9 = vld [vmem:[%s9196_s3 + $0x150] sm:$0xff] }
  0xe1   :  { %809 = vadd.xlane.f32.xlu1 %v808_v51  ;;  %4941 = vpow2.f32 %v4707_v58  ;;  %v832_v47 = vsel %vm474_vm0, %v473_v27, 0.0  ;;  %v855_v27 = vadd.f32 %v5980_v55, %v167_v42 }
  0xe2   :  { %806 = vadd.xlane.f32.xlu0 %v805_v56  ;;  %v6196_v13 = vpop.xlane.xlu1 %605  ;;  %v820_v56 = vsel %vm474_vm0, %v469_v17, 0.0  ;;  %v163_v17 = vld [vmem:[%s9196_s3 + $0x80] sm:$0xff]  ;;  %4943 = vrcp.f32 %v1319_v29  ;;  %v168_v29 = vld [vmem:[%s9196_s3 + $0xa8] sm:$0xff] }
  0xe3   :  { %v6198_v16 = vpop.xlane.xlu0 %602  ;;  %4945 = vpow2.f32 %v4706_v54  ;;  %v851_v36 = vadd.f32 %v5952_v33, %v163_v17  ;;  %v4924_v33 = vpop.eup %4923 }
  0xe4   :  { %4947 = vrcp.f32 %v1322_v1  ;;  %v1324_v5 = vadd.f32 1.0, %v4924_v33  ;;  %v856_v1 = vadd.f32 %v5978_v52, %v168_v29 }
  0xe5   :  { %815 = vadd.xlane.f32.xlu1 %v814_v8  ;;  %v193_v8 = vld [vmem:[%s9196_s3 + $0x170] sm:$0xff]  ;;  %4949 = vrcp.f32 %v1321_v28  ;;  %v4710_v63 = vmul.f32 -1.442695, %v851_v36 }
  0xe6   :  { %812 = vadd.xlane.f32.xlu0 %v811_v7  ;;  %v6215_v48 = vpop.xlane.xlu1 %611  ;;  %v826_v7 = vsel %vm474_vm0, %v471_v31, 0.0  ;;  %v4709_v31 = vmul.f32 -1.442695, %v850_v30  ;;  %v4715_v55 = vmul.f32 -1.442695, %v856_v1 }
  0xe7   :  { %v609_v51 = vpop.xlane.xlu0 %608 }
  0xe8   :  { %v879_v34 = vadd.f32 %v609_v51, %v191_v10  ;;  %4951 = vpow2.f32 %v4709_v31 }
  0xe9   :  { %821 = vadd.xlane.f32.xlu1 %v820_v56  ;;  %v4711_v56 = vmul.f32 -1.442695, %v852_v61  ;;  %4953 = vpow2.f32 %v4708_v35 }
  0xea   :  { %818 = vadd.xlane.f32.xlu0 %v817_v15  ;;  %v6241_v18 = vpop.xlane.xlu1 %617  ;;  %v4926_v15 = vpop.eup %4925  ;;  %v4738_v58 = vmul.f32 -1.442695, %v879_v34 }
  0xeb   :  { %v615_v38 = vpop.xlane.xlu0 %614  ;;  %v6260_v53 = vpop.eup %4927  ;;  %v1323_v43 = vadd.f32 1.0, %v4926_v15  ;;  %v882_v37 = vadd.f32 %v6241_v18, %v194_v23  ;;  %v858_v18 = vadd.f32 %v5992_v0, %v170_v41 }
  0xec   :  { %v881_v45 = vadd.f32 %v615_v38, %v193_v8  ;;  %v6266_v30 = vpop.eup %4929  ;;  %v4712_v38 = vmul.f32 -1.442695, %v853_v6 }
  0xed   :  { %827 = vadd.xlane.f32.xlu1 %v826_v7  ;;  %v4932_v54 = vpop.eup %4931  ;;  %v4741_v42 = vmul.f32 -1.442695, %v882_v37 }
  0xee   :  { %824 = vadd.xlane.f32.xlu0 %v823_v22  ;;  %v4740_v32 = vmul.f32 -1.442695, %v881_v45  ;;  %v6253_v44 = vpop.xlane.xlu1 %623  ;;  %v4934_v10 = vpop.eup %4933  ;;  %v4713_v22 = vmul.f32 -1.442695, %v854_v57  ;;  %v1326_v61 = vadd.f32 1.0, %v4932_v54  ;;  %v877_v45 = vadd.f32 %v6198_v16, %v189_v9 }
  0xef   :  { %v6257_v51 = vpop.xlane.xlu0 %620  ;;  %v6279_v17 = vpop.eup %4935  ;;  %v1325_v35 = vadd.f32 1.0, %v4934_v10  ;;  %v4714_v16 = vmul.f32 -1.442695, %v855_v27 }
  0xf0   :  { %4955 = vpow2.f32 %v4740_v32  ;;  %v4938_v28 = vpop.eup %4937  ;;  %v4736_v33 = vmul.f32 -1.442695, %v877_v45 }
  0xf1   :  { %833 = vadd.xlane.f32.xlu1 %v832_v47  ;;  %4957 = vpow2.f32 %v4711_v56  ;;  %v6290_v52 = vpop.eup %4939  ;;  %v169_v47 = vld [vmem:[%s9196_s3 + $0xb0] sm:$0xff] }
  0xf2   :  { %830 = vadd.xlane.f32.xlu0 %v829_v14  ;;  %v6271_v8 = vpop.xlane.xlu1 %629  ;;  %4959 = vpow2.f32 %v4738_v58  ;;  %v4942_v36 = vpop.eup %4941  ;;  %v857_v29 = vadd.f32 %v5994_v2, %v169_v47  ;;  %v171_v47 = vld [vmem:[%s9196_s3 + $0xc0] sm:$0xff] }
  0xf3   :  { %v6273_v7 = vpop.xlane.xlu0 %626  ;;  %4961 = vpow2.f32 %v4710_v63  ;;  %v6296_v32 = vpop.eup %4943  ;;  %v1328_v58 = vadd.f32 1.0, %v4942_v36  ;;  %v187_v63 = vld [vmem:[%s9196_s3 + $0x140] sm:$0xff] }
  0xf4   :  { %4963 = vrcp.f32 %v1324_v5  ;;  %v4946_v14 = vpop.eup %4945  ;;  %v192_v5 = vld [vmem:[%s9196_s3 + $0x168] sm:$0xff]  ;;  %v875_v0 = vadd.f32 %v6174_v46, %v187_v63  ;;  %v4716_v23 = vmul.f32 -1.442695, %v857_v29 }
  0xf5   :  { %4965 = vrcp.f32 %v1323_v43  ;;  %v6305_v57 = vpop.eup %4947  ;;  %v1327_v43 = vadd.f32 1.0, %v4946_v14  ;;  %v880_v2 = vadd.f32 %v6215_v48, %v192_v5  ;;  %v172_v46 = vld [vmem:[%s9196_s3 + $0xc8] sm:$0xff]  ;;  %v190_v5 = vld [vmem:[%s9196_s3 + $0x158] sm:$0xff] }
  0xf6   :  { %v6286_v31 = vpop.xlane.xlu1 %635  ;;  %4967 = vpow2.f32 %v4713_v22  ;;  %v6311_v6 = vpop.eup %4949  ;;  %v4734_v41 = vmul.f32 -1.442695, %v875_v0  ;;  %v184_v0 = vld [vmem:[%s9196_s3 + $0x128] sm:$0xff] }
  0xf7   :  { %v6288_v34 = vpop.xlane.xlu0 %632  ;;  %4969 = vpow2.f32 %v4712_v38  ;;  %v4952_v54 = vpop.eup %4951  ;;  %v4717_v38 = vmul.f32 -1.442695, %v858_v18  ;;  %v4739_v14 = vmul.f32 -1.442695, %v880_v2  ;;  %v878_v2 = vadd.f32 %v6196_v13, %v190_v5 }
  0xf8   :  { %4971 = vrcp.f32 %v1326_v61  ;;  %v4954_v9 = vpop.eup %4953 }
  0xf9   :  { %4973 = vrcp.f32 %v1325_v35  ;;  %v1330_v35 = vadd.f32 1.0, %v4952_v54  ;;  %v1329_v29 = vadd.f32 1.0, %v4954_v9 }
  0xfa   :  { %v6301_v56 = vpop.xlane.xlu1 %641  ;;  %4975 = vpow2.f32 %v4715_v55  ;;  %v186_v55 = vld [vmem:[%s9196_s3 + $0x138] sm:$0xff] }
  0xfb   :  { %v6303_v15 = vpop.xlane.xlu0 %638  ;;  %4977 = vpow2.f32 %v4714_v16 }
  0xfc   :  { %4979 = vpow2.f32 %v4736_v33 }
  0xfd   :  { %v4956_v1 = vpop.eup %4955  ;;  %4981 = vrcp.f32 %v1328_v58  ;;  %v860_v58 = vadd.f32 %v6006_v11, %v172_v46 }
  0xfe   :  { %v6318_v10 = vpop.xlane.xlu1 %647  ;;  %v4958_v27 = vpop.eup %4957  ;;  %4983 = vpow2.f32 %v4741_v42  ;;  %v1361_v61 = vadd.f32 1.0, %v4956_v1 }
  0xff   :  { %v6320_v22 = vpop.xlane.xlu0 %644  ;;  %v4960_v45 = vpop.eup %4959  ;;  %4985 = vrcp.f32 %v1327_v43  ;;  %v1332_v54 = vadd.f32 1.0, %v4958_v27  ;;  %v859_v43 = vadd.f32 %v6008_v12, %v171_v47  ;;  %v4719_v12 = vmul.f32 -1.442695, %v860_v58 }
 0x100   :  { %v4962_v36 = vpop.eup %4961  ;;  %4987 = vrcp.f32 %v1361_v61  ;;  %v1359_v18 = vadd.f32 1.0, %v4960_v45  ;;  %v4737_v47 = vmul.f32 -1.442695, %v878_v2 }
 0x101   :  { %v6333_v16 = vpop.eup %4963  ;;  %4989 = vpow2.f32 %v4717_v38  ;;  %v1331_v1 = vadd.f32 1.0, %v4962_v36  ;;  %v4718_v45 = vmul.f32 -1.442695, %v859_v43 }
 0x102   :  { %v6329_v37 = vpop.xlane.xlu1 %653  ;;  %1922 = vperm.xlu1 %4906, %v4938_v28   ;;  %v6338_v33 = vpop.eup %4965  ;;  %4991 = vpow2.f32 %v4716_v23  ;;  %v874_v28 = vadd.f32 %v6145_v19, %v186_v55  ;;  %v872_v23 = vadd.f32 %v6124_v3, %v184_v0  ;;  %v174_v3 = vld [vmem:[%s9196_s3 + $0xd8] sm:$0xff] }
 0x103   :  { %v6331_v48 = vpop.xlane.xlu0 %650  ;;  %v4968_v63 = vpop.eup %4967  ;;  %4993 = vrcp.f32 %v1330_v35 }
 0x104   :  { %v4970_v42 = vpop.eup %4969  ;;  %4995 = vpow2.f32 %v4734_v41  ;;  %v1334_v36 = vadd.f32 1.0, %v4968_v63  ;;  %v173_v41 = vld [vmem:[%s9196_s3 + $0xd0] sm:$0xff]  ;;  %v4731_v58 = vmul.f32 -1.442695, %v872_v23 }
 0x105   :  { %v6354_v19 = vpop.eup %4971  ;;  %4997 = vpow2.f32 %v4739_v14  ;;  %v1333_v0 = vadd.f32 1.0, %v4970_v42 }
 0x106   :  { %v6349_v11 = vpop.xlane.xlu1 %659  ;;  %1927 = vperm.xlu1 %4906, %v6260_v53   ;;  %v6357_v38 = vpop.eup %4973  ;;  %4999 = vrcp.f32 %v1359_v18  ;;  %v4733_v53 = vmul.f32 -1.442695, %v874_v28  ;;  %v188_v18 = vld [vmem:[%s9196_s3 + $0x148] sm:$0xff] }
 0x107   :  { %v6352_v9 = vpop.xlane.xlu0 %656  ;;  %v6360_v27 = vpop.eup %4975  ;;  %5001 = vrcp.f32 %v1329_v29  ;;  %v862_v29 = vadd.f32 %v6020_v21, %v174_v3  ;;  %v180_v28 = vld [vmem:[%s9196_s3 + $0x108] sm:$0xff]  ;;  %v185_v21 = vld [vmem:[%s9196_s3 + $0x130] sm:$0xff]  ;;  %v876_v2 = vadd.f32 %v6172_v62, %v188_v18 }
 0x108   :  { %1917 = vperm.xlu0 %4905, %v6266_v30   ;;  %v6363_v61 = vpop.eup %4977  ;;  %5003 = vrcp.f32 %v1332_v54  ;;  %v182_v30 = vld [vmem:[%s9196_s3 + $0x118] sm:$0xff] }
 0x109   :  { %v4980_v46 = vpop.eup %4979  ;;  %5005 = vrcp.f32 %v1331_v1  ;;  %v861_v1 = vadd.f32 %v6022_v24, %v173_v41  ;;  %v4721_v24 = vmul.f32 -1.442695, %v862_v29 }
 0x10a   :  { %v6368_v35 = vpop.xlane.xlu1 %665  ;;  %1932 = vperm.xlu1 %4906, %v6279_v17   ;;  %v6376_v55 = vpop.eup %4981  ;;  %5007 = vpow2.f32 %v4719_v12  ;;  %v870_v17 = vadd.f32 %v6109_v49, %v182_v30  ;;  %v1357_v5 = vadd.f32 1.0, %v4980_v46  ;;  %v178_v30 = vld [vmem:[%s9196_s3 + $0xf8] sm:$0xff] }
 0x10b   :  { %v6371_v13 = vpop.xlane.xlu0 %662  ;;  %v4984_v14 = vpop.eup %4983  ;;  %5009 = vpow2.f32 %v4733_v53  ;;  %v4720_v3 = vmul.f32 -1.442695, %v861_v1 }
 0x10c   :  { %v4986_v63 = vpop.eup %4985  ;;  %5011 = vpow2.f32 %v4718_v45  ;;  %v1362_v23 = vadd.f32 1.0, %v4984_v14  ;;  %v4729_v45 = vmul.f32 -1.442695, %v870_v17  ;;  %v4735_v14 = vmul.f32 -1.442695, %v876_v2 }
 0x10d   :  { %v4988_v43 = vpop.eup %4987  ;;  %5013 = vrcp.f32 %v1334_v36 }
 0x10e   :  { %v6389_v54 = vpop.xlane.xlu1 %671  ;;  %1937 = vperm.xlu1 %4906, %v6296_v32   ;;  %v6395_v12 = vpop.eup %4989  ;;  %5015 = vpow2.f32 %v4737_v47  ;;  %2147 = vperm.xlu0 %4905, %v4988_v43   ;;  %v868_v32 = vadd.f32 %v6087_v25, %v180_v28  ;;  %v873_v25 = vadd.f32 %v6147_v20, %v185_v21  ;;  %v176_v47 = vld [vmem:[%s9196_s3 + $0xe8] sm:$0xff]  ;;  %v181_v21 = vld [vmem:[%s9196_s3 + $0x110] sm:$0xff] }
 0x10f   :  { %v6392_v49 = vpop.xlane.xlu0 %668  ;;  %v6401_v53 = vpop.eup %4991  ;;  %5017 = vpow2.f32 %v4731_v58  ;;  %v866_v58 = vadd.f32 %v6062_v59, %v178_v30  ;;  %v864_v59 = vadd.f32 %v6040_v39, %v176_v47 }
 0x110   :  { %v6404_v42 = vpop.eup %4993  ;;  %5019 = vrcp.f32 %v1357_v5  ;;  %v4727_v18 = vmul.f32 -1.442695, %v868_v32 }
 0x111   :  { %v4996_v36 = vpop.eup %4995  ;;  %5021 = vrcp.f32 %v1333_v0  ;;  %v210_v0 = vld [vmem:[%s9196_s3 + $0x1f8] sm:$0xff]  ;;  %v4725_v32 = vmul.f32 -1.442695, %v866_v58 }
 0x112   :  { %v6409_v46 = vpop.xlane.xlu1 %677  ;;  %1942 = vperm.xlu1 %4906, %v6290_v52   ;;  %v4998_v41 = vpop.eup %4997  ;;  %5023 = vrcp.f32 %v1362_v23  ;;  %1977 = vperm.xlu0 %4905, %v4986_v63   ;;  %v183_v52 = vld [vmem:[%s9196_s3 + $0x120] sm:$0xff]  ;;  %v1355_v20 = vadd.f32 1.0, %v4996_v36  ;;  %v4732_v63 = vmul.f32 -1.442695, %v873_v25  ;;  %v898_v30 = vadd.f32 %v6368_v35, %v210_v0  ;;  %v177_v0 = vld [vmem:[%s9196_s3 + $0xf0] sm:$0xff] }
 0x113   :  { %v6412_v62 = vpop.xlane.xlu0 %674  ;;  %v5000_v17 = vpop.eup %4999  ;;  %5025 = vpow2.f32 %v4729_v45  ;;  %v1360_v2 = vadd.f32 1.0, %v4998_v41  ;;  %v1336_v45 = vadd.f32 1.0, %v6360_v27  ;;  %v4723_v25 = vmul.f32 -1.442695, %v864_v59  ;;  %v175_v35 = vld [vmem:[%s9196_s3 + $0xe0] sm:$0xff]  ;;  %v208_v59 = vld [vmem:[%s9196_s3 + $0x1e8] sm:$0xff] }
 0x114   :  { %v5002_v29 = vpop.eup %5001  ;;  %5027 = vpow2.f32 %v4721_v24  ;;  %v179_v24 = vld [vmem:[%s9196_s3 + $0x100] sm:$0xff]  ;;  %v869_v41 = vadd.f32 %v6111_v50, %v181_v21 }
 0x115   :  { %v6427_v43 = vpop.eup %5003  ;;  %5029 = vpow2.f32 %v4720_v3 }
 0x116   :  { %v6422_v28 = vpop.xlane.xlu1 %683  ;;  %1947 = vperm.xlu1 %4906, %v6311_v6   ;;  %v6433_v1 = vpop.eup %5005  ;;  %v871_v6 = vadd.f32 %v6126_v4, %v183_v52  ;;  %5031 = vpow2.f32 %v4735_v14  ;;  %2137 = vperm.xlu0 %4905, %v5000_v17   ;;  %v867_v17 = vadd.f32 %v6089_v26, %v179_v24  ;;  %v4757_v52 = vmul.f32 -1.442695, %v898_v30 }
 0x117   :  { %v6425_v5 = vpop.xlane.xlu0 %680  ;;  %v6439_v23 = vpop.eup %5007  ;;  %5033 = vpow2.f32 %v4727_v18  ;;  %v863_v26 = vadd.f32 %v6042_v40, %v175_v35  ;;  %v1335_v30 = vadd.f32 1.0, %v6363_v61  ;;  %v209_v35 = vld [vmem:[%s9196_s3 + $0x1f0] sm:$0xff] }
 0x118   :  { %v5010_v39 = vpop.eup %5009  ;;  %5035 = vrcp.f32 %v1355_v20  ;;  %v4730_v27 = vmul.f32 -1.442695, %v871_v6  ;;  %v4726_v6 = vmul.f32 -1.442695, %v867_v17 }
 0x119   :  { %v6450_v3 = vpop.eup %5011  ;;  %5037 = vpow2.f32 %v4732_v63  ;;  %v1354_v58 = vadd.f32 1.0, %v5010_v39  ;;  %v896_v39 = vadd.f32 %v6349_v11, %v208_v59  ;;  %v897_v59 = vadd.f32 %v6371_v13, %v209_v35 }
 0x11a   :  { %v6446_v36 = vpop.xlane.xlu1 %689  ;;  %1987 = vperm.xlu1 %4906, %v5002_v29   ;;  %v6453_v47 = vpop.eup %5013  ;;  %5039 = vrcp.f32 %v1360_v2  ;;  %1967 = vperm.xlu0 %4905, %v6357_v38   ;;  %v4728_v38 = vmul.f32 -1.442695, %v869_v41 }
 0x11b   :  { %v6448_v4 = vpop.xlane.xlu0 %686  ;;  %v5016_v14 = vpop.eup %5015  ;;  %5041 = vpow2.f32 %v4725_v32 }
 0x11c   :  { %v5018_v18 = vpop.eup %5017  ;;  %5043 = vrcp.f32 %v1336_v45  ;;  %v1358_v21 = vadd.f32 1.0, %v5016_v14 }
 0x11d   :  { %v5020_v20 = vpop.eup %5019  ;;  %5045 = vpow2.f32 %v4723_v25  ;;  %v1352_v32 = vadd.f32 1.0, %v5018_v18  ;;  %v865_v25 = vadd.f32 %v6064_v60, %v177_v0  ;;  %v1338_v0 = vadd.f32 1.0, %v6395_v12 }
 0x11e   :  { %v6460_v50 = vpop.xlane.xlu1 %695  ;;  %1992 = vperm.xlu1 %4906, %v6404_v42   ;;  %v6468_v63 = vpop.eup %5021  ;;  %5047 = vpow2.f32 %v4730_v27  ;;  %2127 = vperm.xlu0 %4905, %v5020_v20   ;;  %v4722_v27 = vmul.f32 -1.442695, %v863_v26 }
 0x11f   :  { %v6463_v29 = vpop.xlane.xlu0 %692  ;;  %v5024_v42 = vpop.eup %5023  ;;  %5049 = vrcp.f32 %v1354_v58  ;;  %v4755_v58 = vmul.f32 -1.442695, %v896_v39 }
 0x120   :  { %v5026_v2 = vpop.eup %5025  ;;  %5051 = vpow2.f32 %v4757_v52  ;;  %v4724_v52 = vmul.f32 -1.442695, %v865_v25 }
 0x121   :  { %v6479_v40 = vpop.eup %5027  ;;  %5053 = vpow2.f32 %v4728_v38  ;;  %v1350_v14 = vadd.f32 1.0, %v5026_v2 }
 0x122   :  { %v6475_v45 = vpop.xlane.xlu1 %701  ;;  %2152 = vperm.xlu1 %4906, %v5024_v42   ;;  %v6483_v41 = vpop.eup %5029  ;;  %5055 = vrcp.f32 %v1358_v21  ;;  %1957 = vperm.xlu0 %4905, %v6338_v33   ;;  %v206_v33 = vld [vmem:[%s9196_s3 + $0x1d8] sm:$0xff] }
 0x123   :  { %v6477_v24 = vpop.xlane.xlu0 %698  ;;  %v5032_v11 = vpop.eup %5031  ;;  %5057 = vpow2.f32 %v4726_v6  ;;  %v894_v42 = vadd.f32 %v6329_v37, %v206_v33  ;;  %v207_v37 = vld [vmem:[%s9196_s3 + $0x1e0] sm:$0xff]  ;;  %v196_v33 = vld [vmem:[%s9196_s3 + $0x188] sm:$0xff] }
 0x124   :  { %v5034_v17 = vpop.eup %5033  ;;  %5059 = vrcp.f32 %v1352_v32  ;;  %v1356_v38 = vadd.f32 1.0, %v5032_v11 }
 0x125   :  { %v5036_v18 = vpop.eup %5035  ;;  %5061 = vrcp.f32 %v1335_v30  ;;  %v1348_v21 = vadd.f32 1.0, %v5034_v17  ;;  %v4756_v30 = vmul.f32 -1.442695, %v897_v59  ;;  %v4753_v11 = vmul.f32 -1.442695, %v894_v42 }
 0x126   :  { %v6489_v61 = vpop.xlane.xlu1 %707  ;;  %1982 = vperm.xlu1 %4906, %v6376_v55   ;;  %v5038_v20 = vpop.eup %5037  ;;  %5063 = vpow2.f32 %v4722_v27  ;;  %2117 = vperm.xlu0 %4905, %v5036_v18  }
 0x127   :  { %v6492_v60 = vpop.xlane.xlu0 %704  ;;  %v5040_v26 = vpop.eup %5039  ;;  %5065 = vrcp.f32 %v1350_v14  ;;  %v1353_v39 = vadd.f32 1.0, %v5038_v20  ;;  %v895_v20 = vadd.f32 %v6352_v9, %v207_v37 }
 0x128   :  { %v5042_v55 = vpop.eup %5041  ;;  %5067 = vpow2.f32 %v4755_v58  ;;  %v1337_v58 = vadd.f32 1.0, %v6401_v53  ;;  %v195_v53 = vld [vmem:[%s9196_s3 + $0x180] sm:$0xff] }
 0x129   :  { %v6504_v32 = vpop.eup %5043  ;;  %5069 = vpow2.f32 %v4724_v52  ;;  %v1346_v25 = vadd.f32 1.0, %v5042_v55 }
 0x12a   :  { %v6500_v6 = vpop.xlane.xlu1 %713  ;;  %2142 = vperm.xlu1 %4906, %v5040_v26   ;;  %v5046_v13 = vpop.eup %5045  ;;  %5071 = vrcp.f32 %v1356_v38  ;;  %1952 = vperm.xlu0 %4905, %v6305_v57   ;;  %v204_v57 = vld [vmem:[%s9196_s3 + $0x1c8] sm:$0xff]  ;;  %v202_v26 = vld [vmem:[%s9196_s3 + $0x1b8] sm:$0xff] }
 0x12b   :  { %v6502_v2 = vpop.xlane.xlu0 %710  ;;  %v5048_v12 = vpop.eup %5047  ;;  %5073 = vrcp.f32 %v1338_v0  ;;  %v1344_v38 = vadd.f32 1.0, %v5046_v13  ;;  %v892_v0 = vadd.f32 %v6318_v10, %v204_v57  ;;  %v884_v13 = vadd.f32 %v6253_v44, %v196_v33 }
 0x12c   :  { %v5050_v27 = vpop.eup %5049  ;;  %5075 = vrcp.f32 %v1348_v21  ;;  %v1351_v52 = vadd.f32 1.0, %v5048_v12  ;;  %v883_v12 = vadd.f32 %v6257_v51, %v195_v53 }
 0x12d   :  { %v5052_v17 = vpop.eup %5051  ;;  %5077 = vrcp.f32 %v1353_v39 }
 0x12e   :  { %v6510_v14 = vpop.xlane.xlu1 %719  ;;  %1972 = vperm.xlu1 %4906, %v6354_v19   ;;  %v5054_v18 = vpop.eup %5053  ;;  %5079 = vpow2.f32 %v4756_v30  ;;  %2112 = vperm.xlu0 %4905, %v5050_v27   ;;  %v1378_v55 = vadd.f32 1.0, %v5052_v17  ;;  %v890_v27 = vadd.f32 %v6301_v56, %v202_v26  ;;  %v198_v56 = vld [vmem:[%s9196_s3 + $0x198] sm:$0xff]  ;;  %v4742_v33 = vmul.f32 -1.442695, %v883_v12 }
 0x12f   :  { %v6513_v35 = vpop.xlane.xlu0 %716  ;;  %v5056_v19 = vpop.eup %5055  ;;  %5081 = vrcp.f32 %v1346_v25  ;;  %v1349_v39 = vadd.f32 1.0, %v5054_v18  ;;  %v4754_v25 = vmul.f32 -1.442695, %v895_v20  ;;  %v4743_v18 = vmul.f32 -1.442695, %v884_v13 }
 0x130   :  { %v5058_v59 = vpop.eup %5057  ;;  %5083 = vpow2.f32 %v4753_v11  ;;  %v205_v11 = vld [vmem:[%s9196_s3 + $0x1d0] sm:$0xff] }
 0x131   :  { %v5060_v42 = vpop.eup %5059  ;;  %5085 = vrcp.f32 %v1337_v58  ;;  %v1347_v37 = vadd.f32 1.0, %v5058_v59  ;;  %v4751_v58 = vmul.f32 -1.442695, %v892_v0  ;;  %v893_v20 = vadd.f32 %v6331_v48, %v205_v11 }
 0x132   :  { %v6530_v21 = vpop.xlane.xlu1 %725  ;;  %2132 = vperm.xlu1 %4906, %v5056_v19   ;;  %v6535_v30 = vpop.eup %5061  ;;  %5087 = vrcp.f32 %v1351_v52  ;;  %2102 = vperm.xlu0 %4905, %v5060_v42   ;;  %v886_v42 = vadd.f32 %v6271_v8, %v198_v56 }
 0x133   :  { %v6532_v9 = vpop.xlane.xlu0 %722  ;;  %v6538_v10 = vpop.eup %5063  ;;  %5089 = vrcp.f32 %v1344_v38  ;;  %v4749_v38 = vmul.f32 -1.442695, %v890_v27  ;;  %v4752_v13 = vmul.f32 -1.442695, %v893_v20  ;;  %v1342_v27 = vadd.f32 1.0, %v6479_v40  ;;  %v197_v40 = vld [vmem:[%s9196_s3 + $0x190] sm:$0xff] }
 0x134   :  { %v5066_v17 = vpop.eup %5065  ;;  %5091 = vrcp.f32 %v1378_v55 }
 0x135   :  { %v5068_v57 = vpop.eup %5067  ;;  %5093 = vrcp.f32 %v1349_v39  ;;  %v203_v39 = vld [vmem:[%s9196_s3 + $0x1c0] sm:$0xff] }
 0x136   :  { %v6544_v44 = vpop.xlane.xlu1 %731  ;;  %1962 = vperm.xlu1 %4906, %v6333_v16   ;;  %v5070_v52 = vpop.eup %5069  ;;  %5095 = vpow2.f32 %v4754_v25  ;;  %2092 = vperm.xlu0 %4905, %v5066_v17   ;;  %v1376_v16 = vadd.f32 1.0, %v5068_v57  ;;  %v1340_v25 = vadd.f32 1.0, %v6439_v23  ;;  %v200_v57 = vld [vmem:[%s9196_s3 + $0x1a8] sm:$0xff] }
 0x137   :  { %v6547_v51 = vpop.xlane.xlu0 %728  ;;  %v5072_v19 = vpop.eup %5071  ;;  %5097 = vrcp.f32 %v1347_v37  ;;  %v1345_v55 = vadd.f32 1.0, %v5070_v52 }
 0x138   :  { %v6553_v53 = vpop.eup %5073  ;;  %5099 = vpow2.f32 %v4751_v58  ;;  %v4745_v58 = vmul.f32 -1.442695, %v886_v42  ;;  %v885_v42 = vadd.f32 %v6273_v7, %v197_v40 }
 0x139   :  { %v5076_v0 = vpop.eup %5075  ;;  %5101 = vpow2.f32 %v4743_v18  ;;  %v891_v18 = vadd.f32 %v6320_v22, %v203_v39  ;;  %v199_v22 = vld [vmem:[%s9196_s3 + $0x1a0] sm:$0xff]  ;;  %v1343_v39 = vadd.f32 1.0, %v6538_v10 }
 0x13a   :  { %v6555_v59 = vpop.xlane.xlu1 %737  ;;  %2122 = vperm.xlu1 %4906, %v5072_v19   ;;  %v5078_v48 = vpop.eup %5077  ;;  %5103 = vpow2.f32 %v4742_v33  ;;  %2082 = vperm.xlu0 %4905, %v5076_v0   ;;  %v1339_v33 = vadd.f32 1.0, %v6450_v3  ;;  %v888_v19 = vadd.f32 %v6286_v31, %v200_v57  ;;  %v201_v31 = vld [vmem:[%s9196_s3 + $0x1b0] sm:$0xff] }
 0x13b   :  { %v6557_v26 = vpop.xlane.xlu0 %734  ;;  %v5080_v12 = vpop.eup %5079  ;;  %5105 = vpow2.f32 %v4749_v38  ;;  %v889_v57 = vadd.f32 %v6303_v15, %v201_v31 }
 0x13c   :  { %v5082_v37 = vpop.eup %5081  ;;  %5107 = vrcp.f32 %v1376_v16  ;;  %v1377_v52 = vadd.f32 1.0, %v5080_v12  ;;  %v1341_v12 = vadd.f32 1.0, %v6483_v41 }
 0x13d   :  { %v5084_v17 = vpop.eup %5083  ;;  %5109 = vrcp.f32 %v1345_v55 }
 0x13e   :  { %v6565_v11 = vpop.xlane.xlu1 %743  ;;  %2107 = vperm.xlu1 %4906, %v5078_v48   ;;  %v6573_v23 = vpop.eup %5085  ;;  %5111 = vpow2.f32 %v4752_v13  ;;  %2072 = vperm.xlu0 %4905, %v5082_v37   ;;  %v1374_v38 = vadd.f32 1.0, %v5084_v17  ;;  %v4750_v48 = vmul.f32 -1.442695, %v891_v18 }
 0x13f   :  { %v6567_v8 = vpop.xlane.xlu0 %740  ;;  %v5088_v56 = vpop.eup %5087  ;;  %5113 = vrcp.f32 %v1340_v25  ;;  %v887_v25 = vadd.f32 %v6288_v34, %v199_v22  ;;  %v212_v34 = vld [vmem:[%s9196_s3 + $0x208] sm:$0xff] }
 0x140   :  { %v5090_v20 = vpop.eup %5089  ;;  %5115 = vrcp.f32 %v1342_v27  ;;  %v4747_v27 = vmul.f32 -1.442695, %v888_v19  ;;  %v211_v19 = vld [vmem:[%s9196_s3 + $0x200] sm:$0xff] }
 0x141   :  { %v5092_v55 = vpop.eup %5091  ;;  %5117 = vpow2.f32 %v4745_v58  ;;  %v4744_v58 = vmul.f32 -1.442695, %v885_v42  ;;  %v214_v42 = vld [vmem:[%s9196_s3 + $0x218] sm:$0xff] }
 0x142   :  { %v6583_v16 = vpop.xlane.xlu1 %749  ;;  %2097 = vperm.xlu1 %4906, %v5088_v56   ;;  %v5094_v3 = vpop.eup %5093  ;;  %5119 = vrcp.f32 %v1377_v52  ;;  %2232 = vperm.xlu0 %4905, %v5092_v55   ;;  %v4746_v52 = vmul.f32 -1.442695, %v887_v25  ;;  %v4748_v55 = vmul.f32 -1.442695, %v889_v57 }
 0x143   :  { %v6585_v0 = vpop.xlane.xlu0 %746  ;;  %v5096_v13 = vpop.eup %5095  ;;  %5121 = vrcp.f32 %v1339_v33 }
 0x144   :  { %v5098_v37 = vpop.eup %5097  ;;  %5123 = vrcp.f32 %v1374_v38  ;;  %v1375_v40 = vadd.f32 1.0, %v5096_v13 }
 0x145   :  { %v5100_v10 = vpop.eup %5099  ;;  %5125 = vpow2.f32 %v4750_v48 }
 0x146   :  { %v6594_v7 = vpop.xlane.xlu1 %755  ;;  %2087 = vperm.xlu1 %4906, %v5094_v3   ;;  %v5102_v18 = vpop.eup %5101  ;;  %5127 = vrcp.f32 %v1343_v39  ;;  %2062 = vperm.xlu0 %4905, %v5090_v20   ;;  %v1372_v33 = vadd.f32 1.0, %v5100_v10  ;;  %v900_v20 = vadd.f32 %v6389_v54, %v212_v34  ;;  %v213_v39 = vld [vmem:[%s9196_s3 + $0x210] sm:$0xff]  ;;  %v902_v54 = vadd.f32 %v6409_v46, %v214_v42 }
 0x147   :  { %v6596_v17 = vpop.xlane.xlu0 %752  ;;  %v5104_v41 = vpop.eup %5103  ;;  %5129 = vrcp.f32 %v1341_v12  ;;  %v1364_v3 = vadd.f32 1.0, %v5102_v18  ;;  %v899_v12 = vadd.f32 %v6392_v49, %v211_v19  ;;  %v215_v49 = vld [vmem:[%s9196_s3 + $0x220] sm:$0xff] }
 0x148   :  { %v5106_v56 = vpop.eup %5105  ;;  %5131 = vpow2.f32 %v4747_v27  ;;  %v1363_v13 = vadd.f32 1.0, %v5104_v41  ;;  %v216_v27 = vld [vmem:[%s9196_s3 + $0x228] sm:$0xff]  ;;  %v4759_v18 = vmul.f32 -1.442695, %v900_v20 }
 0x149   :  { %v5108_v38 = vpop.eup %5107  ;;  %5133 = vpow2.f32 %v4744_v58 }
 0x14a   :  { %v6605_v15 = vpop.xlane.xlu1 %761  ;;  %2077 = vperm.xlu1 %4906, %v5098_v37   ;;  %v5110_v48 = vpop.eup %5109  ;;  %5135 = vrcp.f32 %v1375_v40  ;;  %2222 = vperm.xlu0 %4905, %v5108_v38   ;;  %v1370_v37 = vadd.f32 1.0, %v5106_v56  ;;  %v901_v40 = vadd.f32 %v6412_v62, %v213_v39  ;;  %v904_v56 = vadd.f32 %v6422_v28, %v216_v27 }
 0x14b   :  { %v6607_v22 = vpop.xlane.xlu0 %758  ;;  %v5112_v31 = vpop.eup %5111  ;;  %5137 = vpow2.f32 %v4746_v52  ;;  %v4758_v52 = vmul.f32 -1.442695, %v899_v12  ;;  %v4761_v62 = vmul.f32 -1.442695, %v902_v54  ;;  %v903_v38 = vadd.f32 %v6425_v5, %v215_v49  ;;  %v217_v5 = vld [vmem:[%s9196_s3 + $0x230] sm:$0xff] }
 0x14c   :  { %v5114_v25 = vpop.eup %5113  ;;  %5139 = vrcp.f32 %v1372_v33  ;;  %v1373_v46 = vadd.f32 1.0, %v5112_v31  ;;  %v218_v33 = vld [vmem:[%s9196_s3 + $0x238] sm:$0xff]  ;;  %v4763_v12 = vmul.f32 -1.442695, %v904_v56 }
 0x14d   :  { %v5116_v57 = vpop.eup %5115  ;;  %5141 = vpow2.f32 %v4748_v55  ;;  %v226_v55 = vld [vmem:[%s9196_s3 + $0x278] sm:$0xff]  ;;  %v906_v31 = vadd.f32 %v6446_v36, %v218_v33  ;;  %v4762_v27 = vmul.f32 -1.442695, %v903_v38 }
 0x14e   :  { %v6621_v10 = vpop.xlane.xlu1 %767  ;;  %2067 = vperm.xlu1 %4906, %v5110_v48   ;;  %v5118_v34 = vpop.eup %5117  ;;  %5143 = vrcp.f32 %v1364_v3  ;;  %2052 = vperm.xlu0 %4905, %v5116_v57   ;;  %v4760_v48 = vmul.f32 -1.442695, %v901_v40  ;;  %v220_v57 = vld [vmem:[%s9196_s3 + $0x248] sm:$0xff] }
 0x14f   :  { %v6623_v58 = vpop.xlane.xlu0 %764  ;;  %v5120_v41 = vpop.eup %5119  ;;  %5145 = vrcp.f32 %v1363_v13  ;;  %v1366_v39 = vadd.f32 1.0, %v5118_v34  ;;  %v905_v34 = vadd.f32 %v6448_v4, %v217_v5  ;;  %v908_v33 = vadd.f32 %v6460_v50, %v220_v57  ;;  %v222_v4 = vld [vmem:[%s9196_s3 + $0x258] sm:$0xff] }
 0x150   :  { %v6633_v19 = vpop.eup %5121  ;;  %5147 = vrcp.f32 %v1370_v37  ;;  %v914_v37 = vadd.f32 %v6500_v6, %v226_v55  ;;  %v224_v6 = vld [vmem:[%s9196_s3 + $0x268] sm:$0xff] }
 0x151   :  { %v5124_v28 = vpop.eup %5123  ;;  %5149 = vpow2.f32 %v4759_v18 }
 0x152   :  { %v6639_v20 = vpop.xlane.xlu1 %773  ;;  %2227 = vperm.xlu1 %4906, %v5120_v41   ;;  %v5126_v3 = vpop.eup %5125  ;;  %5151 = vrcp.f32 %v1373_v46  ;;  %2212 = vperm.xlu0 %4905, %v5124_v28   ;;  %v4765_v41 = vmul.f32 -1.442695, %v906_v31  ;;  %v912_v28 = vadd.f32 %v6489_v61, %v224_v6  ;;  %v221_v61 = vld [vmem:[%s9196_s3 + $0x250] sm:$0xff] }
 0x153   :  { %v6641_v42 = vpop.xlane.xlu0 %770  ;;  %v5128_v13 = vpop.eup %5127  ;;  %5153 = vpow2.f32 %v4758_v52  ;;  %v1371_v49 = vadd.f32 1.0, %v5126_v3  ;;  %v219_v52 = vld [vmem:[%s9196_s3 + $0x240] sm:$0xff] }
 0x154   :  { %v5130_v54 = vpop.eup %5129  ;;  %5155 = vpow2.f32 %v4761_v62  ;;  %v4773_v62 = vmul.f32 -1.442695, %v914_v37  ;;  %v907_v50 = vadd.f32 %v6463_v29, %v219_v52  ;;  %v910_v37 = vadd.f32 %v6475_v45, %v222_v4 }
 0x155   :  { %v5132_v40 = vpop.eup %5131  ;;  %5157 = vpow2.f32 %v4760_v48  ;;  %v4771_v57 = vmul.f32 -1.442695, %v912_v28 }
 0x156   :  { %v6651_v18 = vpop.xlane.xlu1 %779  ;;  %2057 = vperm.xlu1 %4906, %v5128_v13   ;;  %v5134_v46 = vpop.eup %5133  ;;  %5159 = vrcp.f32 %v1366_v39  ;;  %2042 = vperm.xlu0 %4905, %v5114_v25   ;;  %v1368_v55 = vadd.f32 1.0, %v5132_v40  ;;  %v4764_v39 = vmul.f32 -1.442695, %v905_v34  ;;  %v4766_v34 = vmul.f32 -1.442695, %v907_v50 }
 0x157   :  { %v6653_v36 = vpop.xlane.xlu0 %776  ;;  %v5136_v56 = vpop.eup %5135  ;;  %5161 = vpow2.f32 %v4763_v12  ;;  %v1365_v5 = vadd.f32 1.0, %v5134_v46  ;;  %v4767_v12 = vmul.f32 -1.442695, %v908_v33  ;;  %v909_v46 = vadd.f32 %v6477_v24, %v221_v61 }
 0x158   :  { %v5138_v38 = vpop.eup %5137  ;;  %5163 = vpow2.f32 %v4762_v27  ;;  %v4769_v52 = vmul.f32 -1.442695, %v910_v37 }
 0x159   :  { %v5140_v25 = vpop.eup %5139  ;;  %5165 = vrcp.f32 %v1371_v49  ;;  %v1367_v33 = vadd.f32 1.0, %v5138_v38 }
 0x15a   :  { %v6667_v48 = vpop.xlane.xlu1 %785  ;;  %2217 = vperm.xlu1 %4906, %v5136_v56   ;;  %v5142_v31 = vpop.eup %5141  ;;  %5167 = vpow2.f32 %v4765_v41  ;;  %2202 = vperm.xlu0 %4905, %v5140_v25   ;;  %v225_v56 = vld [vmem:[%s9196_s3 + $0x270] sm:$0xff]  ;;  %v223_v25 = vld [vmem:[%s9196_s3 + $0x260] sm:$0xff] }
 0x15b   :  { %v6669_v3 = vpop.xlane.xlu0 %782  ;;  %v6672_v13 = vpop.eup %5143  ;;  %5169 = vpow2.f32 %v4773_v62  ;;  %v1369_v45 = vadd.f32 1.0, %v5142_v31 }
 0x15c   :  { %v6678_v27 = vpop.eup %5145  ;;  %5171 = vrcp.f32 %v1368_v55 }
 0x15d   :  { %v5148_v49 = vpop.eup %5147  ;;  %5173 = vpow2.f32 %v4764_v39  ;;  %v913_v39 = vadd.f32 %v6502_v2, %v225_v56 }
 0x15e   :  { %v6680_v40 = vpop.xlane.xlu1 %791  ;;  %2047 = vperm.xlu1 %4906, %v5130_v54   ;;  %v5150_v6 = vpop.eup %5149  ;;  %5175 = vrcp.f32 %v1365_v5  ;;  %2032 = vperm.xlu0 %4905, %v6553_v53   ;;  %v4768_v53 = vmul.f32 -1.442695, %v909_v46 }
 0x15f   :  { %v6682_v29 = vpop.xlane.xlu0 %788  ;;  %v5152_v41 = vpop.eup %5151  ;;  %5177 = vpow2.f32 %v4767_v12  ;;  %v1380_v28 = vadd.f32 1.0, %v5150_v6  ;;  %v4772_v2 = vmul.f32 -1.442695, %v913_v39  ;;  %v230_v39 = vld [vmem:[%s9196_s3 + $0x298] sm:$0xff] }
 0x160   :  { %v5154_v54 = vpop.eup %5153  ;;  %5179 = vpow2.f32 %v4771_v57 }
 0x161   :  { %v5156_v4 = vpop.eup %5155  ;;  %5181 = vpow2.f32 %v4766_v34  ;;  %v1379_v50 = vadd.f32 1.0, %v5154_v54  ;;  %v911_v34 = vadd.f32 %v6492_v60, %v223_v25 }
 0x162   :  { %v6689_v62 = vpop.xlane.xlu1 %797  ;;  %2207 = vperm.xlu1 %4906, %v5152_v41   ;;  %v5158_v24 = vpop.eup %5157  ;;  %5183 = vrcp.f32 %v1369_v45  ;;  %2192 = vperm.xlu0 %4905, %v5148_v49   ;;  %v1382_v5 = vadd.f32 1.0, %v5156_v4  ;;  %v258_v49 = vld [vmem:[%s9196_s3 + $0x378] sm:$0xff] }
 0x163   :  { %v6691_v55 = vpop.xlane.xlu0 %794  ;;  %v6697_v38 = vpop.eup %5159  ;;  %5185 = vpow2.f32 %v4769_v52  ;;  %v1381_v57 = vadd.f32 1.0, %v5158_v24 }
 0x164   :  { %v5162_v31 = vpop.eup %5161  ;;  %5187 = vrcp.f32 %v1367_v33 }
 0x165   :  { %v5164_v61 = vpop.eup %5163  ;;  %5189 = vrcp.f32 %v1380_v28  ;;  %v1384_v46 = vadd.f32 1.0, %v5162_v31 }
 0x166   :  { %v804_v12 = vpop.xlane.xlu1 %803  ;;  %2037 = vperm.xlu1 %4906, %v6633_v19   ;;  %v5166_v6 = vpop.eup %5165  ;;  %5191 = vpow2.f32 %v4768_v53  ;;  %2022 = vperm.xlu0 %4905, %v6504_v32   ;;  %v228_v19 = vld [vmem:[%s9196_s3 + $0x288] sm:$0xff]  ;;  %v1383_v52 = vadd.f32 1.0, %v5164_v61  ;;  %v4770_v32 = vmul.f32 -1.442695, %v911_v34 }
 0x167   :  { %v6700_v37 = vpop.xlane.xlu0 %800  ;;  %v5168_v45 = vpop.eup %5167  ;;  %5193 = vrcp.f32 %v1379_v50  ;;  %v916_v24 = vadd.f32 %v6510_v14, %v228_v19  ;;  %v256_v14 = vld [vmem:[%s9196_s3 + $0x368] sm:$0xff] }
 0x168   :  { %v5170_v41 = vpop.eup %5169  ;;  %5195 = vrcp.f32 %v1382_v5  ;;  %v1386_v28 = vadd.f32 1.0, %v5168_v45  ;;  %v229_v45 = vld [vmem:[%s9196_s3 + $0x290] sm:$0xff] }
 0x169   :  { %v5172_v54 = vpop.eup %5171  ;;  %5197 = vrcp.f32 %v1381_v57  ;;  %v1394_v25 = vadd.f32 1.0, %v5170_v41 }
 0x16a   :  { %v810_v60 = vpop.xlane.xlu1 %809  ;;  %2197 = vperm.xlu1 %4906, %v5166_v6   ;;  %v5174_v4 = vpop.eup %5173  ;;  %5199 = vpow2.f32 %v4772_v2  ;;  %2182 = vperm.xlu0 %4905, %v5172_v54   ;;  %v4775_v2 = vmul.f32 -1.442695, %v916_v24 }
 0x16b   :  { %v807_v56 = vpop.xlane.xlu0 %806  ;;  %v946_v33 = vadd.f32 %v810_v60, %v258_v49  ;;  %v6711_v53 = vpop.eup %5175  ;;  %5201 = vrcp.f32 %v1384_v46  ;;  %v1385_v57 = vadd.f32 1.0, %v5174_v4  ;;  %v918_v49 = vadd.f32 %v6530_v21, %v230_v39 }
 0x16c   :  { %v5178_v50 = vpop.eup %5177  ;;  %5203 = vrcp.f32 %v1383_v52  ;;  %v232_v52 = vld [vmem:[%s9196_s3 + $0x2a8] sm:$0xff]  ;;  %v944_v60 = vadd.f32 %v804_v12, %v256_v14  ;;  %v234_v12 = vld [vmem:[%s9196_s3 + $0x2b8] sm:$0xff] }
 0x16d   :  { %v4805_v31 = vmul.f32 -1.442695, %v946_v33  ;;  %v5180_v61 = vpop.eup %5179  ;;  %5205 = vpow2.f32 %v4770_v32  ;;  %v1388_v46 = vadd.f32 1.0, %v5178_v50  ;;  %v917_v33 = vadd.f32 %v6532_v9, %v229_v45 }
 0x16e   :  { %v6716_v5 = vpop.xlane.xlu1 %815  ;;  %2027 = vperm.xlu1 %4906, %v6573_v23   ;;  %v5182_v6 = vpop.eup %5181  ;;  %5207 = vrcp.f32 %v1386_v28  ;;  %2012 = vperm.xlu0 %4905, %v6453_v47   ;;  %v1392_v41 = vadd.f32 1.0, %v5180_v61  ;;  %v257_v47 = vld [vmem:[%s9196_s3 + $0x370] sm:$0xff]  ;;  %v4777_v28 = vmul.f32 -1.442695, %v918_v49  ;;  %v920_v39 = vadd.f32 %v6544_v44, %v232_v52 }
 0x16f   :  { %v6722_v34 = vpop.xlane.xlu0 %812  ;;  %v5184_v23 = vpop.eup %5183  ;;  %5209 = vrcp.f32 %v1394_v25  ;;  %v1387_v32 = vadd.f32 1.0, %v5182_v6  ;;  %v4803_v61 = vmul.f32 -1.442695, %v944_v60  ;;  %v4776_v6 = vmul.f32 -1.442695, %v917_v33 }
 0x170   :  { %v5186_v19 = vpop.eup %5185  ;;  %5211 = vpow2.f32 %v4805_v31  ;;  %v231_v31 = vld [vmem:[%s9196_s3 + $0x2a0] sm:$0xff]  ;;  %v922_v44 = vadd.f32 %v6555_v59, %v234_v12 }
 0x171   :  { %v5188_v21 = vpop.eup %5187  ;;  %5213 = vrcp.f32 %v1385_v57  ;;  %v1390_v25 = vadd.f32 1.0, %v5186_v19  ;;  %v945_v57 = vadd.f32 %v807_v56, %v257_v47  ;;  %v236_v19 = vld [vmem:[%s9196_s3 + $0x2c8] sm:$0xff] }
 0x172   :  { %v6732_v54 = vpop.xlane.xlu1 %821  ;;  %2187 = vperm.xlu1 %4906, %v5184_v23   ;;  %v6738_v4 = vpop.eup %5189  ;;  %5215 = vpow2.f32 %v4775_v2  ;;  %2172 = vperm.xlu0 %4905, %v6697_v38   ;;  %v254_v2 = vld [vmem:[%s9196_s3 + $0x358] sm:$0xff]  ;;  %v4779_v23 = vmul.f32 -1.442695, %v920_v39 }
 0x173   :  { %v5192_v24 = vpop.eup %5191  ;;  %5217 = vrcp.f32 %v1388_v46  ;;  %v6745_v9 = vpop.xlane.xlu0 %818  ;;  %v233_v46 = vld [vmem:[%s9196_s3 + $0x2b0] sm:$0xff]  ;;  %v4804_v52 = vmul.f32 -1.442695, %v945_v57 }
 0x174   :  { %v6747_v50 = vpop.eup %5193  ;;  %5219 = vrcp.f32 %v1392_v41  ;;  %v1389_v45 = vadd.f32 1.0, %v5192_v24  ;;  %v942_v41 = vadd.f32 %v6689_v62, %v254_v2  ;;  %v235_v62 = vld [vmem:[%s9196_s3 + $0x2c0] sm:$0xff]  ;;  %v924_v24 = vadd.f32 %v6565_v11, %v236_v19 }
 0x175   :  { %v6755_v38 = vpop.eup %5195  ;;  %5221 = vrcp.f32 %v1387_v32  ;;  %v923_v11 = vadd.f32 %v6567_v8, %v235_v62 }
 0x176   :  { %v6752_v14 = vpop.xlane.xlu1 %827  ;;  %2017 = vperm.xlu1 %4906, %v6535_v30   ;;  %v6761_v49 = vpop.eup %5197  ;;  %5223 = vpow2.f32 %v4777_v28  ;;  %2002 = vperm.xlu0 %4905, %v6427_v43   ;;  %v919_v30 = vadd.f32 %v6547_v51, %v231_v31  ;;  %v4781_v51 = vmul.f32 -1.442695, %v922_v44  ;;  %v921_v28 = vadd.f32 %v6557_v26, %v233_v46  ;;  %v238_v26 = vld [vmem:[%s9196_s3 + $0x2d8] sm:$0xff] }
 0x177   :  { %v5200_v56 = vpop.eup %5199  ;;  %5225 = vrcp.f32 %v1390_v25  ;;  %v6778_v32 = vpop.xlane.xlu0 %824  ;;  %v255_v25 = vld [vmem:[%s9196_s3 + $0x360] sm:$0xff]  ;;  %v4801_v31 = vmul.f32 -1.442695, %v942_v41  ;;  %v926_v8 = vadd.f32 %v6583_v16, %v238_v26  ;;  %v242_v41 = vld [vmem:[%s9196_s3 + $0x2f8] sm:$0xff] }
 0x178   :  { %v6768_v59 = vpop.eup %5201  ;;  %5227 = vpow2.f32 %v4803_v61  ;;  %v1393_v47 = vadd.f32 1.0, %v5200_v56  ;;  %v4780_v2 = vmul.f32 -1.442695, %v921_v28  ;;  %v943_v56 = vadd.f32 %v6700_v37, %v255_v25 }
 0x179   :  { %v6776_v60 = vpop.eup %5203  ;;  %5229 = vpow2.f32 %v4776_v6  ;;  %v252_v6 = vld [vmem:[%s9196_s3 + $0x348] sm:$0xff]  ;;  %v930_v25 = vadd.f32 %v6605_v15, %v242_v41 }
 0x17a   :  { %v6774_v43 = vpop.xlane.xlu1 %833  ;;  %2177 = vperm.xlu1 %4906, %v5188_v21   ;;  %v5206_v33 = vpop.eup %5205  ;;  %5231 = vrcp.f32 %v1389_v45  ;;  %2162 = vperm.xlu0 %4905, %v6672_v13   ;;  %v4778_v21 = vmul.f32 -1.442695, %v919_v30  ;;  %v237_v45 = vld [vmem:[%s9196_s3 + $0x2d0] sm:$0xff]  ;;  %v240_v30 = vld [vmem:[%s9196_s3 + $0x2e8] sm:$0xff]  ;;  %v940_v37 = vadd.f32 %v6680_v40, %v252_v6  ;;  %v239_v40 = vld [vmem:[%s9196_s3 + $0x2e0] sm:$0xff] }
 0x17b   :  { %v6785_v12 = vpop.eup %5207  ;;  %5233 = vpow2.f32 %v4779_v23  ;;  %v1391_v57 = vadd.f32 1.0, %v5206_v33  ;;  %v4783_v23 = vmul.f32 -1.442695, %v924_v24  ;;  %v6813_v46 = vpop.xlane.xlu0 %830  ;;  %v4782_v33 = vmul.f32 -1.442695, %v923_v11 }
 0x17c   :  { %v5210_v39 = vpop.eup %5209  ;;  %5235 = vpow2.f32 %v4804_v52  ;;  %v928_v62 = vadd.f32 %v6594_v7, %v240_v30  ;;  %v250_v7 = vld [vmem:[%s9196_s3 + $0x338] sm:$0xff]  ;;  %v4799_v26 = vmul.f32 -1.442695, %v940_v37  ;;  %v927_v15 = vadd.f32 %v6596_v17, %v239_v40  ;;  %v244_v30 = vld [vmem:[%s9196_s3 + $0x308] sm:$0xff] }
 0x17d   :  { %v5212_v13 = vpop.eup %5211  ;;  %5237 = vpow2.f32 %v4781_v51 }
 0x17e   :  { %v6794_v61 = vpop.permute.xlu1 %1922  ;;  %2007 = vperm.xlu1 %4906, %v6468_v63   ;;  %v6801_v44 = vpop.eup %5213  ;;  %5239 = vrcp.f32 %v1393_v47  ;;  %2312 = vperm.xlu0 %4905, %v5210_v39   ;;  %v1426_v52 = vadd.f32 1.0, %v5212_v13  ;;  %v925_v47 = vadd.f32 %v6585_v0, %v237_v45  ;;  %v253_v0 = vld [vmem:[%s9196_s3 + $0x350] sm:$0xff] }
 0x17f   :  { %v6807_v63 = vpop.eup %5215  ;;  %5241 = vpow2.f32 %v4778_v21  ;;  %v4802_v21 = vmul.f32 -1.442695, %v943_v56  ;;  %v941_v45 = vadd.f32 %v6691_v55, %v253_v0 }
 0x180   :  { %v5218_v19 = vpop.eup %5217  ;;  %5243 = vpow2.f32 %v4801_v31 }
 0x181   :  { %v5220_v16 = vpop.eup %5219  ;;  %5245 = vrcp.f32 %v1391_v57  ;;  %v4784_v57 = vmul.f32 -1.442695, %v925_v47  ;;  %v243_v47 = vld [vmem:[%s9196_s3 + $0x300] sm:$0xff] }
 0x182   :  { %v6819_v51 = vpop.permute.xlu1 %1927  ;;  %2167 = vperm.xlu1 %4906, %v6711_v53   ;;  %v6823_v28 = vpop.eup %5221  ;;  %5247 = vpow2.f32 %v4780_v2  ;;  %2302 = vperm.xlu0 %4905, %v5220_v16   ;;  %v4785_v53 = vmul.f32 -1.442695, %v926_v8  ;;  %v4787_v2 = vmul.f32 -1.442695, %v928_v62  ;;  %v938_v8 = vadd.f32 %v6667_v48, %v250_v7 }
 0x183   :  { %v6829_v24 = vpop.eup %5223  ;;  %5249 = vpow2.f32 %v4783_v23  ;;  %v6842_v11 = vpop.permute.xlu0 %1917  ;;  %v4789_v23 = vmul.f32 -1.442695, %v930_v25  ;;  %v4800_v62 = vmul.f32 -1.442695, %v941_v45 }
 0x184   :  { %v5226_v39 = vpop.eup %5225  ;;  %5251 = vrcp.f32 %v1426_v52  ;;  %v4786_v52 = vmul.f32 -1.442695, %v927_v15 }
 0x185   :  { %v5228_v13 = vpop.eup %5227  ;;  %5253 = vpow2.f32 %v4782_v33 }
 0x186   :  { %v6838_v31 = vpop.permute.xlu1 %1932  ;;  %1997 = vperm.xlu1 %4906, %v6433_v1   ;;  %v6844_v6 = vpop.eup %5229  ;;  %5255 = vpow2.f32 %v4802_v21  ;;  %2292 = vperm.xlu0 %4905, %v5226_v39   ;;  %v241_v1 = vld [vmem:[%s9196_s3 + $0x2f0] sm:$0xff]  ;;  %v1424_v55 = vadd.f32 1.0, %v5228_v13  ;;  %v932_v21 = vadd.f32 %v6621_v10, %v244_v30  ;;  %v248_v10 = vld [vmem:[%s9196_s3 + $0x328] sm:$0xff]  ;;  %v6884_v13 = vld [vmem:[%s9197_s4] sm:$0xff] }
 0x187   :  { %v6847_v56 = vpop.eup %5231  ;;  %5257 = vpow2.f32 %v4785_v53  ;;  %v929_v48 = vadd.f32 %v6607_v22, %v241_v1  ;;  %v251_v53 = vld [vmem:[%s9196_s3 + $0x340] sm:$0xff] }
 0x188   :  { %v6853_v17 = vpop.eup %5233  ;;  %5259 = vpow2.f32 %v4799_v26  ;;  %v4791_v1 = vmul.f32 -1.442695, %v932_v21 }
 0x189   :  { %v5236_v37 = vpop.eup %5235  ;;  %5261 = vpow2.f32 %v4784_v57  ;;  %v6861_v16 = vpop.permute.xlu0 %2147  ;;  %v6889_v57 = vld [vmem:[%s9197_s4 + $0x20] sm:$0xff] }
 0x18a   :  { %v6858_v41 = vpop.permute.xlu1 %1937  ;;  %2157 = vperm.xlu1 %4906, %v6678_v27   ;;  %v5238_v33 = vpop.eup %5237  ;;  %5263 = vpow2.f32 %v4787_v2  ;;  %2282 = vperm.xlu0 %4905, %v5218_v19   ;;  %v4797_v27 = vmul.f32 -1.442695, %v938_v8  ;;  %v1425_v0 = vadd.f32 1.0, %v5236_v37  ;;  %v931_v19 = vadd.f32 %v6623_v58, %v243_v47  ;;  %9218 = vst [vmem:[#allocation2_spill] sm:$0xff] %v6889_v57 }
 0x18b   :  { %v5240_v40 = vpop.eup %5239  ;;  %5265 = vpow2.f32 %v4789_v23  ;;  %v1402_v7 = vadd.f32 1.0, %v5238_v33  ;;  %v4788_v2 = vmul.f32 -1.442695, %v929_v48  ;;  %v939_v58 = vadd.f32 %v6682_v29, %v251_v53 }
 0x18c   :  { %v6871_v25 = vpop.eup %5241  ;;  %5267 = vrcp.f32 %v1424_v55  ;;  %v4815_v45 = vcombine.high %v6884_v13, %v6889_v57  ;;  %v246_v55 = vld [vmem:[%s9196_s3 + $0x318] sm:$0xff]  ;;  %v936_v29 = vadd.f32 %v6651_v18, %v248_v10  ;;  %v4790_v33 = vmul.f32 -1.442695, %v931_v19 }
 0x18d   :  { %v5244_v39 = vpop.eup %5243  ;;  %5269 = vpow2.f32 %v4786_v52  ;;  %v6879_v26 = vpop.permute.xlu0 %1977  ;;  %v934_v18 = vadd.f32 %v6639_v20, %v246_v55  ;;  %v1704_v20 = vld [vmem:[%s9198_s1 + $0xe8] sm:$0xff] }
 0x18e   :  { %v6873_v22 = vpop.permute.xlu1 %1942  ;;  %2307 = vperm.xlu1 %4906, %v5240_v40   ;;  %v5246_v15 = vpop.eup %5245  ;;  %5271 = vpow2.f32 %v4800_v62  ;;  %2272 = vperm.xlu0 %4905, %v6785_v12   ;;  %v1422_v37 = vadd.f32 1.0, %v5244_v39  ;;  %v4798_v62 = vmul.f32 -1.442695, %v939_v58  ;;  %v245_v39 = vld [vmem:[%s9196_s3 + $0x310] sm:$0xff] }
 0x18f   :  { %v6895_v23 = vpop.eup %5247  ;;  %5273 = vpow2.f32 %v4797_v27  ;;  %3328 = vmatprep.mubr.bf16.mxu0 %v4815_v45  ;;  %v249_v27 = vld [vmem:[%s9196_s3 + $0x330] sm:$0xff]  ;;  %v1703_v45 = vld [vmem:[%s9198_s1 + $0xe0] sm:$0xff]  ;;  %v933_v55 = vadd.f32 %v6641_v42, %v245_v39 }
 0x190   :  { %v5250_v30 = vpop.eup %5249  ;;  %5275 = vrcp.f32 %v1425_v0  ;;  %v4795_v0 = vmul.f32 -1.442695, %v936_v29  ;;  %v1769_v39 = vld [vmem:[%s9198_s1 + $0x2f0] sm:$0xff] }
 0x191   :  { %v5252_v52 = vpop.eup %5251  ;;  %5277 = vrcp.f32 %v1402_v7  ;;  %v6905_v48 = vpop.permute.xlu0 %2137  ;;  %v1404_v21 = vadd.f32 1.0, %v5250_v30 }
 0x192   :  { %v6903_v12 = vpop.permute.xlu1 %1947  ;;  %2297 = vperm.xlu1 %4906, %v5246_v15   ;;  %v6907_v47 = vpop.eup %5253  ;;  %5279 = vpow2.f32 %v4788_v2  ;;  %2472 = vperm.xlu0 %4905, %v5252_v52   ;;  %v937_v2 = vadd.f32 %v6669_v3, %v249_v27  ;;  %v4793_v3 = vmul.f32 -1.442695, %v934_v18 }
 0x193   :  { %v5256_v40 = vpop.eup %5255  ;;  %5281 = vpow2.f32 %v4791_v1  ;;  %v1705_v1 = vld [vmem:[%s9198_s1 + $0xf0] sm:$0xff] }
 0x194   :  { %v6913_v53 = vpop.eup %5257  ;;  %5283 = vrcp.f32 %v1422_v37  ;;  %v1423_v58 = vadd.f32 1.0, %v5256_v40  ;;  %v4796_v42 = vmul.f32 -1.442695, %v937_v2 }
 0x195   :  { %v5260_v19 = vpop.eup %5259  ;;  %5285 = vpow2.f32 %v4790_v33  ;;  %v6919_v10 = vpop.permute.xlu0 %1967 }
 0x196   :  { %v1988_v7 = vpop.permute.xlu1 %1987  ;;  %2287 = vperm.xlu1 %4906, %v6847_v56   ;;  %v6924_v15 = vpop.eup %5261  ;;  %5287 = vpow2.f32 %v4798_v62  ;;  %2262 = vperm.xlu0 %4905, %v6768_v59   ;;  %v1706_v56 = vld [vmem:[%s9198_s1 + $0xf8] sm:$0xff]  ;;  %v1420_v59 = vadd.f32 1.0, %v5260_v19  ;;  %v4792_v19 = vmul.f32 -1.442695, %v933_v55 }
 0x197   :  { %v6937_v30 = vpop.eup %5263  ;;  %5289 = vrcp.f32 %v1404_v21  ;;  %v2544_v62 = vmul.f32 %v1988_v7, %v1704_v20  ;;  %v2543_v27 = vmul.f32 %v1988_v7, %v1703_v45  ;;  %v1768_v21 = vld [vmem:[%s9198_s1 + $0x2e8] sm:$0xff]  ;;  %v247_v20 = vld [vmem:[%s9196_s3 + $0x320] sm:$0xff] }
 0x198   :  { %v5266_v29 = vpop.eup %5265  ;;  %5291 = vpow2.f32 %v4795_v0  ;;  %v1767_v0 = vld [vmem:[%s9198_s1 + $0x2e0] sm:$0xff] }
 0x199   :  { %v5268_v52 = vpop.eup %5267  ;;  %v6941_v33 = vpop.permute.xlu0 %2127  ;;  %5293 = vrcp.f32 %v1423_v58  ;;  %v1410_v45 = vadd.f32 1.0, %v5266_v29  ;;  %v935_v29 = vadd.f32 %v6653_v36, %v247_v20  ;;  %v1406_v36 = vadd.f32 1.0, %v6913_v53 }
 0x19a   :  { %v1993_v37 = vpop.permute.xlu1 %1992  ;;  %2277 = vperm.xlu1 %4906, %v6823_v28   ;;  %v6946_v18 = vpop.eup %5269  ;;  %2462 = vperm.xlu0 %4905, %v5268_v52   ;;  %v1770_v28 = vld [vmem:[%s9198_s1 + $0x2f8] sm:$0xff]  ;;  %5295 = vpow2.f32 %v4793_v3  ;;  %v1699_v52 = vld [vmem:[%s9198_s1 + $0xc0] sm:$0xff]  ;;  %v2608_v3 = vmul.f32 %v6861_v16, %v1768_v21 }
 0x19b   :  { %v2546_v40 = vmul.f32 %v1993_v37, %v1706_v56  ;;  %v2545_v8 = vmul.f32 %v1993_v37, %v1705_v1  ;;  %v5272_v7 = vpop.eup %5271  ;;  %5297 = vrcp.f32 %v1420_v59  ;;  %v1700_v59 = vld [vmem:[%s9198_s1 + $0xc8] sm:$0xff]  ;;  %v2539_v20 = vmul.f32 %v6879_v26, %v1699_v52 }
 0x19c   :  { %v5274_v56 = vpop.eup %5273  ;;  %5299 = vpow2.f32 %v4796_v42  ;;  %v4794_v52 = vmul.f32 -1.442695, %v935_v29 }
 0x19d   :  { %v2770_v2 = vpack.c.bf16 %v2546_v40, %v2544_v62  ;;  %v2769_v58 = vpack.c.bf16 %v2545_v8, %v2543_v27  ;;  %v5276_v37 = vpop.eup %5275  ;;  %v6964_v57 = vpop.permute.xlu0 %1957  ;;  %v2607_v62 = vmul.f32 %v6861_v16, %v1767_v0  ;;  %v1701_v27 = vld [vmem:[%s9198_s1 + $0xd0] sm:$0xff]  ;;  %v1702_v16 = vld [vmem:[%s9198_s1 + $0xd8] sm:$0xff]  ;;  %5301 = vpow2.f32 %v4792_v19 }
 0x19e   :  { %v2153_v1 = vpop.permute.xlu1 %2152  ;;  %2267 = vperm.xlu1 %4906, %v6801_v44   ;;  %v6968_v40 = vpop.eup %5277  ;;  %v1421_v44 = vadd.f32 1.0, %v5272_v7  ;;  %2252 = vperm.xlu0 %4905, %v6755_v38   ;;  %5303 = vrcp.f32 %v1410_v45  ;;  %v1418_v38 = vadd.f32 1.0, %v5274_v56  ;;  %v6996_v56 = vld [vmem:[%s9197_s4 + $0x8] sm:$0xff] }
 0x19f   :  { %3296 = vmatprep.subr.bf16.mxu0 %v2770_v2  ;;  %v2610_v55 = vmul.f32 %v2153_v1, %v1770_v28  ;;  %v2609_v8 = vmul.f32 %v2153_v1, %v1769_v39  ;;  %v6981_v21 = vpop.eup %5279  ;;  %v2540_v2 = vmul.f32 %v6879_v26, %v1700_v59  ;;  %v7001_v45 = vld [vmem:[%s9197_s4 + $0x28] sm:$0xff] }
 0x1a0   :  { %3297 = vmatpush1.bf16.msra.mxu0 %v2769_v58  ;;  %v6984_v0 = vpop.eup %5281  ;;  %v1763_v58 = vld [vmem:[%s9198_s1 + $0x2c0] sm:$0xff]  ;;  %5305 = vrcp.f32 %v1421_v44 }
 0x1a1   :  { %v2802_v42 = vpack.c.bf16 %v2610_v55, %v2608_v3  ;;  %v2801_v28 = vpack.c.bf16 %v2609_v8, %v2607_v62  ;;  %v5284_v7 = vpop.eup %5283  ;;  %v6991_v1 = vpop.permute.xlu0 %2117  ;;  %v1764_v3 = vld [vmem:[%s9198_s1 + $0x2c8] sm:$0xff]  ;;  %v1765_v55 = vld [vmem:[%s9198_s1 + $0x2d0] sm:$0xff]  ;;  %v1766_v62 = vld [vmem:[%s9198_s1 + $0x2d8] sm:$0xff]  ;;  %v4817_v8 = vcombine.high %v6996_v56, %v7001_v45  ;;  %5307 = vrcp.f32 %v1406_v36 }
 0x1a2   :  { %v1983_v39 = vpop.permute.xlu1 %1982  ;;  %2467 = vperm.xlu1 %4906, %v5276_v37   ;;  %v7003_v26 = vpop.eup %5285  ;;  %v1405_v37 = vadd.f32 1.0, %v6924_v15  ;;  %2452 = vperm.xlu0 %4905, %v5284_v7   ;;  %5309 = vrcp.f32 %v1418_v38  ;;  %v2603_v36 = vmul.f32 %v6905_v48, %v1763_v58  ;;  %v2604_v7 = vmul.f32 %v6905_v48, %v1764_v3  ;;  %v1697_v48 = vld [vmem:[%s9198_s1 + $0xb0] sm:$0xff]  ;;  %v1698_v58 = vld [vmem:[%s9198_s1 + $0xb8] sm:$0xff] }
 0x1a3   :  { %v2541_v53 = vmul.f32 %v1983_v39, %v1701_v27  ;;  %v2542_v19 = vmul.f32 %v1983_v39, %v1702_v16  ;;  %3429 = vmatprep.subr.bf16.mxu1 %v2802_v42  ;;  %v5288_v15 = vpop.eup %5287  ;;  %v1408_v16 = vadd.f32 1.0, %v6937_v30  ;;  %3461 = vmatprep.mubr.bf16.mxu1 %v4817_v8  ;;  %v266_v39 = vld [vmem:[%s9196_s3 + $0x3b8] sm:$0xff]  ;;  %5311 = vpow2.f32 %v4794_v52 }
 0x1a4   :  { %3430 = vmatpush1.bf16.msra.mxu1 %v2801_v28  ;;  %v7019_v27 = vpop.eup %5289  ;;  %5313 = vrcp.f32 %v1405_v37  ;;  %v1407_v52 = vadd.f32 1.0, %v6946_v18  ;;  %v1759_v37 = vld [vmem:[%s9198_s1 + $0x2a0] sm:$0xff] }
 0x1a5   :  { %v2768_v29 = vpack.c.bf16 %v2542_v19, %v2540_v2  ;;  %v2767_v44 = vpack.c.bf16 %v2541_v53, %v2539_v20  ;;  %v5292_v28 = vpop.eup %5291  ;;  %v1695_v20 = vld [vmem:[%s9198_s1 + $0xa0] sm:$0xff]  ;;  %v7031_v2 = vpop.permute.xlu0 %1952  ;;  %v1696_v53 = vld [vmem:[%s9198_s1 + $0xa8] sm:$0xff]  ;;  %5315 = vrcp.f32 %v1408_v16  ;;  %v1409_v16 = vadd.f32 1.0, %v6981_v21 }
 0x1a6   :  { %v2143_v42 = vpop.permute.xlu1 %2142  ;;  %2257 = vperm.xlu1 %4906, %v6776_v60   ;;  %v1419_v60 = vadd.f32 1.0, %v5288_v15  ;;  %2242 = vperm.xlu0 %4905, %v6738_v4   ;;  %v5294_v19 = vpop.eup %5293  ;;  %v1416_v8 = vadd.f32 1.0, %v5292_v28  ;;  %v954_v4 = vadd.f32 %v6774_v43, %v266_v39  ;;  %v1760_v43 = vld [vmem:[%s9198_s1 + $0x2a8] sm:$0xff]  ;;  %v1762_v28 = vld [vmem:[%s9198_s1 + $0x2b8] sm:$0xff] }
 0x1a7   :  { %v2605_v30 = vmul.f32 %v2143_v42, %v1765_v55  ;;  %v2606_v38 = vmul.f32 %v2143_v42, %v1766_v62  ;;  %3298 = vmatprep.subr.bf16.mxu0 %v2768_v29  ;;  %v5296_v62 = vpop.eup %5295  ;;  %v2536_v42 = vmul.f32 %v6919_v10, %v1696_v53 }
 0x1a8   :  { %3299 = vmatpush1.bf16.msra.mxu0 %v2767_v44  ;;  %v5298_v29 = vpop.eup %5297  ;;  %v2535_v44 = vmul.f32 %v6919_v10, %v1695_v20  ;;  %5317 = vrcp.f32 %v1419_v60  ;;  %v1761_v10 = vld [vmem:[%s9198_s1 + $0x2b0] sm:$0xff]  ;;  %v4813_v60 = vmul.f32 -1.442695, %v954_v4  ;;  %v1690_v4 = vld [vmem:[%s9198_s1 + $0x78] sm:$0xff] }
 0x1a9   :  { %v2800_v3 = vpack.c.bf16 %v2606_v38, %v2604_v7  ;;  %v2799_v55 = vpack.c.bf16 %v2605_v30, %v2603_v36  ;;  %v7050_v59 = vpop.permute.xlu0 %2112  ;;  %v5300_v39 = vpop.eup %5299  ;;  %5319 = vrcp.f32 %v1407_v52  ;;  %v1412_v7 = vadd.f32 1.0, %v6984_v0  ;;  %v264_v38 = vld [vmem:[%s9196_s3 + $0x3a8] sm:$0xff]  ;;  %v1691_v0 = vld [vmem:[%s9198_s1 + $0x80] sm:$0xff] }
 0x1aa   :  { %v1973_v15 = vpop.permute.xlu1 %1972  ;;  %2457 = vperm.xlu1 %4906, %v5294_v19   ;;  %2442 = vperm.xlu0 %4905, %v5298_v29   ;;  %v7063_v30 = vpop.eup %5301  ;;  %5321 = vrcp.f32 %v1416_v8  ;;  %v2600_v19 = vmul.f32 %v6941_v33, %v1760_v43  ;;  %v1692_v52 = vld [vmem:[%s9198_s1 + $0x88] sm:$0xff]  ;;  %v2531_v43 = vmul.f32 %v6964_v57, %v1691_v0 }
 0x1ab   :  { %v2537_v18 = vmul.f32 %v1973_v15, %v1697_v48  ;;  %v2538_v36 = vmul.f32 %v1973_v15, %v1698_v58  ;;  %3431 = vmatprep.subr.bf16.mxu1 %v2800_v3  ;;  %v5304_v48 = vpop.eup %5303  ;;  %v2599_v58 = vmul.f32 %v6941_v33, %v1759_v37  ;;  %5323 = vrcp.f32 %v1409_v16  ;;  %v1693_v33 = vld [vmem:[%s9198_s1 + $0x90] sm:$0xff]  ;;  %v1694_v15 = vld [vmem:[%s9198_s1 + $0x98] sm:$0xff]  ;;  %v1688_v16 = vld [vmem:[%s9198_s1 + $0x68] sm:$0xff] }
 0x1ac   :  { %3432 = vmatpush1.bf16.msra.mxu1 %v2799_v55  ;;  %5325 = vrcp.f32 %v1412_v7  ;;  %v1689_v7 = vld [vmem:[%s9198_s1 + $0x70] sm:$0xff] }
 0x1ad   :  { %v2766_v21 = vpack.c.bf16 %v2538_v36, %v2536_v42  ;;  %v2765_v20 = vpack.c.bf16 %v2537_v18, %v2535_v44  ;;  %v7077_v3 = vpop.permute.xlu0 %2102  ;;  %v5306_v29 = vpop.eup %5305  ;;  %v952_v44 = vadd.f32 %v6752_v14, %v264_v38  ;;  %v1414_v36 = vadd.f32 1.0, %v5296_v62  ;;  %v1755_v62 = vld [vmem:[%s9198_s1 + $0x280] sm:$0xff] }
 0x1ae   :  { %v2133_v53 = vpop.permute.xlu1 %2132  ;;  %2247 = vperm.xlu1 %4906, %v6761_v49   ;;  %v1417_v49 = vadd.f32 1.0, %v5300_v39  ;;  %2392 = vperm.xlu0 %4905, %v5304_v48   ;;  %v7089_v18 = vpop.eup %5307  ;;  %5327 = vpow2.f32 %v4813_v60  ;;  %v1686_v39 = vld [vmem:[%s9198_s1 + $0x58] sm:$0xff]  ;;  %v2532_v14 = vmul.f32 %v6964_v57, %v1692_v52  ;;  %v1756_v57 = vld [vmem:[%s9198_s1 + $0x288] sm:$0xff]  ;;  %v1757_v48 = vld [vmem:[%s9198_s1 + $0x290] sm:$0xff] }
 0x1af   :  { %v2601_v55 = vmul.f32 %v2133_v53, %v1761_v10  ;;  %v2602_v8 = vmul.f32 %v2133_v53, %v1762_v28  ;;  %3300 = vmatprep.subr.bf16.mxu0 %v2766_v21  ;;  %v5310_v28 = vpop.eup %5309  ;;  %v2530_v21 = vmul.f32 %v7031_v2, %v1690_v4  ;;  %v7109_v53 = vadd.f32 1.0, %v6907_v47  ;;  %v265_v47 = vld [vmem:[%s9196_s3 + $0x3b0] sm:$0xff]  ;;  %v1684_v52 = vld [vmem:[%s9198_s1 + $0x48] sm:$0xff] }
 0x1b0   :  { %3301 = vmatpush1.bf16.msra.mxu0 %v2765_v20  ;;  %5329 = vrcp.f32 %v1417_v49  ;;  %v4811_v0 = vmul.f32 -1.442695, %v952_v44  ;;  %v7139_v44 = vmul.f32 %v6991_v1, %v1755_v62 }
 0x1b1   :  { %v2798_v42 = vpack.c.bf16 %v2602_v8, %v2600_v19  ;;  %v2797_v37 = vpack.c.bf16 %v2601_v55, %v2599_v58  ;;  %v7106_v20 = vpop.permute.xlu0 %2092  ;;  %v1758_v58 = vld [vmem:[%s9198_s1 + $0x298] sm:$0xff]  ;;  %v5312_v19 = vpop.eup %5311  ;;  %v1687_v55 = vld [vmem:[%s9198_s1 + $0x60] sm:$0xff]  ;;  %v2528_v8 = vmul.f32 %v6903_v12, %v1688_v16  ;;  %5331 = vrcp.f32 %v1414_v36 }
 0x1b2   :  { %v1963_v10 = vpop.permute.xlu1 %1962  ;;  %2447 = vperm.xlu1 %4906, %v5306_v29   ;;  %2432 = vperm.xlu0 %4905, %v5310_v28   ;;  %v7136_v29 = vmul.f32 %v6873_v22, %v1686_v39  ;;  %v1682_v36 = vld [vmem:[%s9198_s1 + $0x38] sm:$0xff]  ;;  %v1753_v28 = vld [vmem:[%s9198_s1 + $0x270] sm:$0xff]  ;;  %v1415_v62 = vadd.f32 1.0, %v5312_v19  ;;  %5333 = vpow2.f32 %v4811_v0 }
 0x1b3   :  { %v2533_v38 = vmul.f32 %v1963_v10, %v1693_v33  ;;  %v2534_v60 = vmul.f32 %v1963_v10, %v1694_v15  ;;  %3433 = vmatprep.subr.bf16.mxu1 %v2798_v42  ;;  %v7130_v33 = vpop.eup %5313  ;;  %v262_v15 = vld [vmem:[%s9196_s3 + $0x398] sm:$0xff]  ;;  %v2529_v42 = vmul.f32 %v7031_v2, %v1689_v7  ;;  %v2596_v10 = vmul.f32 %v6991_v1, %v1756_v57  ;;  %v1751_v57 = vld [vmem:[%s9198_s1 + $0x260] sm:$0xff] }
 0x1b4   :  { %3434 = vmatpush1.bf16.msra.mxu1 %v2797_v37  ;;  %v5316_v16 = vpop.eup %5315  ;;  %v953_v7 = vadd.f32 %v6813_v46, %v265_v47  ;;  %v1754_v1 = vld [vmem:[%s9198_s1 + $0x278] sm:$0xff]  ;;  %v950_v46 = vadd.f32 %v6732_v54, %v262_v15  ;;  %v1676_v15 = vld [vmem:[%s9198_s1 + $0x8] sm:$0xff]  ;;  %5335 = vrcp.f32 %v1415_v62  ;;  %v1413_v62 = vadd.f32 1.0, %v7063_v30 }
 0x1b5   :  { %v2764_v49 = vpack.c.bf16 %v2534_v60, %v2532_v14  ;;  %v2763_v4 = vpack.c.bf16 %v2533_v38, %v2531_v43  ;;  %v1685_v43 = vld [vmem:[%s9198_s1 + $0x50] sm:$0xff]  ;;  %v7153_v39 = vpop.permute.xlu0 %2082  ;;  %v2524_v38 = vmul.f32 %v6858_v41, %v1684_v52  ;;  %v2527_v60 = vmul.f32 %v6903_v12, %v1687_v55  ;;  %v1680_v12 = vld [vmem:[%s9198_s1 + $0x28] sm:$0xff] }
 0x1b6   :  { %v2123_v37 = vpop.permute.xlu1 %2122  ;;  %2237 = vperm.xlu1 %4906, %v6747_v50   ;;  %v2762_v50 = vpack.c.bf16 %v2530_v21, %v2528_v8  ;;  %2382 = vperm.xlu0 %4905, %v5316_v16   ;;  %v1752_v21 = vld [vmem:[%s9198_s1 + $0x268] sm:$0xff]  ;;  %v7178_v55 = vmul.f32 %v6838_v31, %v1682_v36  ;;  %v2525_v54 = vmul.f32 %v6873_v22, %v1685_v43  ;;  %v1749_v22 = vld [vmem:[%s9198_s1 + $0x250] sm:$0xff]  ;;  %v4812_v43 = vmul.f32 -1.442695, %v953_v7 }
 0x1b7   :  { %v2597_v2 = vmul.f32 %v2123_v37, %v1757_v48  ;;  %v2598_v14 = vmul.f32 %v2123_v37, %v1758_v58  ;;  %3302 = vmatprep.subr.bf16.mxu0 %v2764_v49  ;;  %v5318_v48 = vpop.eup %5317  ;;  %v1683_v58 = vld [vmem:[%s9198_s1 + $0x40] sm:$0xff]  ;;  %v2761_v8 = vpack.c.bf16 %v2529_v42, %v2527_v60  ;;  %v2760_v49 = vpack.c.bf16 %v7136_v29, %v2524_v38  ;;  %v1678_v38 = vld [vmem:[%s9198_s1 + $0x18] sm:$0xff]  ;;  %v260_v30 = vld [vmem:[%s9196_s3 + $0x388] sm:$0xff] }
 0x1b8   :  { %3303 = vmatpush1.bf16.msra.mxu0 %v2763_v4  ;;  %v7175_v52 = vpop.eup %5319  ;;  %v2593_v37 = vmul.f32 %v7050_v59, %v1753_v28  ;;  %v2594_v16 = vmul.f32 %v7050_v59, %v1754_v1  ;;  %v1750_v28 = vld [vmem:[%s9198_s1 + $0x258] sm:$0xff]  ;;  %v1747_v59 = vld [vmem:[%s9198_s1 + $0x240] sm:$0xff]  ;;  %v4809_v7 = vmul.f32 -1.442695, %v950_v46  ;;  %5337 = vpow2.f32 %v4812_v43 }
 0x1b9   :  { %3304 = vmatprep.subr.bf16.mxu0 %v2762_v50  ;;  %v2796_v19 = vpack.c.bf16 %v2598_v14, %v2596_v10  ;;  %v2795_v47 = vpack.c.bf16 %v2597_v2, %v7139_v44  ;;  %v5322_v4 = vpop.eup %5321  ;;  %v1681_v44 = vld [vmem:[%s9198_s1 + $0x30] sm:$0xff]  ;;  %v7193_v42 = vpop.permute.xlu0 %2072  ;;  %v2520_v10 = vmul.f32 %v6819_v51, %v1680_v12  ;;  %v2523_v2 = vmul.f32 %v6858_v41, %v1683_v58  ;;  %v1748_v14 = vld [vmem:[%s9198_s1 + $0x248] sm:$0xff]  ;;  %v263_v41 = vld [vmem:[%s9196_s3 + $0x3a0] sm:$0xff] }
 0x1ba   :  { %v2108_v0 = vpop.permute.xlu1 %2107  ;;  %2437 = vperm.xlu1 %4906, %v5318_v48   ;;  %2422 = vperm.xlu0 %4905, %v5322_v4   ;;  %v5324_v50 = vpop.eup %5323  ;;  %v1679_v60 = vld [vmem:[%s9198_s1 + $0x20] sm:$0xff]  ;;  %v2516_v48 = vmul.f32 %v6842_v11, %v1676_v15  ;;  %v2521_v46 = vmul.f32 %v6838_v31, %v1681_v44  ;;  %v1745_v4 = vld [vmem:[%s9198_s1 + $0x230] sm:$0xff]  ;;  %5339 = vpow2.f32 %v4809_v7 }
 0x1bb   :  { %v2591_v29 = vmul.f32 %v2108_v0, %v1751_v57  ;;  %v2592_v36 = vmul.f32 %v2108_v0, %v1752_v21  ;;  %3435 = vmatprep.subr.bf16.mxu1 %v2796_v19  ;;  %v7216_v21 = vpop.eup %5325  ;;  %v2759_v58 = vpack.c.bf16 %v2525_v54, %v2523_v2  ;;  %v2758_v19 = vpack.c.bf16 %v7178_v55, %v2520_v10  ;;  %v1741_v7 = vld [vmem:[%s9198_s1 + $0x210] sm:$0xff] }
 0x1bc   :  { %3305 = vmatpush1.bf16.msra.mxu0 %v2761_v8  ;;  %3436 = vmatpush1.bf16.msra.mxu1 %v2795_v47  ;;  %v5328_v0 = vpop.eup %5327  ;;  %v1675_v47 = vld [vmem:[%s9198_s1] sm:$0xff]  ;;  %v2589_v8 = vmul.f32 %v7077_v3, %v1749_v22  ;;  %v951_v55 = vadd.f32 %v6778_v32, %v263_v41  ;;  %v2518_v54 = vmul.f32 %v6794_v61, %v1678_v38  ;;  %v1744_v32 = vld [vmem:[%s9198_s1 + $0x228] sm:$0xff]  ;;  %5341 = vrcp.f32 %v1413_v62 }
 0x1bd   :  { %3306 = vmatprep.subr.bf16.mxu0 %v2760_v49  ;;  %v2794_v1 = vpack.c.bf16 %v2594_v16, %v2592_v36  ;;  %v2793_v57 = vpack.c.bf16 %v2593_v37, %v2591_v29  ;;  %v2590_v49 = vmul.f32 %v7077_v3, %v1750_v28  ;;  %v7232_v15 = vpop.permute.xlu0 %2232  ;;  %v2519_v37 = vmul.f32 %v6819_v51, %v1679_v60  ;;  %v1746_v3 = vld [vmem:[%s9198_s1 + $0x238] sm:$0xff]  ;;  %v1743_v16 = vld [vmem:[%s9198_s1 + $0x220] sm:$0xff]  ;;  %v5330_v22 = vpop.eup %5329  ;;  %v1677_v51 = vld [vmem:[%s9198_s1 + $0x10] sm:$0xff] }
 0x1be   :  { %v2098_v12 = vpop.permute.xlu1 %2097  ;;  %2387 = vperm.xlu1 %4906, %v5324_v50   ;;  %2372 = vperm.xlu0 %4905, %v7089_v18   ;;  %v948_v29 = vadd.f32 %v6716_v5, %v260_v30  ;;  %v1434_v43 = vadd.f32 1.0, %v5328_v0  ;;  %v2515_v10 = vmul.f32 %v6842_v11, %v1675_v47  ;;  %v2585_v50 = vmul.f32 %v7106_v20, %v1745_v4  ;;  %v1740_v30 = vld [vmem:[%s9198_s1 + $0x208] sm:$0xff]  ;;  %v227_v62 = vld [vmem:[%s9196_s3 + $0x280] sm:$0xff] }
 0x1bf   :  { %v2587_v31 = vmul.f32 %v2098_v12, %v1747_v59  ;;  %v2588_v44 = vmul.f32 %v2098_v12, %v1748_v14  ;;  %3437 = vmatprep.subr.bf16.mxu1 %v2794_v1  ;;  %v2757_v28 = vpack.c.bf16 %v2521_v46, %v2519_v37  ;;  %v2756_v59 = vpack.c.bf16 %v2518_v54, %v2516_v48  ;;  %v5332_v14 = vpop.eup %5331  ;;  %v261_v48 = vld [vmem:[%s9196_s3 + $0x390] sm:$0xff]  ;;  %v1735_v54 = vld [vmem:[%s9198_s1 + $0x1e0] sm:$0xff] }
 0x1c0   :  { %3307 = vmatpush1.bf16.msra.mxu0 %v2759_v58  ;;  %3438 = vmatpush1.bf16.msra.mxu1 %v2793_v57  ;;  %v2586_v5 = vmul.f32 %v7106_v20, %v1746_v3  ;;  %v4810_v11 = vmul.f32 -1.442695, %v951_v55  ;;  %v2517_v1 = vmul.f32 %v6794_v61, %v1677_v51  ;;  %v1742_v57 = vld [vmem:[%s9198_s1 + $0x218] sm:$0xff]  ;;  %v1739_v20 = vld [vmem:[%s9198_s1 + $0x200] sm:$0xff]  ;;  %v1400_v61 = vadd.f32 1.0, %v6853_v17  ;;  %v5334_v58 = vpop.eup %5333 }
 0x1c1   :  { %3308 = vmatprep.subr.bf16.mxu0 %v2758_v19  ;;  %v2792_v18 = vpack.c.bf16 %v2590_v49, %v2588_v44  ;;  %v2791_v36 = vpack.c.bf16 %v2589_v8, %v2587_v31  ;;  %v7257_v41 = vpop.permute.xlu0 %2062  ;;  %5343 = vrcp.f32 %v7109_v53  ;;  %v4807_v19 = vmul.f32 -1.442695, %v948_v29  ;;  %v1737_v53 = vld [vmem:[%s9198_s1 + $0x1f0] sm:$0xff]  ;;  %v5336_v37 = vpop.eup %5335 }
 0x1c2   :  { %v2088_v2 = vpop.permute.xlu1 %2087  ;;  %2427 = vperm.xlu1 %4906, %v5330_v22   ;;  %2412 = vperm.xlu0 %4905, %v5332_v14   ;;  %5345 = vrcp.f32 %v1434_v43  ;;  %v2755_v47 = vpack.c.bf16 %v2517_v1, %v2515_v10  ;;  %v2581_v8 = vmul.f32 %v7153_v39, %v1741_v7  ;;  %v2582_v17 = vmul.f32 %v7153_v39, %v1742_v57  ;;  %v1738_v39 = vld [vmem:[%s9198_s1 + $0x1f8] sm:$0xff]  ;;  %v1801_v29 = vld [vmem:[%s9198_s1 + $0x3f0] sm:$0xff]  ;;  %v1800_v10 = vld [vmem:[%s9198_s1 + $0x3e8] sm:$0xff] }
 0x1c3   :  { %v2583_v38 = vmul.f32 %v2088_v2, %v1743_v16  ;;  %v2584_v60 = vmul.f32 %v2088_v2, %v1744_v32  ;;  %3439 = vmatprep.subr.bf16.mxu1 %v2792_v18  ;;  %v915_v44 = vadd.f32 %v6513_v35, %v227_v62  ;;  %v1411_v55 = vadd.f32 1.0, %v7003_v26  ;;  %v1736_v35 = vld [vmem:[%s9198_s1 + $0x1e8] sm:$0xff]  ;;  %v1802_v43 = vld [vmem:[%s9198_s1 + $0x3f8] sm:$0xff] }
 0x1c4   :  { %3309 = vmatpush1.bf16.msra.mxu0 %v2757_v28  ;;  %3440 = vmatpush1.bf16.msra.mxu1 %v2791_v36  ;;  %5347 = vpow2.f32 %v4810_v11  ;;  %v1432_v16 = vadd.f32 1.0, %v5334_v58  ;;  %v2578_v22 = vmul.f32 %v7193_v42, %v1738_v39  ;;  %v1733_v11 = vld [vmem:[%s9198_s1 + $0x1d0] sm:$0xff]  ;;  %v1732_v62 = vld [vmem:[%s9198_s1 + $0x1c8] sm:$0xff] }
 0x1c5   :  { %3310 = vmatprep.subr.bf16.mxu0 %v2756_v59  ;;  %v2790_v46 = vpack.c.bf16 %v2586_v5, %v2584_v60  ;;  %v2789_v12 = vpack.c.bf16 %v2585_v50, %v2583_v38  ;;  %v7283_v49 = vpop.permute.xlu0 %2222  ;;  %5349 = vrcp.f32 %v1400_v61  ;;  %v5338_v2 = vpop.eup %5337  ;;  %v4774_v28 = vmul.f32 -1.442695, %v915_v44  ;;  %v259_v59 = vld [vmem:[%s9196_s3 + $0x380] sm:$0xff]  ;;  %v1796_v44 = vld [vmem:[%s9198_s1 + $0x3c8] sm:$0xff] }
 0x1c6   :  { %v2078_v0 = vpop.permute.xlu1 %2077  ;;  %2377 = vperm.xlu1 %4906, %v7175_v52   ;;  %v949_v52 = vadd.f32 %v6745_v9, %v261_v48  ;;  %2362 = vperm.xlu0 %4905, %v7019_v27   ;;  %v1401_v9 = vadd.f32 1.0, %v6895_v23  ;;  %5351 = vpow2.f32 %v4807_v19  ;;  %v2577_v27 = vmul.f32 %v7193_v42, %v1737_v53  ;;  %v1799_v42 = vld [vmem:[%s9198_s1 + $0x3e0] sm:$0xff] }
 0x1c7   :  { %v2579_v4 = vmul.f32 %v2078_v0, %v1739_v20  ;;  %v2580_v31 = vmul.f32 %v2078_v0, %v1740_v30  ;;  %3441 = vmatprep.subr.bf16.mxu1 %v2790_v46  ;;  %5353 = vrcp.f32 %v1411_v55  ;;  %v5340_v5 = vpop.eup %5339  ;;  %v2641_v38 = vmul.f32 %v7232_v15, %v1801_v29 }
 0x1c8   :  { %3311 = vmatpush1.bf16.msra.mxu0 %v2755_v47  ;;  %3442 = vmatpush1.bf16.msra.mxu1 %v2789_v12  ;;  %v4808_v23 = vmul.f32 -1.442695, %v949_v52  ;;  %5355 = vrcp.f32 %v1401_v9  ;;  %v2642_v60 = vmul.f32 %v7232_v15, %v1802_v43  ;;  %v947_v30 = vadd.f32 %v6722_v34, %v259_v59  ;;  %v1731_v15 = vld [vmem:[%s9198_s1 + $0x1c0] sm:$0xff] }
 0x1c9   :  { %v2788_v26 = vpack.c.bf16 %v2582_v17, %v2580_v31  ;;  %v2787_v3 = vpack.c.bf16 %v2581_v8, %v2579_v4  ;;  %v7304_v51 = vpop.permute.xlu0 %2052  ;;  %5357 = vrcp.f32 %v1432_v16  ;;  %v5342_v61 = vpop.eup %5341  ;;  %v1399_v34 = vadd.f32 1.0, %v6871_v25  ;;  %v1797_v8 = vld [vmem:[%s9198_s1 + $0x3d0] sm:$0xff]  ;;  %v1798_v31 = vld [vmem:[%s9198_s1 + $0x3d8] sm:$0xff] }
 0x1ca   :  { %v2068_v32 = vpop.permute.xlu1 %2067  ;;  %2417 = vperm.xlu1 %4906, %v5336_v37   ;;  %2402 = vperm.xlu0 %4905, %v7216_v21   ;;  %v1398_v21 = vadd.f32 1.0, %v6829_v24  ;;  %5359 = vpow2.f32 %v4808_v23  ;;  %v1433_v24 = vadd.f32 1.0, %v5338_v2  ;;  %v1430_v58 = vadd.f32 1.0, %v5340_v5  ;;  %v1729_v16 = vld [vmem:[%s9198_s1 + $0x1b0] sm:$0xff] }
 0x1cb   :  { %v2575_v18 = vmul.f32 %v2068_v32, %v1735_v54  ;;  %v2576_v36 = vmul.f32 %v2068_v32, %v1736_v35  ;;  %3443 = vmatprep.subr.bf16.mxu1 %v2788_v26  ;;  %5361 = vpow2.f32 %v4774_v28  ;;  %v2573_v0 = vmul.f32 %v7257_v41, %v1733_v11  ;;  %v1792_v11 = vld [vmem:[%s9198_s1 + $0x3a8] sm:$0xff] }
 0x1cc   :  { %3444 = vmatpush1.bf16.msra.mxu1 %v2787_v3  ;;  %5363 = vrcp.f32 %v1398_v21  ;;  %v4806_v4 = vmul.f32 -1.442695, %v947_v30  ;;  %v1396_v35 = vadd.f32 1.0, %v6807_v63  ;;  %v2637_v26 = vmul.f32 %v7283_v49, %v1797_v8  ;;  %v1730_v63 = vld [vmem:[%s9198_s1 + $0x1b8] sm:$0xff] }
 0x1cd   :  { %v2786_v14 = vpack.c.bf16 %v2578_v22, %v2576_v36  ;;  %v2785_v50 = vpack.c.bf16 %v2577_v27, %v2575_v18  ;;  %v7326_v1 = vpop.permute.xlu0 %2212  ;;  %5365 = vrcp.f32 %v1433_v24  ;;  %v2638_v3 = vmul.f32 %v7283_v49, %v1798_v31  ;;  %v1727_v49 = vld [vmem:[%s9198_s1 + $0x1a0] sm:$0xff]  ;;  %v1728_v18 = vld [vmem:[%s9198_s1 + $0x1a8] sm:$0xff] }
 0x1ce   :  { %v2228_v7 = vpop.permute.xlu1 %2227  ;;  %2367 = vperm.xlu1 %4906, %v7130_v33   ;;  %v1734_v33 = vld [vmem:[%s9198_s1 + $0x1d8] sm:$0xff]  ;;  %2352 = vperm.xlu0 %4905, %v6968_v40   ;;  %v5344_v12 = vpop.eup %5343  ;;  %5367 = vrcp.f32 %v1399_v34  ;;  %v2569_v59 = vmul.f32 %v7304_v51, %v1729_v16 }
 0x1cf   :  { %v2639_v57 = vmul.f32 %v2228_v7, %v1799_v42  ;;  %v2640_v20 = vmul.f32 %v2228_v7, %v1800_v10  ;;  %3312 = vmatprep.subr.bf16.mxu0 %v2786_v14  ;;  %v5346_v40 = vpop.eup %5345  ;;  %v2574_v47 = vmul.f32 %v7257_v41, %v1734_v33  ;;  %v1795_v41 = vld [vmem:[%s9198_s1 + $0x3c0] sm:$0xff]  ;;  %5369 = vrcp.f32 %v1430_v58  ;;  %v1726_v58 = vld [vmem:[%s9198_s1 + $0x198] sm:$0xff] }
 0x1d0   :  { %3313 = vmatpush2.bf16.msra.mxu0 %v2785_v50  ;;  %5371 = vpow2.f32 %v4806_v4  ;;  %v2570_v14 = vmul.f32 %v7304_v51, %v1730_v63  ;;  %v1793_v50 = vld [vmem:[%s9198_s1 + $0x3b0] sm:$0xff]  ;;  %v1791_v51 = vld [vmem:[%s9198_s1 + $0x3a0] sm:$0xff] }
 0x1d1   :  { %v2818_v48 = vpack.c.bf16 %v2642_v60, %v2640_v20  ;;  %v2817_v46 = vpack.c.bf16 %v2641_v38, %v2639_v57  ;;  %v7345_v17 = vpop.permute.xlu0 %2042  ;;  %v5348_v55 = vpop.eup %5347  ;;  %5373 = vrcp.f32 %v1396_v35  ;;  %v1397_v38 = vadd.f32 1.0, %v6844_v6  ;;  %v1794_v60 = vld [vmem:[%s9198_s1 + $0x3b8] sm:$0xff]  ;;  %v1788_v35 = vld [vmem:[%s9198_s1 + $0x388] sm:$0xff] }
 0x1d2   :  { %v2058_v19 = vpop.permute.xlu1 %2057  ;;  %2407 = vperm.xlu1 %4906, %v5342_v61   ;;  %2512 = vperm.xlu0 %4905, %v5346_v40   ;;  %v5350_v54 = vpop.eup %5349  ;;  %v1431_v29 = vadd.f32 1.0, %v5348_v55  ;;  %v1725_v61 = vld [vmem:[%s9198_s1 + $0x190] sm:$0xff]  ;;  %v2566_v31 = vmul.f32 %v7345_v17, %v1726_v58 }
 0x1d3   :  { %v2571_v53 = vmul.f32 %v2058_v19, %v1731_v15  ;;  %v2572_v25 = vmul.f32 %v2058_v19, %v1732_v62  ;;  %3445 = vmatprep.subr.bf16.mxu1 %v2818_v48  ;;  %v5352_v9 = vpop.eup %5351  ;;  %v2633_v15 = vmul.f32 %v7326_v1, %v1793_v50  ;;  %v2634_v62 = vmul.f32 %v7326_v1, %v1794_v60  ;;  %v1723_v1 = vld [vmem:[%s9198_s1 + $0x180] sm:$0xff]  ;;  %v1724_v19 = vld [vmem:[%s9198_s1 + $0x188] sm:$0xff] }
 0x1d4   :  { %3446 = vmatpush2.bf16.msra.mxu1 %v2817_v46  ;;  %v5354_v36 = vpop.eup %5353  ;;  %v1428_v10 = vadd.f32 1.0, %v5352_v9  ;;  %5375 = vrcp.f32 %v1431_v29  ;;  %v2565_v4 = vmul.f32 %v7345_v17, %v1725_v61  ;;  %v1787_v17 = vld [vmem:[%s9198_s1 + $0x380] sm:$0xff]  ;;  %v1721_v29 = vld [vmem:[%s9198_s1 + $0x170] sm:$0xff] }
 0x1d5   :  { %v2784_v52 = vpack.c.bf16 %v2574_v47, %v2572_v25  ;;  %v2783_v39 = vpack.c.bf16 %v2573_v0, %v2571_v53  ;;  %v7362_v32 = vpop.permute.xlu0 %2202  ;;  %v5356_v42 = vpop.eup %5355 }
 0x1d6   :  { %v2218_v37 = vpop.permute.xlu1 %2217  ;;  %2357 = vperm.xlu1 %4906, %v5344_v12   ;;  %2342 = vperm.xlu0 %4905, %v5350_v54   ;;  %v5358_v28 = vpop.eup %5357  ;;  %5377 = vrcp.f32 %v1428_v10  ;;  %v1790_v54 = vld [vmem:[%s9198_s1 + $0x398] sm:$0xff] }
 0x1d7   :  { %v2635_v27 = vmul.f32 %v2218_v37, %v1795_v41  ;;  %v2636_v22 = vmul.f32 %v2218_v37, %v1796_v44  ;;  %3314 = vmatprep.subr.bf16.mxu0 %v2784_v52  ;;  %v5360_v57 = vpop.eup %5359  ;;  %5379 = vrcp.f32 %v1397_v38  ;;  %v1789_v41 = vld [vmem:[%s9198_s1 + $0x390] sm:$0xff] }
 0x1d8   :  { %3315 = vmatpush2.bf16.msra.mxu0 %v2783_v39  ;;  %v5362_v24 = vpop.eup %5361  ;;  %v1429_v12 = vadd.f32 1.0, %v5360_v57 }
 0x1d9   :  { %v2816_v23 = vpack.c.bf16 %v2638_v3, %v2636_v22  ;;  %v2815_v43 = vpack.c.bf16 %v2637_v26, %v2635_v27  ;;  %v7378_v5 = vpop.permute.xlu0 %2032  ;;  %v5364_v33 = vpop.eup %5363  ;;  %v1395_v39 = vadd.f32 1.0, %v5362_v24  ;;  %v2629_v27 = vmul.f32 %v7362_v32, %v1789_v41  ;;  %v1779_v41 = vld [vmem:[%s9198_s1 + $0x340] sm:$0xff] }
 0x1da   :  { %v2048_v2 = vpop.permute.xlu1 %2047  ;;  %2397 = vperm.xlu1 %4906, %v5354_v36   ;;  %2502 = vperm.xlu0 %4905, %v5358_v28   ;;  %v5366_v40 = vpop.eup %5365  ;;  %5381 = vrcp.f32 %v1429_v12  ;;  %v2630_v22 = vmul.f32 %v7362_v32, %v1790_v54  ;;  %v1719_v32 = vld [vmem:[%s9198_s1 + $0x160] sm:$0xff] }
 0x1db   :  { %v2567_v21 = vmul.f32 %v2048_v2, %v1727_v49  ;;  %v2568_v7 = vmul.f32 %v2048_v2, %v1728_v18  ;;  %3447 = vmatprep.subr.bf16.mxu1 %v2816_v23  ;;  %v5368_v8 = vpop.eup %5367  ;;  %5383 = vrcp.f32 %v1395_v39  ;;  %v1722_v23 = vld [vmem:[%s9198_s1 + $0x178] sm:$0xff]  ;;  %v1715_v12 = vld [vmem:[%s9198_s1 + $0x140] sm:$0xff] }
 0x1dc   :  { %3448 = vmatpush2.bf16.msra.mxu1 %v2815_v43  ;;  %v5370_v25 = vpop.eup %5369  ;;  %v1720_v43 = vld [vmem:[%s9198_s1 + $0x168] sm:$0xff]  ;;  %v2562_v50 = vmul.f32 %v7378_v5, %v1722_v23 }
 0x1dd   :  { %v2782_v20 = vpack.c.bf16 %v2570_v14, %v2568_v7  ;;  %v2781_v30 = vpack.c.bf16 %v2569_v59, %v2567_v21  ;;  %v7395_v34 = vpop.permute.xlu0 %2192  ;;  %v5372_v37 = vpop.eup %5371  ;;  %v2561_v14 = vmul.f32 %v7378_v5, %v1721_v29  ;;  %v1785_v21 = vld [vmem:[%s9198_s1 + $0x370] sm:$0xff]  ;;  %v1783_v5 = vld [vmem:[%s9198_s1 + $0x360] sm:$0xff] }
 0x1de   :  { %v2208_v6 = vpop.permute.xlu1 %2207  ;;  %2347 = vperm.xlu1 %4906, %v5356_v42   ;;  %2332 = vperm.xlu0 %4905, %v5364_v33   ;;  %v5374_v16 = vpop.eup %5373  ;;  %v1427_v36 = vadd.f32 1.0, %v5372_v37  ;;  %v1713_v37 = vld [vmem:[%s9198_s1 + $0x130] sm:$0xff] }
 0x1df   :  { %v2631_v48 = vmul.f32 %v2208_v6, %v1791_v51  ;;  %v2632_v46 = vmul.f32 %v2208_v6, %v1792_v11  ;;  %3316 = vmatprep.subr.bf16.mxu0 %v2782_v20  ;;  %v1786_v51 = vld [vmem:[%s9198_s1 + $0x378] sm:$0xff]  ;;  %v1784_v11 = vld [vmem:[%s9198_s1 + $0x368] sm:$0xff]  ;;  %v2625_v6 = vmul.f32 %v7395_v34, %v1785_v21 }
 0x1e0   :  { %3317 = vmatpush2.bf16.msra.mxu0 %v2781_v30  ;;  %5385 = vrcp.f32 %v1427_v36  ;;  %v2626_v33 = vmul.f32 %v7395_v34, %v1786_v51  ;;  %v1716_v34 = vld [vmem:[%s9198_s1 + $0x148] sm:$0xff] }
 0x1e1   :  { %v2814_v0 = vpack.c.bf16 %v2634_v62, %v2632_v46  ;;  %v2813_v47 = vpack.c.bf16 %v2633_v15, %v2631_v48  ;;  %v7411_v44 = vpop.permute.xlu0 %2022  ;;  %v5376_v42 = vpop.eup %5375  ;;  %v1717_v15 = vld [vmem:[%s9198_s1 + $0x150] sm:$0xff]  ;;  %v1718_v46 = vld [vmem:[%s9198_s1 + $0x158] sm:$0xff] }
 0x1e2   :  { %v2038_v53 = vpop.permute.xlu1 %2037  ;;  %2507 = vperm.xlu1 %4906, %v5366_v40   ;;  %2492 = vperm.xlu0 %4905, %v5370_v25  }
 0x1e3   :  { %v2563_v55 = vmul.f32 %v2038_v53, %v1723_v1  ;;  %v2564_v52 = vmul.f32 %v2038_v53, %v1724_v19  ;;  %3449 = vmatprep.subr.bf16.mxu1 %v2814_v0  ;;  %v5378_v59 = vpop.eup %5377  ;;  %v2557_v0 = vmul.f32 %v7411_v44, %v1717_v15 }
 0x1e4   :  { %3450 = vmatpush2.bf16.msra.mxu1 %v2813_v47  ;;  %v5380_v57 = vpop.eup %5379  ;;  %v2558_v47 = vmul.f32 %v7411_v44, %v1718_v46  ;;  %v1780_v44 = vld [vmem:[%s9198_s1 + $0x348] sm:$0xff] }
 0x1e5   :  { %v2780_v9 = vpack.c.bf16 %v2566_v31, %v2564_v52  ;;  %v2779_v26 = vpack.c.bf16 %v2565_v4, %v2563_v55  ;;  %v7427_v63 = vpop.permute.xlu0 %2182  ;;  %v1782_v31 = vld [vmem:[%s9198_s1 + $0x358] sm:$0xff] }
 0x1e6   :  { %v2198_v3 = vpop.permute.xlu1 %2197  ;;  %2337 = vperm.xlu1 %4906, %v5368_v8   ;;  %2322 = vperm.xlu0 %4905, %v5374_v16   ;;  %v1781_v8 = vld [vmem:[%s9198_s1 + $0x350] sm:$0xff]  ;;  %v1714_v16 = vld [vmem:[%s9198_s1 + $0x138] sm:$0xff] }
 0x1e7   :  { %v2627_v49 = vmul.f32 %v2198_v3, %v1787_v17  ;;  %v2628_v18 = vmul.f32 %v2198_v3, %v1788_v35  ;;  %3318 = vmatprep.subr.bf16.mxu0 %v2780_v9  ;;  %v5382_v58 = vpop.eup %5381  ;;  %v2621_v17 = vmul.f32 %v7427_v63, %v1781_v8  ;;  %v2622_v35 = vmul.f32 %v7427_v63, %v1782_v31 }
 0x1e8   :  { %3319 = vmatpush2.bf16.msra.mxu0 %v2779_v26  ;;  %v5384_v55 = vpop.eup %5383 }
 0x1e9   :  { %v2812_v10 = vpack.c.bf16 %v2630_v22, %v2628_v18  ;;  %v2811_v2 = vpack.c.bf16 %v2629_v27, %v2627_v49  ;;  %v7443_v7 = vpop.permute.xlu0 %2012  ;;  %v1711_v27 = vld [vmem:[%s9198_s1 + $0x120] sm:$0xff]  ;;  %v1712_v22 = vld [vmem:[%s9198_s1 + $0x128] sm:$0xff] }
 0x1ea   :  { %v2028_v28 = vpop.permute.xlu1 %2027  ;;  %2497 = vperm.xlu1 %4906, %v5376_v42   ;;  %2482 = vperm.xlu0 %4905, %v5378_v59   ;;  %v2553_v36 = vmul.f32 %v7443_v7, %v1713_v37  ;;  %v2554_v23 = vmul.f32 %v7443_v7, %v1714_v16  ;;  %v1776_v59 = vld [vmem:[%s9198_s1 + $0x328] sm:$0xff] }
 0x1eb   :  { %v2559_v38 = vmul.f32 %v2028_v28, %v1719_v32  ;;  %v2560_v60 = vmul.f32 %v2028_v28, %v1720_v43  ;;  %3451 = vmatprep.subr.bf16.mxu1 %v2812_v10  ;;  %v1777_v32 = vld [vmem:[%s9198_s1 + $0x330] sm:$0xff]  ;;  %v1775_v28 = vld [vmem:[%s9198_s1 + $0x320] sm:$0xff]  ;;  %v7567_v37 = vld [vmem:[%s9197_s4 + $0x48] sm:$0xff] }
 0x1ec   :  { %3452 = vmatpush2.bf16.msra.mxu1 %v2811_v2  ;;  %v1778_v2 = vld [vmem:[%s9198_s1 + $0x338] sm:$0xff] }
 0x1ed   :  { %v2778_v20 = vpack.c.bf16 %v2562_v50, %v2560_v60  ;;  %v2777_v30 = vpack.c.bf16 %v2561_v14, %v2559_v38  ;;  %v2173_v62 = vpop.permute.xlu0 %2172  ;;  %v5386_v29 = vpop.eup %5385  ;;  %v1709_v60 = vld [vmem:[%s9198_s1 + $0x110] sm:$0xff] }
 0x1ee   :  { %v2188_v24 = vpop.permute.xlu1 %2187  ;;  %2327 = vperm.xlu1 %4906, %v5380_v57   ;;  %v2617_v7 = vmul.f32 %v2173_v62, %v1777_v32  ;;  %v2618_v38 = vmul.f32 %v2173_v62, %v1778_v2  ;;  %v1710_v57 = vld [vmem:[%s9198_s1 + $0x118] sm:$0xff]  ;;  %v1828_v32 = vld [vmem:[%s9198_s1 + $0x4c8] sm:$0xff]  ;;  %v7601_v2 = vld [vmem:[%s9197_s4 + $0xa0] sm:$0xff] }
 0x1ef   :  { %v2623_v61 = vmul.f32 %v2188_v24, %v1783_v5  ;;  %v2624_v48 = vmul.f32 %v2188_v24, %v1784_v11  ;;  %3320 = vmatprep.subr.bf16.mxu0 %v2778_v20  ;;  %v1707_v20 = vld [vmem:[%s9198_s1 + $0x100] sm:$0xff] }
 0x1f0   :  { %3321 = vmatpush2.bf16.msra.mxu0 %v2777_v30  ;;  %v1708_v30 = vld [vmem:[%s9198_s1 + $0x108] sm:$0xff] }
 0x1f1   :  { %v2810_v1 = vpack.c.bf16 %v2626_v33, %v2624_v48  ;;  %v2809_v19 = vpack.c.bf16 %v2625_v6, %v2623_v61  ;;  %v2003_v53 = vpop.permute.xlu0 %2002  ;;  %v1773_v61 = vld [vmem:[%s9198_s1 + $0x310] sm:$0xff] }
 0x1f2   :  { %v2018_v40 = vpop.permute.xlu1 %2017  ;;  %2487 = vperm.xlu1 %4906, %v5382_v58   ;;  %v2549_v15 = vmul.f32 %v2003_v53, %v1709_v60  ;;  %v2550_v62 = vmul.f32 %v2003_v53, %v1710_v57  ;;  %v1771_v58 = vld [vmem:[%s9198_s1 + $0x300] sm:$0xff]  ;;  %v1824_v57 = vld [vmem:[%s9198_s1 + $0x4a8] sm:$0xff] }
 0x1f3   :  { %v2555_v25 = vmul.f32 %v2018_v40, %v1715_v12  ;;  %v2556_v4 = vmul.f32 %v2018_v40, %v1716_v34  ;;  %3453 = vmatprep.subr.bf16.mxu1 %v2810_v1  ;;  %v1774_v34 = vld [vmem:[%s9198_s1 + $0x318] sm:$0xff]  ;;  %v1772_v1 = vld [vmem:[%s9198_s1 + $0x308] sm:$0xff] }
 0x1f4   :  { %3454 = vmatpush2.bf16.msra.mxu1 %v2809_v19 }
 0x1f5   :  { %v2776_v52 = vpack.c.bf16 %v2558_v47, %v2556_v4  ;;  %v2775_v39 = vpack.c.bf16 %v2557_v0, %v2555_v25  ;;  %v2163_v9 = vpop.permute.xlu0 %2162  ;;  %v7541_v0 = vld [vmem:[%s9197_s4 + $0x40] sm:$0xff]  ;;  %v1833_v4 = vld [vmem:[%s9198_s1 + $0x4f0] sm:$0xff] }
 0x1f6   :  { %v2178_v54 = vpop.permute.xlu1 %2177  ;;  %2317 = vperm.xlu1 %4906, %v5384_v55   ;;  %v7546_v47 = vld [vmem:[%s9197_s4 + $0x60] sm:$0xff]  ;;  %v2613_v53 = vmul.f32 %v2163_v9, %v1773_v61  ;;  %v2614_v25 = vmul.f32 %v2163_v9, %v1774_v34  ;;  %v1834_v55 = vld [vmem:[%s9198_s1 + $0x4f8] sm:$0xff]  ;;  %v7572_v9 = vld [vmem:[%s9197_s4 + $0x68] sm:$0xff] }
 0x1f7   :  { %v2619_v26 = vmul.f32 %v2178_v54, %v1779_v41  ;;  %v2620_v3 = vmul.f32 %v2178_v54, %v1780_v44  ;;  %3322 = vmatprep.subr.bf16.mxu0 %v2776_v52  ;;  %v1831_v52 = vld [vmem:[%s9198_s1 + $0x4e0] sm:$0xff]  ;;  %v4823_v54 = vcombine.high %v7541_v0, %v7546_v47  ;;  %v1821_v61 = vld [vmem:[%s9198_s1 + $0x490] sm:$0xff] }
 0x1f8   :  { %3323 = vmatpush2.bf16.msra.mxu0 %v2775_v39  ;;  %v1832_v39 = vld [vmem:[%s9198_s1 + $0x4e8] sm:$0xff] }
 0x1f9   :  { %v2808_v63 = vpack.c.bf16 %v2622_v35, %v2620_v3  ;;  %v2807_v49 = vpack.c.bf16 %v2621_v17, %v2619_v26  ;;  %v2313_v43 = vpop.permute.xlu0 %2312 }
 0x1fa   :  { %v2008_v18 = vpop.permute.xlu1 %2007  ;;  %2477 = vperm.xlu1 %4906, %v5386_v29   ;;  %v2673_v26 = vmul.f32 %v2313_v43, %v1833_v4  ;;  %v2674_v16 = vmul.f32 %v2313_v43, %v1834_v55  ;;  %v4825_v43 = vcombine.high %v7567_v37, %v7572_v9 }
 0x1fb   :  { %v2551_v42 = vmul.f32 %v2008_v18, %v1711_v27  ;;  %v2552_v10 = vmul.f32 %v2008_v18, %v1712_v22  ;;  %3455 = vmatprep.subr.bf16.mxu1 %v2808_v63  ;;  %v1829_v27 = vld [vmem:[%s9198_s1 + $0x4d0] sm:$0xff] }
 0x1fc   :  { %3456 = vmatpush2.bf16.msra.mxu1 %v2807_v49  ;;  %v9219_v49 = vld [vmem:[#allocation2_spill] sm:$0xff] }
 0x1fd   :  { %v2774_v14 = vpack.c.bf16 %v2554_v23, %v2552_v10  ;;  %v2773_v50 = vpack.c.bf16 %v2553_v36, %v2551_v42  ;;  %v7513_v51 = vpop.permute.xlu0 %2302  ;;  %v9220_v18 = vcombine.low %v6884_v13, %v9219_v49  ;;  %v1830_v36 = vld [vmem:[%s9198_s1 + $0x4d8] sm:$0xff]  ;;  %v1827_v23 = vld [vmem:[%s9198_s1 + $0x4c0] sm:$0xff]  ;;  %v1897_v49 = vld [vmem:[%s9198_s1 + $0x6f0] sm:$0xff] }
 0x1fe   :  { %v2168_v21 = vpop.permute.xlu1 %2167  ;;  %v7596_v10 = vld [vmem:[%s9197_s4 + $0x80] sm:$0xff] }
 0x1ff   :  { %v2615_v5 = vmul.f32 %v2168_v21, %v1775_v28  ;;  %v2616_v11 = vmul.f32 %v2168_v21, %v1776_v59  ;;  %3324 = vmatprep.subr.bf16.mxu0 %v2774_v14  ;;  %v2669_v28 = vmul.f32 %v7513_v51, %v1829_v27  ;;  %v4822_v14 = vcombine.low %v7541_v0, %v7546_v47  ;;  %v1825_v21 = vld [vmem:[%s9198_s1 + $0x4b0] sm:$0xff]  ;;  %v7659_v47 = vld [vmem:[%s9197_s4 + $0xc0] sm:$0xff] }
 0x200   :  { %3325 = vmatpush2.bf16.msra.mxu0 %v2773_v50  ;;  %v2670_v50 = vmul.f32 %v7513_v51, %v1830_v36  ;;  %v1823_v51 = vld [vmem:[%s9198_s1 + $0x4a0] sm:$0xff]  ;;  %v4830_v4 = vcombine.low %v7596_v10, %v7601_v2 }
 0x201   :  { %v2806_v24 = vpack.c.bf16 %v2618_v38, %v2616_v11  ;;  %v2805_v6 = vpack.c.bf16 %v2617_v7, %v2615_v5  ;;  %v7527_v48 = vpop.permute.xlu0 %2292  ;;  %v9221_v5 = vcombine.low %v6996_v56, %v7001_v45  ;;  %v1826_v11 = vld [vmem:[%s9198_s1 + $0x4b8] sm:$0xff]  ;;  %v7629_v45 = vld [vmem:[%s9197_s4 + $0x88] sm:$0xff] }
 0x202   :  { %v1998_v33 = vpop.permute.xlu1 %1997 }
 0x203   :  { %v2547_v46 = vmul.f32 %v1998_v33, %v1707_v20  ;;  %v2548_v12 = vmul.f32 %v1998_v33, %v1708_v30  ;;  %3457 = vmatprep.subr.bf16.mxu1 %v2806_v24  ;;  %v4831_v20 = vcombine.high %v7596_v10, %v7601_v2  ;;  %v7634_v24 = vld [vmem:[%s9197_s4 + $0xa8] sm:$0xff]  ;;  %v7719_v2 = vld [vmem:[%s9197_s4 + $0x100] sm:$0xff] }
 0x204   :  { %3458 = vmatpush2.bf16.msra.mxu1 %v2805_v6  ;;  %v2665_v6 = vmul.f32 %v7527_v48, %v1825_v21 }
 0x205   :  { %v2772_v19 = vpack.c.bf16 %v2550_v62, %v2548_v12  ;;  %v2771_v40 = vpack.c.bf16 %v2549_v15, %v2547_v46  ;;  %v7551_v31 = vpop.permute.xlu0 %2282  ;;  %v4824_v15 = vcombine.low %v7567_v37, %v7572_v9  ;;  %v2666_v62 = vmul.f32 %v7527_v48, %v1826_v11  ;;  %v1820_v48 = vld [vmem:[%s9198_s1 + $0x488] sm:$0xff] }
 0x206   :  { %v2158_v8 = vpop.permute.xlu1 %2157 }
 0x207   :  { %v2611_v41 = vmul.f32 %v2158_v8, %v1771_v58  ;;  %v2612_v44 = vmul.f32 %v2158_v8, %v1772_v1  ;;  %3326 = vmatprep.subr.bf16.mxu0 %v2772_v19  ;;  %v1822_v58 = vld [vmem:[%s9198_s1 + $0x498] sm:$0xff]  ;;  %v1819_v1 = vld [vmem:[%s9198_s1 + $0x480] sm:$0xff]  ;;  %v4833_v19 = vcombine.high %v7629_v45, %v7634_v24 }
 0x208   :  { %3327 = vmatpush2.bf16.msra.mxu0 %v2771_v40  ;;  %v7664_v8 = vld [vmem:[%s9197_s4 + $0xe0] sm:$0xff] }
 0x209   :  { %v2804_v17 = vpack.c.bf16 %v2614_v25, %v2612_v44  ;;  %v2803_v35 = vpack.c.bf16 %v2613_v53, %v2611_v41  ;;  %v7577_v22 = vpop.permute.xlu0 %2272  ;;  %v2661_v53 = vmul.f32 %v7551_v31, %v1821_v61  ;;  %v2662_v41 = vmul.f32 %v7551_v31, %v1822_v58  ;;  %v1817_v44 = vld [vmem:[%s9198_s1 + $0x470] sm:$0xff]  ;;  %v1816_v31 = vld [vmem:[%s9198_s1 + $0x468] sm:$0xff] }
 0x20a   :  { %v2308_v3 = vpop.permute.xlu1 %2307  ;;  %v1893_v61 = vld [vmem:[%s9198_s1 + $0x6d0] sm:$0xff] }
 0x20b   :  { %v2671_v29 = vmul.f32 %v2308_v3, %v1831_v52  ;;  %v2672_v63 = vmul.f32 %v2308_v3, %v1832_v39  ;;  %3459 = vmatprep.subr.bf16.mxu1 %v2804_v17  ;;  %3329 = vmatmul.mubr.bf16.vlgmr.msra.gmra.mxu0 %v9220_v18  ;;  %v1815_v17 = vld [vmem:[%s9198_s1 + $0x460] sm:$0xff]  ;;  %v7694_v3 = vld [vmem:[%s9197_s4 + $0xe8] sm:$0xff] }
 0x20c   :  { %3460 = vmatpush2.bf16.msra.mxu1 %v2803_v35  ;;  %3338 = vmatprep.mubr.bf16.mxu0 %v4823_v54  ;;  %v1818_v54 = vld [vmem:[%s9198_s1 + $0x478] sm:$0xff]  ;;  %v4839_v35 = vcombine.high %v7659_v47, %v7664_v8 }
 0x20d   :  { %v2833_v42 = vpack.c.bf16 %v2673_v26, %v2671_v29  ;;  %v2834_v13 = vpack.c.bf16 %v2674_v16, %v2672_v63  ;;  %v7610_v7 = vpop.permute.xlu0 %2472  ;;  %v7689_v26 = vld [vmem:[%s9197_s4 + $0xc8] sm:$0xff]  ;;  %v2657_v16 = vmul.f32 %v7577_v22, %v1817_v44  ;;  %v4832_v29 = vcombine.low %v7629_v45, %v7634_v24  ;;  %v1809_v44 = vld [vmem:[%s9198_s1 + $0x430] sm:$0xff] }
 0x20e   :  { %v2298_v59 = vpop.permute.xlu1 %2297  ;;  %v2658_v63 = vmul.f32 %v7577_v22, %v1818_v54  ;;  %v1896_v22 = vld [vmem:[%s9198_s1 + $0x6e8] sm:$0xff] }
 0x20f   :  { %v2667_v38 = vmul.f32 %v2298_v59, %v1827_v23  ;;  %v2668_v60 = vmul.f32 %v2298_v59, %v1828_v32  ;;  %3562 = vmatprep.subr.bf16.mxu0 %v2834_v13  ;;  %3462 = vmatmul.mubr.bf16.vlgmr.msra.gmra.mxu1 %v9221_v5  ;;  %v1898_v32 = vld [vmem:[%s9198_s1 + $0x6f8] sm:$0xff]  ;;  %v2737_v59 = vmul.f32 %v7610_v7, %v1897_v49  ;;  %v7749_v45 = vld [vmem:[%s9197_s4 + $0x108] sm:$0xff]  ;;  %v1889_v49 = vld [vmem:[%s9198_s1 + $0x6b0] sm:$0xff] }
 0x210   :  { %3563 = vmatpush1.bf16.msra.mxu0 %v2833_v42  ;;  %3471 = vmatprep.mubr.bf16.mxu1 %v4825_v43  ;;  %v1895_v43 = vld [vmem:[%s9198_s1 + $0x6e0] sm:$0xff]  ;;  %v4841_v42 = vcombine.high %v7689_v26, %v7694_v3  ;;  %v2738_v21 = vmul.f32 %v7610_v7, %v1898_v32  ;;  %v1812_v7 = vld [vmem:[%s9198_s1 + $0x448] sm:$0xff] }
 0x211   :  { %v2831_v30 = vpack.c.bf16 %v2669_v28, %v2667_v38  ;;  %v2832_v56 = vpack.c.bf16 %v2670_v50, %v2668_v60  ;;  %v7643_v46 = vpop.permute.xlu0 %2262  ;;  %v7724_v28 = vld [vmem:[%s9197_s4 + $0x120] sm:$0xff]  ;;  %v4838_v50 = vcombine.low %v7659_v47, %v7664_v8  ;;  %v1813_v38 = vld [vmem:[%s9198_s1 + $0x450] sm:$0xff]  ;;  %v7754_v24 = vld [vmem:[%s9197_s4 + $0x128] sm:$0xff] }
 0x212   :  { %v2288_v33 = vpop.permute.xlu1 %2287  ;;  %v7779_v47 = vld [vmem:[%s9197_s4 + $0x140] sm:$0xff] }
 0x213   :  { %v2663_v12 = vmul.f32 %v2288_v33, %v1823_v51  ;;  %v2664_v34 = vmul.f32 %v2288_v33, %v1824_v57  ;;  %3564 = vmatprep.subr.bf16.mxu0 %v2832_v56  ;;  %3339 = vmatmul.mubr.bf16.gmra.mxu0 %v4822_v14  ;;  %v1814_v51 = vld [vmem:[%s9198_s1 + $0x458] sm:$0xff]  ;;  %v1811_v57 = vld [vmem:[%s9198_s1 + $0x440] sm:$0xff] }
 0x214   :  { %3565 = vmatpush1.bf16.msra.mxu0 %v2831_v30  ;;  %3348 = vmatprep.mubr.bf16.mxu0 %v4831_v20  ;;  %v4847_v20 = vcombine.high %v7719_v2, %v7724_v28  ;;  %v7784_v8 = vld [vmem:[%s9197_s4 + $0x160] sm:$0xff] }
 0x215   :  { %v2829_v40 = vpack.c.bf16 %v2665_v6, %v2663_v12  ;;  %v2830_v0 = vpack.c.bf16 %v2666_v62, %v2664_v34  ;;  %v7673_v55 = vpop.permute.xlu0 %2462  ;;  %v2653_v6 = vmul.f32 %v7643_v46, %v1813_v38  ;;  %v2654_v62 = vmul.f32 %v7643_v46, %v1814_v51  ;;  %v1892_v46 = vld [vmem:[%s9198_s1 + $0x6c8] sm:$0xff]  ;;  %v1805_v38 = vld [vmem:[%s9198_s1 + $0x410] sm:$0xff] }
 0x216   :  { %v2278_v25 = vpop.permute.xlu1 %2277 }
 0x217   :  { %v2659_v52 = vmul.f32 %v2278_v25, %v1819_v1  ;;  %v2660_v39 = vmul.f32 %v2278_v25, %v1820_v48  ;;  %3566 = vmatprep.subr.bf16.mxu0 %v2830_v0  ;;  %3472 = vmatmul.mubr.bf16.gmra.mxu1 %v4824_v15  ;;  %v4840_v15 = vcombine.low %v7689_v26, %v7694_v3  ;;  %v1894_v1 = vld [vmem:[%s9198_s1 + $0x6d8] sm:$0xff]  ;;  %v1891_v48 = vld [vmem:[%s9198_s1 + $0x6c0] sm:$0xff]  ;;  %v7809_v26 = vld [vmem:[%s9197_s4 + $0x148] sm:$0xff] }
 0x218   :  { %3567 = vmatpush1.bf16.msra.mxu0 %v2829_v40  ;;  %3481 = vmatprep.mubr.bf16.mxu1 %v4833_v19  ;;  %v4849_v19 = vcombine.high %v7749_v45, %v7754_v24  ;;  %v7814_v3 = vld [vmem:[%s9197_s4 + $0x168] sm:$0xff] }
 0x219   :  { %v2827_v37 = vpack.c.bf16 %v2661_v53, %v2659_v52  ;;  %v2828_v9 = vpack.c.bf16 %v2662_v41, %v2660_v39  ;;  %v7703_v18 = vpop.permute.xlu0 %2252  ;;  %v2733_v53 = vmul.f32 %v7673_v55, %v1893_v61  ;;  %v2734_v41 = vmul.f32 %v7673_v55, %v1894_v1  ;;  %v1808_v55 = vld [vmem:[%s9198_s1 + $0x428] sm:$0xff]  ;;  %v1885_v61 = vld [vmem:[%s9198_s1 + $0x690] sm:$0xff] }
 0x21a   :  { %v2268_v27 = vpop.permute.xlu1 %2267 }
 0x21b   :  { %v2655_v36 = vmul.f32 %v2268_v27, %v1815_v17  ;;  %v2656_v23 = vmul.f32 %v2268_v27, %v1816_v31  ;;  %3568 = vmatprep.subr.bf16.mxu0 %v2828_v9  ;;  %3349 = vmatmul.mubr.bf16.gmra.mxu0 %v4830_v4  ;;  %v4846_v4 = vcombine.low %v7719_v2, %v7724_v28  ;;  %v1810_v17 = vld [vmem:[%s9198_s1 + $0x438] sm:$0xff]  ;;  %v1807_v31 = vld [vmem:[%s9198_s1 + $0x420] sm:$0xff] }
 0x21c   :  { %3569 = vmatpush1.bf16.msra.mxu0 %v2827_v37  ;;  %3358 = vmatprep.mubr.bf16.mxu0 %v4839_v35  ;;  %v4855_v35 = vcombine.high %v7779_v47, %v7784_v8  ;;  %v7839_v2 = vld [vmem:[%s9197_s4 + $0x180] sm:$0xff] }
 0x21d   :  { %v2825_v13 = vpack.c.bf16 %v2657_v16, %v2655_v36  ;;  %v2826_v10 = vpack.c.bf16 %v2658_v63, %v2656_v23  ;;  %v7733_v60 = vpop.permute.xlu0 %2452  ;;  %v2649_v16 = vmul.f32 %v7703_v18, %v1809_v44  ;;  %v2650_v63 = vmul.f32 %v7703_v18, %v1810_v17  ;;  %v1888_v18 = vld [vmem:[%s9198_s1 + $0x6a8] sm:$0xff]  ;;  %v7844_v28 = vld [vmem:[%s9197_s4 + $0x1a0] sm:$0xff]  ;;  %v1865_v44 = vld [vmem:[%s9198_s1 + $0x5f0] sm:$0xff] }
 0x21e   :  { %v2468_v14 = vpop.permute.xlu1 %2467 }
 0x21f   :  { %v2735_v5 = vmul.f32 %v2468_v14, %v1895_v43  ;;  %v2736_v11 = vmul.f32 %v2468_v14, %v1896_v22  ;;  %3570 = vmatprep.subr.bf16.mxu0 %v2826_v10  ;;  %3482 = vmatmul.mubr.bf16.gmra.mxu1 %v4832_v29  ;;  %v4848_v29 = vcombine.low %v7749_v45, %v7754_v24  ;;  %v1890_v43 = vld [vmem:[%s9198_s1 + $0x6b8] sm:$0xff]  ;;  %v1887_v22 = vld [vmem:[%s9198_s1 + $0x6a0] sm:$0xff]  ;;  %v7869_v45 = vld [vmem:[%s9197_s4 + $0x188] sm:$0xff] }
 0x220   :  { %3571 = vmatpush1.bf16.msra.mxu0 %v2825_v13  ;;  %3491 = vmatprep.mubr.bf16.mxu1 %v4841_v42  ;;  %v4857_v42 = vcombine.high %v7809_v26, %v7814_v3  ;;  %v7874_v24 = vld [vmem:[%s9197_s4 + $0x1a8] sm:$0xff] }
 0x221   :  { %v2865_v30 = vpack.c.bf16 %v2737_v59, %v2735_v5  ;;  %v2866_v56 = vpack.c.bf16 %v2738_v21, %v2736_v11  ;;  %v7763_v12 = vpop.permute.xlu0 %2242  ;;  %v2729_v59 = vmul.f32 %v7733_v60, %v1889_v49  ;;  %v2730_v21 = vmul.f32 %v7733_v60, %v1890_v43  ;;  %v1804_v60 = vld [vmem:[%s9198_s1 + $0x408] sm:$0xff]  ;;  %v1881_v49 = vld [vmem:[%s9198_s1 + $0x670] sm:$0xff] }
 0x222   :  { %v2258_v33 = vpop.permute.xlu1 %2257 }
 0x223   :  { %v2651_v34 = vmul.f32 %v2258_v33, %v1811_v57  ;;  %v2652_v58 = vmul.f32 %v2258_v33, %v1812_v7  ;;  %3695 = vmatprep.subr.bf16.mxu1 %v2866_v56  ;;  %3359 = vmatmul.mubr.bf16.gmra.mxu0 %v4838_v50  ;;  %v4854_v50 = vcombine.low %v7779_v47, %v7784_v8  ;;  %v1806_v57 = vld [vmem:[%s9198_s1 + $0x418] sm:$0xff]  ;;  %v1803_v7 = vld [vmem:[%s9198_s1 + $0x400] sm:$0xff] }
 0x224   :  { %3696 = vmatpush1.bf16.msra.mxu1 %v2865_v30  ;;  %3368 = vmatprep.mubr.bf16.mxu0 %v4847_v20  ;;  %v4863_v20 = vcombine.high %v7839_v2, %v7844_v28  ;;  %v7899_v47 = vld [vmem:[%s9197_s4 + $0x1c0] sm:$0xff] }
 0x225   :  { %v2823_v40 = vpack.c.bf16 %v2653_v6, %v2651_v34  ;;  %v2824_v0 = vpack.c.bf16 %v2654_v62, %v2652_v58  ;;  %v7793_v52 = vpop.permute.xlu0 %2442  ;;  %v2645_v6 = vmul.f32 %v7763_v12, %v1805_v38  ;;  %v2646_v62 = vmul.f32 %v7763_v12, %v1806_v57  ;;  %v1884_v12 = vld [vmem:[%s9198_s1 + $0x688] sm:$0xff]  ;;  %v7904_v8 = vld [vmem:[%s9197_s4 + $0x1e0] sm:$0xff]  ;;  %v1861_v38 = vld [vmem:[%s9198_s1 + $0x5d0] sm:$0xff] }
 0x226   :  { %v2458_v25 = vpop.permute.xlu1 %2457 }
 0x227   :  { %v2731_v39 = vmul.f32 %v2458_v25, %v1891_v48  ;;  %v2732_v54 = vmul.f32 %v2458_v25, %v1892_v46  ;;  %3572 = vmatprep.subr.bf16.mxu0 %v2824_v0  ;;  %3492 = vmatmul.mubr.bf16.gmra.mxu1 %v4840_v15  ;;  %v4856_v15 = vcombine.low %v7809_v26, %v7814_v3  ;;  %v1886_v48 = vld [vmem:[%s9198_s1 + $0x698] sm:$0xff]  ;;  %v1883_v46 = vld [vmem:[%s9198_s1 + $0x680] sm:$0xff]  ;;  %v7929_v26 = vld [vmem:[%s9197_s4 + $0x1c8] sm:$0xff] }
 0x228   :  { %3573 = vmatpush1.bf16.msra.mxu0 %v2823_v40  ;;  %3501 = vmatprep.mubr.bf16.mxu1 %v4849_v19  ;;  %v4865_v19 = vcombine.high %v7869_v45, %v7874_v24  ;;  %v7934_v3 = vld [vmem:[%s9197_s4 + $0x1e8] sm:$0xff] }
 0x229   :  { %v2863_v37 = vpack.c.bf16 %v2733_v53, %v2731_v39  ;;  %v2864_v9 = vpack.c.bf16 %v2734_v41, %v2732_v54  ;;  %v7823_v36 = vpop.permute.xlu0 %2392  ;;  %v2725_v53 = vmul.f32 %v7793_v52, %v1885_v61  ;;  %v2726_v41 = vmul.f32 %v7793_v52, %v1886_v48  ;;  %v1864_v52 = vld [vmem:[%s9198_s1 + $0x5e8] sm:$0xff]  ;;  %v1877_v61 = vld [vmem:[%s9198_s1 + $0x650] sm:$0xff] }
 0x22a   :  { %v2248_v27 = vpop.permute.xlu1 %2247 }
 0x22b   :  { %v2647_v23 = vmul.f32 %v2248_v27, %v1807_v31  ;;  %v2648_v32 = vmul.f32 %v2248_v27, %v1808_v55  ;;  %3697 = vmatprep.subr.bf16.mxu1 %v2864_v9  ;;  %3369 = vmatmul.mubr.bf16.gmra.mxu0 %v4846_v4  ;;  %v4862_v4 = vcombine.low %v7839_v2, %v7844_v28  ;;  %v1866_v31 = vld [vmem:[%s9198_s1 + $0x5f8] sm:$0xff]  ;;  %v1863_v55 = vld [vmem:[%s9198_s1 + $0x5e0] sm:$0xff] }
 0x22c   :  { %3698 = vmatpush1.bf16.msra.mxu1 %v2863_v37  ;;  %3378 = vmatprep.mubr.bf16.mxu0 %v4855_v35  ;;  %v4871_v35 = vcombine.high %v7899_v47, %v7904_v8  ;;  %v7959_v2 = vld [vmem:[%s9197_s4 + $0x200] sm:$0xff] }
 0x22d   :  { %v2821_v13 = vpack.c.bf16 %v2649_v16, %v2647_v23  ;;  %v2822_v10 = vpack.c.bf16 %v2650_v63, %v2648_v32  ;;  %v7853_v5 = vpop.permute.xlu0 %2432  ;;  %v2705_v16 = vmul.f32 %v7823_v36, %v1865_v44  ;;  %v2706_v63 = vmul.f32 %v7823_v36, %v1866_v31  ;;  %v1880_v36 = vld [vmem:[%s9198_s1 + $0x668] sm:$0xff]  ;;  %v7964_v28 = vld [vmem:[%s9197_s4 + $0x220] sm:$0xff]  ;;  %v1857_v44 = vld [vmem:[%s9198_s1 + $0x5b0] sm:$0xff] }
 0x22e   :  { %v2448_v14 = vpop.permute.xlu1 %2447 }
 0x22f   :  { %v2727_v11 = vmul.f32 %v2448_v14, %v1887_v22  ;;  %v2728_v51 = vmul.f32 %v2448_v14, %v1888_v18  ;;  %3574 = vmatprep.subr.bf16.mxu0 %v2822_v10  ;;  %3502 = vmatmul.mubr.bf16.gmra.mxu1 %v4848_v29  ;;  %v4864_v29 = vcombine.low %v7869_v45, %v7874_v24  ;;  %v1882_v22 = vld [vmem:[%s9198_s1 + $0x678] sm:$0xff]  ;;  %v1879_v18 = vld [vmem:[%s9198_s1 + $0x660] sm:$0xff]  ;;  %v7989_v45 = vld [vmem:[%s9197_s4 + $0x208] sm:$0xff] }
 0x230   :  { %3575 = vmatpush1.bf16.msra.mxu0 %v2821_v13  ;;  %3511 = vmatprep.mubr.bf16.mxu1 %v4857_v42  ;;  %v4873_v42 = vcombine.high %v7929_v26, %v7934_v3  ;;  %v7994_v24 = vld [vmem:[%s9197_s4 + $0x228] sm:$0xff] }
 0x231   :  { %v2861_v30 = vpack.c.bf16 %v2729_v59, %v2727_v11  ;;  %v2862_v56 = vpack.c.bf16 %v2730_v21, %v2728_v51  ;;  %v7883_v34 = vpop.permute.xlu0 %2382  ;;  %v2721_v59 = vmul.f32 %v7853_v5, %v1881_v49  ;;  %v2722_v21 = vmul.f32 %v7853_v5, %v1882_v22  ;;  %v1860_v5 = vld [vmem:[%s9198_s1 + $0x5c8] sm:$0xff]  ;;  %v1873_v49 = vld [vmem:[%s9198_s1 + $0x630] sm:$0xff] }
 0x232   :  { %v2238_v33 = vpop.permute.xlu1 %2237 }
 0x233   :  { %v2643_v58 = vmul.f32 %v2238_v33, %v1803_v7  ;;  %v2644_v1 = vmul.f32 %v2238_v33, %v1804_v60  ;;  %3699 = vmatprep.subr.bf16.mxu1 %v2862_v56  ;;  %3379 = vmatmul.mubr.bf16.gmra.mxu0 %v4854_v50  ;;  %v4870_v50 = vcombine.low %v7899_v47, %v7904_v8  ;;  %v1862_v7 = vld [vmem:[%s9198_s1 + $0x5d8] sm:$0xff]  ;;  %v1859_v60 = vld [vmem:[%s9198_s1 + $0x5c0] sm:$0xff] }
 0x234   :  { %3700 = vmatpush1.bf16.msra.mxu1 %v2861_v30  ;;  %3388 = vmatprep.mubr.bf16.mxu0 %v4863_v20  ;;  %v4879_v20 = vcombine.high %v7959_v2, %v7964_v28  ;;  %v8019_v47 = vld [vmem:[%s9197_s4 + $0x240] sm:$0xff] }
 0x235   :  { %v2819_v40 = vpack.c.bf16 %v2645_v6, %v2643_v58  ;;  %v2820_v0 = vpack.c.bf16 %v2646_v62, %v2644_v1  ;;  %v7913_v39 = vpop.permute.xlu0 %2422  ;;  %v2701_v6 = vmul.f32 %v7883_v34, %v1861_v38  ;;  %v2702_v62 = vmul.f32 %v7883_v34, %v1862_v7  ;;  %v1876_v34 = vld [vmem:[%s9198_s1 + $0x648] sm:$0xff]  ;;  %v8024_v8 = vld [vmem:[%s9197_s4 + $0x260] sm:$0xff]  ;;  %v1853_v38 = vld [vmem:[%s9198_s1 + $0x590] sm:$0xff] }
 0x236   :  { %v2438_v25 = vpop.permute.xlu1 %2437  ;;  %v1854_v7 = vld [vmem:[%s9198_s1 + $0x598] sm:$0xff] }
 0x237   :  { %v2723_v54 = vmul.f32 %v2438_v25, %v1883_v46  ;;  %v2724_v17 = vmul.f32 %v2438_v25, %v1884_v12  ;;  %3576 = vmatprep.subr.bf16.mxu0 %v2820_v0  ;;  %3512 = vmatmul.mubr.bf16.gmra.mxu1 %v4856_v15  ;;  %v4872_v15 = vcombine.low %v7929_v26, %v7934_v3  ;;  %v1878_v46 = vld [vmem:[%s9198_s1 + $0x658] sm:$0xff]  ;;  %v1875_v12 = vld [vmem:[%s9198_s1 + $0x640] sm:$0xff]  ;;  %v8049_v26 = vld [vmem:[%s9197_s4 + $0x248] sm:$0xff] }
 0x238   :  { %3577 = vmatpush1.bf16.msra.mxu0 %v2819_v40  ;;  %3521 = vmatprep.mubr.bf16.mxu1 %v4865_v19  ;;  %v4881_v19 = vcombine.high %v7989_v45, %v7994_v24  ;;  %v8054_v3 = vld [vmem:[%s9197_s4 + $0x268] sm:$0xff] }
 0x239   :  { %v2859_v37 = vpack.c.bf16 %v2725_v53, %v2723_v54  ;;  %v2860_v9 = vpack.c.bf16 %v2726_v41, %v2724_v17  ;;  %v7943_v23 = vpop.permute.xlu0 %2372  ;;  %v2717_v53 = vmul.f32 %v7913_v39, %v1877_v61  ;;  %v2718_v41 = vmul.f32 %v7913_v39, %v1878_v46  ;;  %v1856_v39 = vld [vmem:[%s9198_s1 + $0x5a8] sm:$0xff]  ;;  %v1869_v61 = vld [vmem:[%s9198_s1 + $0x610] sm:$0xff]  ;;  %v1870_v46 = vld [vmem:[%s9198_s1 + $0x618] sm:$0xff] }
 0x23a   :  { %v2388_v27 = vpop.permute.xlu1 %2387 }
 0x23b   :  { %v2703_v32 = vmul.f32 %v2388_v27, %v1863_v55  ;;  %v2704_v43 = vmul.f32 %v2388_v27, %v1864_v52  ;;  %3701 = vmatprep.subr.bf16.mxu1 %v2860_v9  ;;  %3389 = vmatmul.mubr.bf16.gmra.mxu0 %v4862_v4  ;;  %v4878_v4 = vcombine.low %v7959_v2, %v7964_v28  ;;  %v1858_v55 = vld [vmem:[%s9198_s1 + $0x5b8] sm:$0xff]  ;;  %v1855_v52 = vld [vmem:[%s9198_s1 + $0x5a0] sm:$0xff]  ;;  %v8079_v2 = vld [vmem:[%s9197_s4 + $0x10] sm:$0xff] }
 0x23c   :  { %3702 = vmatpush1.bf16.msra.mxu1 %v2859_v37  ;;  %3398 = vmatprep.mubr.bf16.mxu0 %v4871_v35  ;;  %v4887_v35 = vcombine.high %v8019_v47, %v8024_v8  ;;  %v8084_v28 = vld [vmem:[%s9197_s4 + $0x30] sm:$0xff] }
 0x23d   :  { %v2849_v13 = vpack.c.bf16 %v2705_v16, %v2703_v32  ;;  %v2850_v10 = vpack.c.bf16 %v2706_v63, %v2704_v43  ;;  %v7973_v11 = vpop.permute.xlu0 %2412  ;;  %v2697_v16 = vmul.f32 %v7943_v23, %v1857_v44  ;;  %v2698_v63 = vmul.f32 %v7943_v23, %v1858_v55  ;;  %v1872_v23 = vld [vmem:[%s9198_s1 + $0x628] sm:$0xff]  ;;  %v1850_v44 = vld [vmem:[%s9198_s1 + $0x578] sm:$0xff] }
 0x23e   :  { %v2428_v14 = vpop.permute.xlu1 %2427 }
 0x23f   :  { %v2719_v51 = vmul.f32 %v2428_v14, %v1879_v18  ;;  %v2720_v57 = vmul.f32 %v2428_v14, %v1880_v36  ;;  %3578 = vmatprep.subr.bf16.mxu0 %v2850_v10  ;;  %3522 = vmatmul.mubr.bf16.gmra.mxu1 %v4864_v29  ;;  %v4880_v29 = vcombine.low %v7989_v45, %v7994_v24  ;;  %v1874_v18 = vld [vmem:[%s9198_s1 + $0x638] sm:$0xff]  ;;  %v1871_v36 = vld [vmem:[%s9198_s1 + $0x620] sm:$0xff] }
 0x240   :  { %3579 = vmatpush2.bf16.msra.mxu0 %v2849_v13  ;;  %3531 = vmatprep.mubr.bf16.mxu1 %v4873_v42  ;;  %v4889_v42 = vcombine.high %v8049_v26, %v8054_v3  ;;  %v8107_v45 = vld [vmem:[%s9197_s4 + $0x18] sm:$0xff] }
 0x241   :  { %v2857_v30 = vpack.c.bf16 %v2721_v59, %v2719_v51  ;;  %v2858_v56 = vpack.c.bf16 %v2722_v21, %v2720_v57  ;;  %v8003_v58 = vpop.permute.xlu0 %2362  ;;  %v2713_v59 = vmul.f32 %v7973_v11, %v1873_v49  ;;  %v2714_v21 = vmul.f32 %v7973_v11, %v1874_v18  ;;  %v1852_v11 = vld [vmem:[%s9198_s1 + $0x588] sm:$0xff]  ;;  %v8112_v24 = vld [vmem:[%s9197_s4 + $0x38] sm:$0xff]  ;;  %v1845_v18 = vld [vmem:[%s9198_s1 + $0x550] sm:$0xff] }
 0x242   :  { %v2378_v33 = vpop.permute.xlu1 %2377 }
 0x243   :  { %v2699_v1 = vmul.f32 %v2378_v33, %v1859_v60  ;;  %v2700_v48 = vmul.f32 %v2378_v33, %v1860_v5  ;;  %3703 = vmatprep.subr.bf16.mxu1 %v2858_v56  ;;  %3399 = vmatmul.mubr.bf16.gmra.mxu0 %v4870_v50  ;;  %v4886_v50 = vcombine.low %v8019_v47, %v8024_v8  ;;  %v1851_v5 = vld [vmem:[%s9198_s1 + $0x580] sm:$0xff] }
 0x244   :  { %3704 = vmatpush1.bf16.msra.mxu1 %v2857_v30  ;;  %3408 = vmatprep.mubr.bf16.mxu0 %v4879_v20  ;;  %v4819_v20 = vcombine.high %v8079_v2, %v8084_v28 }
 0x245   :  { %v2847_v40 = vpack.c.bf16 %v2701_v6, %v2699_v1  ;;  %v2848_v0 = vpack.c.bf16 %v2702_v62, %v2700_v48  ;;  %v8033_v54 = vpop.permute.xlu0 %2402  ;;  %v2693_v6 = vmul.f32 %v8003_v58, %v1853_v38  ;;  %v2694_v62 = vmul.f32 %v8003_v58, %v1854_v7  ;;  %v1868_v58 = vld [vmem:[%s9198_s1 + $0x608] sm:$0xff] }
 0x246   :  { %v2418_v25 = vpop.permute.xlu1 %2417 }
 0x247   :  { %v2715_v17 = vmul.f32 %v2418_v25, %v1875_v12  ;;  %v2716_v31 = vmul.f32 %v2418_v25, %v1876_v34  ;;  %3580 = vmatprep.subr.bf16.mxu0 %v2848_v0  ;;  %3532 = vmatmul.mubr.bf16.gmra.mxu1 %v4872_v15  ;;  %v4888_v15 = vcombine.low %v8049_v26, %v8054_v3  ;;  %v1867_v12 = vld [vmem:[%s9198_s1 + $0x600] sm:$0xff]  ;;  %v1849_v25 = vld [vmem:[%s9198_s1 + $0x570] sm:$0xff]  ;;  %v1914_v3 = vld [vmem:[%s9198_s1 + $0x778] sm:$0xff] }
 0x248   :  { %3581 = vmatpush2.bf16.msra.mxu0 %v2847_v40  ;;  %3541 = vmatprep.mubr.bf16.mxu1 %v4881_v19  ;;  %v4821_v34 = vcombine.high %v8107_v45, %v8112_v24  ;;  %v2709_v0 = vmul.f32 %v8033_v54, %v1869_v61 }
 0x249   :  { %v2855_v37 = vpack.c.bf16 %v2717_v53, %v2715_v17  ;;  %v2856_v9 = vpack.c.bf16 %v2718_v41, %v2716_v31  ;;  %v8063_v32 = vpop.permute.xlu0 %2352  ;;  %v2710_v53 = vmul.f32 %v8033_v54, %v1870_v46  ;;  %v1847_v17 = vld [vmem:[%s9198_s1 + $0x560] sm:$0xff]  ;;  %v1848_v54 = vld [vmem:[%s9198_s1 + $0x568] sm:$0xff] }
 0x24a   :  { %v2368_v27 = vpop.permute.xlu1 %2367 }
 0x24b   :  { %v2695_v43 = vmul.f32 %v2368_v27, %v1855_v52  ;;  %v2696_v22 = vmul.f32 %v2368_v27, %v1856_v39  ;;  %3705 = vmatprep.subr.bf16.mxu1 %v2856_v9  ;;  %3409 = vmatmul.mubr.bf16.gmra.mxu0 %v4878_v4  ;;  %v2689_v39 = vmul.f32 %v8063_v32, %v1849_v25  ;;  %v1911_v27 = vld [vmem:[%s9198_s1 + $0x760] sm:$0xff] }
 0x24c   :  { %3706 = vmatpush1.bf16.msra.mxu1 %v2855_v37  ;;  %3418 = vmatprep.mubr.bf16.mxu0 %v4887_v35  ;;  %v2690_v35 = vmul.f32 %v8063_v32, %v1850_v44  ;;  %v1913_v37 = vld [vmem:[%s9198_s1 + $0x770] sm:$0xff]  ;;  %v1904_v44 = vld [vmem:[%s9198_s1 + $0x728] sm:$0xff] }
 0x24d   :  { %v2845_v13 = vpack.c.bf16 %v2697_v16, %v2695_v43  ;;  %v2846_v10 = vpack.c.bf16 %v2698_v63, %v2696_v22  ;;  %v2513_v60 = vpop.permute.xlu0 %2512 }
 0x24e   :  { %v2408_v14 = vpop.permute.xlu1 %2407  ;;  %v2753_v43 = vmul.f32 %v2513_v60, %v1913_v37  ;;  %v2754_v22 = vmul.f32 %v2513_v60, %v1914_v3  ;;  %v1835_v3 = vld [vmem:[%s9198_s1 + $0x500] sm:$0xff] }
 0x24f   :  { %v2711_v51 = vmul.f32 %v2408_v14, %v1871_v36  ;;  %v2712_v57 = vmul.f32 %v2408_v14, %v1872_v23  ;;  %3582 = vmatprep.subr.bf16.mxu0 %v2846_v10  ;;  %3542 = vmatmul.mubr.bf16.gmra.mxu1 %v4880_v29  ;;  %v1912_v29 = vld [vmem:[%s9198_s1 + $0x768] sm:$0xff] }
 0x250   :  { %3583 = vmatpush2.bf16.msra.mxu0 %v2845_v13  ;;  %3551 = vmatprep.mubr.bf16.mxu1 %v4889_v42  ;;  %v1846_v42 = vld [vmem:[%s9198_s1 + $0x558] sm:$0xff]  ;;  %v1843_v13 = vld [vmem:[%s9198_s1 + $0x540] sm:$0xff]  ;;  %v1844_v10 = vld [vmem:[%s9198_s1 + $0x548] sm:$0xff] }
 0x251   :  { %v2853_v30 = vpack.c.bf16 %v2713_v59, %v2711_v51  ;;  %v2854_v56 = vpack.c.bf16 %v2714_v21, %v2712_v57  ;;  %v2343_v47 = vpop.permute.xlu0 %2342  ;;  %v1909_v57 = vld [vmem:[%s9198_s1 + $0x750] sm:$0xff] }
 0x252   :  { %v2358_v33 = vpop.permute.xlu1 %2357  ;;  %v2685_v38 = vmul.f32 %v2343_v47, %v1845_v18  ;;  %v2686_v51 = vmul.f32 %v2343_v47, %v1846_v42  ;;  %v1899_v42 = vld [vmem:[%s9198_s1 + $0x700] sm:$0xff] }
 0x253   :  { %v2691_v1 = vmul.f32 %v2358_v33, %v1851_v5  ;;  %v2692_v48 = vmul.f32 %v2358_v33, %v1852_v11  ;;  %3707 = vmatprep.subr.bf16.mxu1 %v2854_v56  ;;  %3419 = vmatmul.mubr.bf16.gmra.mxu0 %v4886_v50  ;;  %v1910_v5 = vld [vmem:[%s9198_s1 + $0x758] sm:$0xff]  ;;  %v1907_v11 = vld [vmem:[%s9198_s1 + $0x740] sm:$0xff] }
 0x254   :  { %3708 = vmatpush1.bf16.msra.mxu1 %v2853_v30  ;;  %3594 = vmatprep.mubr.bf16.mxu0 %v4819_v20  ;;  %v1908_v20 = vld [vmem:[%s9198_s1 + $0x748] sm:$0xff] }
 0x255   :  { %v2843_v19 = vpack.c.bf16 %v2693_v6, %v2691_v1  ;;  %v2844_v40 = vpack.c.bf16 %v2694_v62, %v2692_v48  ;;  %v2503_v16 = vpop.permute.xlu0 %2502  ;;  %v1841_v62 = vld [vmem:[%s9198_s1 + $0x530] sm:$0xff]  ;;  %v1842_v48 = vld [vmem:[%s9198_s1 + $0x538] sm:$0xff] }
 0x256   :  { %v2398_v8 = vpop.permute.xlu1 %2397  ;;  %v2749_v33 = vmul.f32 %v2503_v16, %v1909_v57 }
 0x257   :  { %v2707_v4 = vmul.f32 %v2398_v8, %v1867_v12  ;;  %v2708_v41 = vmul.f32 %v2398_v8, %v1868_v58  ;;  %3584 = vmatprep.subr.bf16.mxu0 %v2844_v40  ;;  %3552 = vmatmul.mubr.bf16.gmra.mxu1 %v4888_v15  ;;  %v2750_v15 = vmul.f32 %v2503_v16, %v1910_v5  ;;  %v1839_v12 = vld [vmem:[%s9198_s1 + $0x520] sm:$0xff]  ;;  %v1840_v58 = vld [vmem:[%s9198_s1 + $0x528] sm:$0xff]  ;;  %v1905_v8 = vld [vmem:[%s9198_s1 + $0x730] sm:$0xff] }
 0x258   :  { %3585 = vmatpush2.bf16.msra.mxu0 %v2843_v19  ;;  %4894 = vmatprep.mubr.msk.bf16.mxu1 %vm3265_vm1, %v4821_v34  ;;  %v1836_v16 = vld [vmem:[%s9198_s1 + $0x508] sm:$0xff] }
 0x259   :  { %v2851_v31 = vpack.c.bf16 %v2709_v0, %v2707_v4  ;;  %v2852_v55 = vpack.c.bf16 %v2710_v53, %v2708_v41  ;;  %v2333_v50 = vpop.permute.xlu0 %2332  ;;  %v1906_v4 = vld [vmem:[%s9198_s1 + $0x738] sm:$0xff]  ;;  %v1903_v41 = vld [vmem:[%s9198_s1 + $0x720] sm:$0xff] }
 0x25a   :  { %v2348_v52 = vpop.permute.xlu1 %2347  ;;  %v2681_v0 = vmul.f32 %v2333_v50, %v1841_v62  ;;  %v2682_v47 = vmul.f32 %v2333_v50, %v1842_v48  ;;  %v281_v50 = vld [vmem:[%s9197_s4 + $0x70] sm:$0xff] }
 0x25b   :  { %v2687_v9 = vmul.f32 %v2348_v52, %v1847_v17  ;;  %v2688_v26 = vmul.f32 %v2348_v52, %v1848_v54  ;;  %3709 = vmatprep.subr.bf16.mxu1 %v2852_v55  ;;  %v293_v48 = vld [vmem:[%s9197_s4 + $0xd0] sm:$0xff] }
 0x25c   :  { %3710 = vmatpush1.bf16.msra.mxu1 %v2851_v31 }
 0x25d   :  { %v2841_v63 = vpack.c.bf16 %v2689_v39, %v2687_v9  ;;  %v2842_v49 = vpack.c.bf16 %v2690_v35, %v2688_v26  ;;  %v2493_v46 = vpop.permute.xlu0 %2492  ;;  %v1837_v35 = vld [vmem:[%s9198_s1 + $0x510] sm:$0xff]  ;;  %v1838_v26 = vld [vmem:[%s9198_s1 + $0x518] sm:$0xff] }
 0x25e   :  { %v2508_v32 = vpop.permute.xlu1 %2507  ;;  %v2745_v52 = vmul.f32 %v2493_v46, %v1905_v8  ;;  %v2746_v39 = vmul.f32 %v2493_v46, %v1906_v4  ;;  %v297_v46 = vld [vmem:[%s9197_s4 + $0xf0] sm:$0xff]  ;;  %v302_v4 = vld [vmem:[%s9197_s4 + $0x118] sm:$0xff] }
 0x25f   :  { %v2751_v36 = vmul.f32 %v2508_v32, %v1911_v27  ;;  %v2752_v23 = vmul.f32 %v2508_v32, %v1912_v29  ;;  %3586 = vmatprep.subr.bf16.mxu0 %v2842_v49  ;;  %v305_v8 = vld [vmem:[%s9197_s4 + $0x130] sm:$0xff] }
 0x260   :  { %3587 = vmatpush2.bf16.msra.mxu0 %v2841_v63 }
 0x261   :  { %v2873_v59 = vpack.c.bf16 %v2753_v43, %v2751_v36  ;;  %v2874_v14 = vpack.c.bf16 %v2754_v22, %v2752_v23  ;;  %v2323_v31 = vpop.permute.xlu0 %2322  ;;  %v1901_v43 = vld [vmem:[%s9198_s1 + $0x710] sm:$0xff]  ;;  %v1902_v36 = vld [vmem:[%s9198_s1 + $0x718] sm:$0xff] }
 0x262   :  { %v2338_v21 = vpop.permute.xlu1 %2337  ;;  %v2677_v49 = vmul.f32 %v2323_v31, %v1837_v35  ;;  %v2678_v32 = vmul.f32 %v2323_v31, %v1838_v26  ;;  %v313_v31 = vld [vmem:[%s9197_s4 + $0x170] sm:$0xff]  ;;  %v314_v35 = vld [vmem:[%s9197_s4 + $0x178] sm:$0xff] }
 0x263   :  { %v2683_v7 = vmul.f32 %v2338_v21, %v1843_v13  ;;  %v2684_v60 = vmul.f32 %v2338_v21, %v1844_v10  ;;  %3719 = vmatprep.subr.bf16.mxu1 %v2874_v14  ;;  %v1900_v13 = vld [vmem:[%s9198_s1 + $0x708] sm:$0xff]  ;;  %v277_v14 = vld [vmem:[%s9197_s4 + $0x50] sm:$0xff] }
 0x264   :  { %3720 = vmatpush2.bf16.msra.mxu1 %v2873_v59  ;;  %v4827_v5 = vcombine.high %v277_v14, %v281_v50  ;;  %v317_v26 = vld [vmem:[%s9197_s4 + $0x190] sm:$0xff] }
 0x265   :  { %v2839_v30 = vpack.c.bf16 %v2685_v38, %v2683_v7  ;;  %v2840_v56 = vpack.c.bf16 %v2686_v51, %v2684_v60  ;;  %v2483_v23 = vpop.permute.xlu0 %2482  ;;  %v4818_v38 = vcombine.low %v8079_v2, %v8084_v28  ;;  %v4820_v2 = vcombine.low %v8107_v45, %v8112_v24  ;;  %v286_v45 = vld [vmem:[%s9197_s4 + $0x98] sm:$0xff] }
 0x266   :  { %v2498_v6 = vpop.permute.xlu1 %2497  ;;  %v2741_v51 = vmul.f32 %v2483_v23, %v1901_v43  ;;  %v2742_v57 = vmul.f32 %v2483_v23, %v1902_v36  ;;  %v290_v24 = vld [vmem:[%s9197_s4 + $0xb8] sm:$0xff]  ;;  %v325_v43 = vld [vmem:[%s9197_s4 + $0x1d0] sm:$0xff] }
 0x267   :  { %v2747_v61 = vmul.f32 %v2498_v6, %v1907_v11  ;;  %v2748_v1 = vmul.f32 %v2498_v6, %v1908_v20  ;;  %3588 = vmatprep.subr.bf16.mxu0 %v2840_v56  ;;  %v282_v56 = vld [vmem:[%s9197_s4 + $0x78] sm:$0xff]  ;;  %v285_v6 = vld [vmem:[%s9197_s4 + $0x90] sm:$0xff] }
 0x268   :  { %3589 = vmatpush2.bf16.msra.mxu0 %v2839_v30  ;;  %v278_v30 = vld [vmem:[%s9197_s4 + $0x58] sm:$0xff] }
 0x269   :  { %v2871_v34 = vpack.c.bf16 %v2749_v33, %v2747_v61  ;;  %v2872_v19 = vpack.c.bf16 %v2750_v15, %v2748_v1  ;;  %v4829_v28 = vcombine.high %v278_v30, %v282_v56  ;;  %v289_v33 = vld [vmem:[%s9197_s4 + $0xb0] sm:$0xff]  ;;  %v4826_v15 = vcombine.low %v277_v14, %v281_v50  ;;  %v326_v23 = vld [vmem:[%s9197_s4 + $0x1d8] sm:$0xff] }
 0x26a   :  { %v2328_v40 = vpop.permute.xlu1 %2327  ;;  %v4835_v62 = vcombine.high %v285_v6, %v289_v33  ;;  %v4828_v61 = vcombine.low %v278_v30, %v282_v56  ;;  %v4837_v1 = vcombine.high %v286_v45, %v290_v24  ;;  %v337_v14 = vld [vmem:[%s9197_s4 + $0x230] sm:$0xff]  ;;  %v342_v30 = vld [vmem:[%s9197_s4 + $0x258] sm:$0xff] }
 0x26b   :  { %v2679_v53 = vmul.f32 %v2328_v40, %v1839_v12  ;;  %v2680_v25 = vmul.f32 %v2328_v40, %v1840_v58  ;;  %3721 = vmatprep.subr.bf16.mxu1 %v2872_v19  ;;  %v4834_v12 = vcombine.low %v285_v6, %v289_v33  ;;  %v4843_v58 = vcombine.high %v293_v48, %v297_v46  ;;  %v298_v19 = vld [vmem:[%s9197_s4 + $0xf8] sm:$0xff] }
 0x26c   :  { %3722 = vmatpush2.bf16.msra.mxu1 %v2871_v34  ;;  %v294_v34 = vld [vmem:[%s9197_s4 + $0xd8] sm:$0xff]  ;;  %v4836_v40 = vcombine.low %v286_v45, %v290_v24 }
 0x26d   :  { %v2837_v17 = vpack.c.bf16 %v2681_v0, %v2679_v53  ;;  %v2838_v54 = vpack.c.bf16 %v2682_v47, %v2680_v25  ;;  %v4845_v0 = vcombine.high %v294_v34, %v298_v19  ;;  %v301_v47 = vld [vmem:[%s9197_s4 + $0x110] sm:$0xff]  ;;  %v4842_v53 = vcombine.low %v293_v48, %v297_v46  ;;  %v346_v56 = vld [vmem:[%s9197_s4 + $0x278] sm:$0xff] }
 0x26e   :  { %v2488_v55 = vpop.permute.xlu1 %2487  ;;  %v4851_v25 = vcombine.high %v301_v47, %v305_v8  ;;  %v4892_v33 = vcombine.low %v342_v30, %v346_v56 }
 0x26f   :  { %v2743_v37 = vmul.f32 %v2488_v55, %v1903_v41  ;;  %v2744_v9 = vmul.f32 %v2488_v55, %v1904_v44  ;;  %3590 = vmatprep.subr.bf16.mxu0 %v2838_v54  ;;  %v306_v41 = vld [vmem:[%s9197_s4 + $0x138] sm:$0xff]  ;;  %v4844_v44 = vcombine.low %v294_v34, %v298_v19  ;;  %v309_v54 = vld [vmem:[%s9197_s4 + $0x150] sm:$0xff]  ;;  %v4850_v55 = vcombine.low %v301_v47, %v305_v8 }
 0x270   :  { %3591 = vmatpush2.bf16.msra.mxu0 %v2837_v17  ;;  %v4853_v17 = vcombine.high %v302_v4, %v306_v41 }
 0x271   :  { %v2869_v27 = vpack.c.bf16 %v2745_v52, %v2743_v37  ;;  %v2870_v29 = vpack.c.bf16 %v2746_v39, %v2744_v9  ;;  %v4859_v52 = vcombine.high %v309_v54, %v313_v31  ;;  %v310_v39 = vld [vmem:[%s9197_s4 + $0x158] sm:$0xff]  ;;  %v4852_v37 = vcombine.low %v302_v4, %v306_v41 }
 0x272   :  { %v2318_v63 = vpop.permute.xlu1 %2317  ;;  %v4861_v9 = vcombine.high %v310_v39, %v314_v35 }
 0x273   :  { %v2675_v22 = vmul.f32 %v2318_v63, %v1835_v3  ;;  %v2676_v18 = vmul.f32 %v2318_v63, %v1836_v16  ;;  %3723 = vmatprep.subr.bf16.mxu1 %v2870_v29  ;;  %v321_v3 = vld [vmem:[%s9197_s4 + $0x1b0] sm:$0xff]  ;;  %v4858_v16 = vcombine.low %v309_v54, %v313_v31  ;;  %v318_v29 = vld [vmem:[%s9197_s4 + $0x198] sm:$0xff] }
 0x274   :  { %3724 = vmatpush2.bf16.msra.mxu1 %v2869_v27  ;;  %v4867_v27 = vcombine.high %v317_v26, %v321_v3  ;;  %v322_v63 = vld [vmem:[%s9197_s4 + $0x1b8] sm:$0xff] }
 0x275   :  { %v2835_v10 = vpack.c.bf16 %v2677_v49, %v2675_v22  ;;  %v2836_v59 = vpack.c.bf16 %v2678_v32, %v2676_v18  ;;  %v4860_v49 = vcombine.low %v310_v39, %v314_v35  ;;  %v4869_v32 = vcombine.high %v318_v29, %v322_v63  ;;  %v329_v22 = vld [vmem:[%s9197_s4 + $0x1f0] sm:$0xff] }
 0x276   :  { %v2478_v21 = vpop.permute.xlu1 %2477  ;;  %v4866_v18 = vcombine.low %v317_v26, %v321_v3  ;;  %v4875_v36 = vcombine.high %v325_v43, %v329_v22  ;;  %v4874_v50 = vcombine.low %v325_v43, %v329_v22 }
 0x277   :  { %v2739_v7 = vmul.f32 %v2478_v21, %v1899_v42  ;;  %v2740_v60 = vmul.f32 %v2478_v21, %v1900_v13  ;;  %3592 = vmatprep.subr.bf16.mxu0 %v2836_v59  ;;  %v330_v42 = vld [vmem:[%s9197_s4 + $0x1f8] sm:$0xff]  ;;  %v4868_v13 = vcombine.low %v318_v29, %v322_v63  ;;  %v333_v59 = vld [vmem:[%s9197_s4 + $0x210] sm:$0xff] }
 0x278   :  { %3593 = vmatpush2.bf16.msra.mxu0 %v2835_v10  ;;  %v4877_v10 = vcombine.high %v326_v23, %v330_v42  ;;  %v4883_v21 = vcombine.high %v333_v59, %v337_v14 }
 0x279   :  { %v2867_v11 = vpack.c.bf16 %v2741_v51, %v2739_v7  ;;  %v2868_v20 = vpack.c.bf16 %v2742_v57, %v2740_v60  ;;  %v338_v51 = vld [vmem:[%s9197_s4 + $0x238] sm:$0xff]  ;;  %v4876_v57 = vcombine.low %v326_v23, %v330_v42  ;;  %v341_v60 = vld [vmem:[%s9197_s4 + $0x250] sm:$0xff] }
 0x27b   :  { %3595 = vmatmul.mubr.bf16.vlgmr.msra.gmra.mxu0 %v4818_v38  ;;  %3725 = vmatprep.subr.bf16.mxu1 %v2868_v20  ;;  %v334_v38 = vld [vmem:[%s9197_s4 + $0x218] sm:$0xff] }
 0x27c   :  { %3726 = vmatpush2.bf16.msra.mxu1 %v2867_v11  ;;  %3604 = vmatprep.mubr.bf16.mxu0 %v4827_v5  ;;  %v4885_v7 = vcombine.high %v334_v38, %v338_v51  ;;  %v345_v5 = vld [vmem:[%s9197_s4 + $0x270] sm:$0xff]  ;;  %v4882_v11 = vcombine.low %v333_v59, %v337_v14 }
 0x27d   :  { %v4891_v20 = vcombine.high %v341_v60, %v345_v5  ;;  %v4890_v6 = vcombine.low %v341_v60, %v345_v5 }
 0x27f   :  { %3728 = vmatmul.mubr.bf16.vlgmr.msra.gmra.mxu1 %v4820_v2  ;;  %v4884_v2 = vcombine.low %v334_v38, %v338_v51 }
 0x280   :  { %4895 = vmatprep.mubr.msk.bf16.mxu1 %vm3265_vm1, %v4829_v28  ;;  %v4893_v28 = vcombine.high %v342_v30, %v346_v56 }
 0x283   :  { %3605 = vmatmul.mubr.bf16.gmra.mxu0 %v4826_v15 }
 0x284   :  { %3614 = vmatprep.mubr.bf16.mxu0 %v4835_v62 }
 0x287   :  { %3738 = vmatmul.mubr.bf16.gmra.mxu1 %v4828_v61 }
 0x288   :  { %4896 = vmatprep.mubr.msk.bf16.mxu1 %vm3265_vm1, %v4837_v1 }
 0x28b   :  { %3615 = vmatmul.mubr.bf16.gmra.mxu0 %v4834_v12 }
 0x28c   :  { %3624 = vmatprep.mubr.bf16.mxu0 %v4843_v58 }
 0x28f   :  { %3748 = vmatmul.mubr.bf16.gmra.mxu1 %v4836_v40 }
 0x290   :  { %4897 = vmatprep.mubr.msk.bf16.mxu1 %vm3265_vm1, %v4845_v0 }
 0x293   :  { %3625 = vmatmul.mubr.bf16.gmra.mxu0 %v4842_v53 }
 0x294   :  { %3634 = vmatprep.mubr.bf16.mxu0 %v4851_v25 }
 0x297   :  { %3758 = vmatmul.mubr.bf16.gmra.mxu1 %v4844_v44 }
 0x298   :  { %4898 = vmatprep.mubr.msk.bf16.mxu1 %vm3265_vm1, %v4853_v17 }
 0x29b   :  { %3635 = vmatmul.mubr.bf16.gmra.mxu0 %v4850_v55 }
 0x29c   :  { %3644 = vmatprep.mubr.bf16.mxu0 %v4859_v52 }
 0x29f   :  { %3768 = vmatmul.mubr.bf16.gmra.mxu1 %v4852_v37 }
 0x2a0   :  { %4899 = vmatprep.mubr.msk.bf16.mxu1 %vm3265_vm1, %v4861_v9 }
 0x2a3   :  { %3645 = vmatmul.mubr.bf16.gmra.mxu0 %v4858_v16 }
 0x2a4   :  { %3654 = vmatprep.mubr.bf16.mxu0 %v4867_v27 }
 0x2a7   :  { %3778 = vmatmul.mubr.bf16.gmra.mxu1 %v4860_v49 }
 0x2a8   :  { %4900 = vmatprep.mubr.msk.bf16.mxu1 %vm3265_vm1, %v4869_v32 }
 0x2ab   :  { %3655 = vmatmul.mubr.bf16.gmra.mxu0 %v4866_v18 }
 0x2ac   :  { %3664 = vmatprep.mubr.bf16.mxu0 %v4875_v36 }
 0x2af   :  { %3788 = vmatmul.mubr.bf16.gmra.mxu1 %v4868_v13 }
 0x2b0   :  { %4901 = vmatprep.mubr.msk.bf16.mxu1 %vm3265_vm1, %v4877_v10 }
 0x2b3   :  { %3665 = vmatmul.mubr.bf16.gmra.mxu0 %v4874_v50 }
 0x2b4   :  { %3674 = vmatprep.mubr.bf16.mxu0 %v4883_v21 }
 0x2b7   :  { %3798 = vmatmul.mubr.bf16.gmra.mxu1 %v4876_v57 }
 0x2b8   :  { %4902 = vmatprep.mubr.msk.bf16.mxu1 %vm3265_vm1, %v4885_v7 }
 0x2bb   :  { %3675 = vmatmul.mubr.bf16.gmra.mxu0 %v4882_v11 }
 0x2bc   :  { %3684 = vmatprep.mubr.bf16.mxu0 %v4891_v20 }
 0x2bf   :  { %3808 = vmatmul.mubr.bf16.gmra.mxu1 %v4884_v2 }
 0x2c0   :  { %4903 = vmatprep.mubr.msk.bf16.mxu1 %vm3265_vm1, %v4893_v28 }
 0x2c3   :  { %3685 = vmatmul.mubr.bf16.gmra.mxu0 %v4890_v6 }
 0x2c7   :  { %3818 = vmatmul.mubr.bf16.gmra.mxu1 %v4892_v33 }
 0x2cb   :  { %v3330_v15 = vpop.f32.mrf.mxu0 }
 0x2cd   :  { %v3332_v62 = vpop.f32.mrf.mxu0 }
 0x2cf   :  { %v3463_v45 = vpop.f32.mrf.mxu1  ;;  %v3334_v24 = vpop.f32.mrf.mxu0 }
 0x2d0   :  { %v8354_v61 = vadd.f32 %v3463_v45, %v3330_v15 }
 0x2d1   :  { %v3465_v1 = vpop.f32.mrf.mxu1  ;;  %v3336_v48 = vpop.f32.mrf.mxu0 }
 0x2d2   :  { %v8356_v46 = vadd.f32 %v3465_v1, %v3332_v62 }
 0x2d3   :  { %v3467_v12 = vpop.f32.mrf.mxu1  ;;  %v3340_v58 = vpop.f32.mrf.mxu0 }
 0x2d4   :  { %v8358_v34 = vadd.f32 %v3467_v12, %v3334_v24 }
 0x2d5   :  { %v3469_v19 = vpop.f32.mrf.mxu1  ;;  %v3342_v40 = vpop.f32.mrf.mxu0 }
 0x2d6   :  { %v8360_v0 = vadd.f32 %v3469_v19, %v3336_v48 }
 0x2d7   :  { %v3473_v47 = vpop.f32.mrf.mxu1  ;;  %v3344_v8 = vpop.f32.mrf.mxu0 }
 0x2d8   :  { %v8362_v53 = vadd.f32 %v3473_v47, %v3340_v58 }
 0x2d9   :  { %v3475_v25 = vpop.f32.mrf.mxu1  ;;  %v3346_v4 = vpop.f32.mrf.mxu0 }
 0x2da   :  { %v8364_v41 = vadd.f32 %v3475_v25, %v3342_v40 }
 0x2db   :  { %v3477_v44 = vpop.f32.mrf.mxu1  ;;  %v3350_v17 = vpop.f32.mrf.mxu0 }
 0x2dc   :  { %v8366_v54 = vadd.f32 %v3477_v44, %v3344_v8 }
 0x2dd   :  { %v3479_v31 = vpop.f32.mrf.mxu1  ;;  %v3352_v55 = vpop.f32.mrf.mxu0 }
 0x2de   :  { %v8368_v52 = vadd.f32 %v3479_v31, %v3346_v4 }
 0x2df   :  { %v3483_v39 = vpop.f32.mrf.mxu1  ;;  %v3354_v35 = vpop.f32.mrf.mxu0 }
 0x2e0   :  { %v8370_v37 = vadd.f32 %v3483_v39, %v3350_v17 }
 0x2e1   :  { %v3485_v9 = vpop.f32.mrf.mxu1  ;;  %v3356_v26 = vpop.f32.mrf.mxu0 }
 0x2e2   :  { %v8372_v3 = vadd.f32 %v3485_v9, %v3352_v55 }
 0x2e3   :  { %v3487_v16 = vpop.f32.mrf.mxu1  ;;  %v3360_v27 = vpop.f32.mrf.mxu0 }
 0x2e4   :  { %v8374_v29 = vadd.f32 %v3487_v16, %v3354_v35 }
 0x2e5   :  { %v3489_v63 = vpop.f32.mrf.mxu1  ;;  %v3362_v49 = vpop.f32.mrf.mxu0 }
 0x2e6   :  { %v8376_v32 = vadd.f32 %v3489_v63, %v3356_v26 }
 0x2e7   :  { %v3493_v43 = vpop.f32.mrf.mxu1  ;;  %v3364_v22 = vpop.f32.mrf.mxu0 }
 0x2e8   :  { %v8378_v18 = vadd.f32 %v3493_v43, %v3360_v27 }
 0x2e9   :  { %v3495_v36 = vpop.f32.mrf.mxu1  ;;  %v3366_v23 = vpop.f32.mrf.mxu0 }
 0x2ea   :  { %v8380_v42 = vadd.f32 %v3495_v36, %v3362_v49 }
 0x2eb   :  { %v3497_v13 = vpop.f32.mrf.mxu1  ;;  %v3370_v10 = vpop.f32.mrf.mxu0 }
 0x2ec   :  { %v8382_v59 = vadd.f32 %v3497_v13, %v3364_v22 }
 0x2ed   :  { %v3499_v14 = vpop.f32.mrf.mxu1  ;;  %v3372_v50 = vpop.f32.mrf.mxu0 }
 0x2ee   :  { %v8384_v21 = vadd.f32 %v3499_v14, %v3366_v23 }
 0x2ef   :  { %v3503_v38 = vpop.f32.mrf.mxu1  ;;  %v3374_v51 = vpop.f32.mrf.mxu0 }
 0x2f0   :  { %v8386_v57 = vadd.f32 %v3503_v38, %v3370_v10 }
 0x2f1   :  { %v3505_v7 = vpop.f32.mrf.mxu1  ;;  %v3376_v60 = vpop.f32.mrf.mxu0 }
 0x2f2   :  { %v8388_v5 = vadd.f32 %v3505_v7, %v3372_v50 }
 0x2f3   :  { %v3507_v11 = vpop.f32.mrf.mxu1  ;;  %v3380_v20 = vpop.f32.mrf.mxu0 }
 0x2f4   :  { %v8390_v30 = vadd.f32 %v3507_v11, %v3374_v51 }
 0x2f5   :  { %v3509_v56 = vpop.f32.mrf.mxu1  ;;  %v3382_v2 = vpop.f32.mrf.mxu0 }
 0x2f6   :  { %v8392_v28 = vadd.f32 %v3509_v56, %v3376_v60 }
 0x2f7   :  { %v3513_v6 = vpop.f32.mrf.mxu1  ;;  %v3384_v33 = vpop.f32.mrf.mxu0 }
 0x2f8   :  { %v8394_v15 = vadd.f32 %v3513_v6, %v3380_v20 }
 0x2f9   :  { %v3515_v62 = vpop.f32.mrf.mxu1  ;;  %v3386_v45 = vpop.f32.mrf.mxu0 }
 0x2fa   :  { %v8396_v24 = vadd.f32 %v3515_v62, %v3382_v2 }
 0x2fb   :  { %v3517_v1 = vpop.f32.mrf.mxu1  ;;  %v3390_v48 = vpop.f32.mrf.mxu0 }
 0x2fc   :  { %v8398_v12 = vadd.f32 %v3517_v1, %v3384_v33 }
 0x2fd   :  { %v3519_v58 = vpop.f32.mrf.mxu1  ;;  %v3392_v19 = vpop.f32.mrf.mxu0 }
 0x2fe   :  { %v8400_v40 = vadd.f32 %v3519_v58, %v3386_v45 }
 0x2ff   :  { %v3523_v47 = vpop.f32.mrf.mxu1  ;;  %v3394_v8 = vpop.f32.mrf.mxu0 }
 0x300   :  { %v8402_v25 = vadd.f32 %v3523_v47, %v3390_v48 }
 0x301   :  { %v3525_v4 = vpop.f32.mrf.mxu1  ;;  %v3396_v44 = vpop.f32.mrf.mxu0 }
 0x302   :  { %v8404_v17 = vadd.f32 %v3525_v4, %v3392_v19 }
 0x303   :  { %v3527_v31 = vpop.f32.mrf.mxu1  ;;  %v3400_v55 = vpop.f32.mrf.mxu0 }
 0x304   :  { %v8406_v39 = vadd.f32 %v3527_v31, %v3394_v8 }
 0x305   :  { %v3529_v35 = vpop.f32.mrf.mxu1  ;;  %v3402_v9 = vpop.f32.mrf.mxu0 }
 0x306   :  { %v8408_v26 = vadd.f32 %v3529_v35, %v3396_v44 }
 0x307   :  { %v3533_v16 = vpop.f32.mrf.mxu1  ;;  %v3404_v27 = vpop.f32.mrf.mxu0 }
 0x308   :  { %v8410_v63 = vadd.f32 %v3533_v16, %v3400_v55 }
 0x309   :  { %v3535_v49 = vpop.f32.mrf.mxu1  ;;  %v3406_v43 = vpop.f32.mrf.mxu0 }
 0x30a   :  { %v8412_v22 = vadd.f32 %v3535_v49, %v3402_v9 }
 0x30b   :  { %v3537_v36 = vpop.f32.mrf.mxu1  ;;  %v3410_v23 = vpop.f32.mrf.mxu0 }
 0x30c   :  { %v8414_v13 = vadd.f32 %v3537_v36, %v3404_v27 }
 0x30d   :  { %v3539_v10 = vpop.f32.mrf.mxu1  ;;  %v3412_v14 = vpop.f32.mrf.mxu0 }
 0x30e   :  { %v8416_v50 = vadd.f32 %v3539_v10, %v3406_v43 }
 0x30f   :  { %v3543_v38 = vpop.f32.mrf.mxu1  ;;  %v3414_v51 = vpop.f32.mrf.mxu0 }
 0x310   :  { %v8418_v7 = vadd.f32 %v3543_v38, %v3410_v23 }
 0x311   :  { %v3545_v60 = vpop.f32.mrf.mxu1  ;;  %v3416_v11 = vpop.f32.mrf.mxu0 }
 0x312   :  { %v8420_v20 = vadd.f32 %v3545_v60, %v3412_v14 }
 0x313   :  { %v3547_v56 = vpop.f32.mrf.mxu1  ;;  %v3420_v2 = vpop.f32.mrf.mxu0 }
 0x314   :  { %v8422_v6 = vadd.f32 %v3547_v56, %v3414_v51 }
 0x315   :  { %v3549_v33 = vpop.f32.mrf.mxu1  ;;  %v3422_v62 = vpop.f32.mrf.mxu0 }
 0x316   :  { %v8424_v45 = vadd.f32 %v3549_v33, %v3416_v11 }
 0x317   :  { %v3553_v1 = vpop.f32.mrf.mxu1  ;;  %v3424_v48 = vpop.f32.mrf.mxu0 }
 0x318   :  { %v8426_v58 = vadd.f32 %v3553_v1, %v3420_v2 }
 0x319   :  { %v3555_v19 = vpop.f32.mrf.mxu1  ;;  %v3426_v4 = vpop.f32.mrf.mxu0 }
 0x31a   :  { %v8428_v47 = vadd.f32 %v3555_v19, %v3422_v62 }
 0x31b   :  { %v3557_v8 = vpop.f32.mrf.mxu1 }
 0x31c   :  { %v8430_v44 = vadd.f32 %v3557_v8, %v3424_v48 }
 0x31d   :  { %v3559_v31 = vpop.f32.mrf.mxu1 }
 0x31e   :  { %v8432_v55 = vadd.f32 %v3559_v31, %v3426_v4 }
 0x33b   :  { %v3596_v35 = vpop.f32.mrf.mxu0 }
 0x33c   :  { %v3597_v43 = vadd.f32 %v3596_v35, %v8354_v61 }
 0x33d   :  { %v3598_v9 = vpop.f32.mrf.mxu0 }
 0x33e   :  { %v3599_v49 = vadd.f32 %v3598_v9, %v8356_v46 }
 0x33f   :  { %v3600_v16 = vpop.f32.mrf.mxu0  ;;  %v3729_v27 = vpop.f32.mrf.mxu1 }
 0x340   :  { %v8436_v14 = vadd.f32 %v3729_v27, %v3597_v43  ;;  %v3601_v46 = vadd.f32 %v3600_v16, %v8358_v34 }
 0x341   :  { %v3602_v36 = vpop.f32.mrf.mxu0  ;;  %v3731_v23 = vpop.f32.mrf.mxu1 }
 0x342   :  { %v3732_v10 = vadd.f32 %v3731_v23, %v3599_v49  ;;  %v3603_v60 = vadd.f32 %v3602_v36, %v8360_v0 }
 0x343   :  { %v3606_v38 = vpop.f32.mrf.mxu0  ;;  %v3733_v51 = vpop.f32.mrf.mxu1 }
 0x344   :  { %3830 = vst.msk [vmem:[%s9199_s7 + $0x8] sm:$0xff] %vm3829_vm2, %v3732_v10  ;;  %v3869_v11 = vsel %vm3829_vm2, %v3732_v10, 0.0  ;;  %v8446_v62 = vadd.f32 %v3733_v51, %v3601_v46  ;;  %v3607_v34 = vadd.f32 %v3606_v38, %v8362_v53 }
 0x345   :  { %v3870_v61 = vadd.f32 %v3869_v11, %v8436_v14  ;;  %v3608_v56 = vpop.f32.mrf.mxu0  ;;  %v3735_v2 = vpop.f32.mrf.mxu1 }
 0x346   :  { %v3736_v33 = vadd.f32 %v3735_v2, %v3603_v60  ;;  %v3609_v0 = vadd.f32 %v3608_v56, %v8364_v41 }
 0x347   :  { %v3610_v1 = vpop.f32.mrf.mxu0  ;;  %v3739_v48 = vpop.f32.mrf.mxu1  ;;  %3871 = vadd.xlane.f32.xlu1 %v3870_v61 }
 0x348   :  { %3832 = vst.msk [vmem:[%s9199_s7 + $0x18] sm:$0xff] %vm3829_vm2, %v3736_v33  ;;  %v3873_v19 = vsel %vm3829_vm2, %v3736_v33, 0.0  ;;  %v8456_v9 = vadd.f32 %v3739_v48, %v3607_v34  ;;  %v3611_v53 = vadd.f32 %v3610_v1, %v8366_v54 }
 0x349   :  { %v3874_v8 = vadd.f32 %v3873_v19, %v8446_v62  ;;  %v3612_v4 = vpop.f32.mrf.mxu0  ;;  %v3741_v31 = vpop.f32.mrf.mxu1 }
 0x34a   :  { %v3742_v35 = vadd.f32 %v3741_v31, %v3609_v0  ;;  %v3613_v41 = vadd.f32 %v3612_v4, %v8368_v52 }
 0x34b   :  { %v3616_v16 = vpop.f32.mrf.mxu0  ;;  %v3743_v27 = vpop.f32.mrf.mxu1  ;;  %3875 = vadd.xlane.f32.xlu0 %v3874_v8 }
 0x34c   :  { %3834 = vst.msk [vmem:[%s9199_s7 + $0x28] sm:$0xff] %vm3829_vm2, %v3742_v35  ;;  %v3877_v49 = vsel %vm3829_vm2, %v3742_v35, 0.0  ;;  %v8466_v38 = vadd.f32 %v3743_v27, %v3611_v53  ;;  %v3617_v54 = vadd.f32 %v3616_v16, %v8370_v37 }
 0x34d   :  { %v3878_v43 = vadd.f32 %v3877_v49, %v8456_v9  ;;  %v3618_v36 = vpop.f32.mrf.mxu0  ;;  %v3745_v23 = vpop.f32.mrf.mxu1 }
 0x34e   :  { %v3746_v10 = vadd.f32 %v3745_v23, %v3613_v41  ;;  %v3619_v52 = vadd.f32 %v3618_v36, %v8372_v3 }
 0x34f   :  { %v3620_v51 = vpop.f32.mrf.mxu0  ;;  %v3749_v60 = vpop.f32.mrf.mxu1  ;;  %3879 = vadd.xlane.f32.xlu0 %v3878_v43 }
 0x350   :  { %3836 = vst.msk [vmem:[%s9199_s7 + $0x38] sm:$0xff] %vm3829_vm2, %v3746_v10  ;;  %v3881_v11 = vsel %vm3829_vm2, %v3746_v10, 0.0  ;;  %v8476_v33 = vadd.f32 %v3749_v60, %v3617_v54  ;;  %v3621_v37 = vadd.f32 %v3620_v51, %v8374_v29 }
 0x351   :  { %v3882_v46 = vadd.f32 %v3881_v11, %v8466_v38  ;;  %v3622_v61 = vpop.f32.mrf.mxu0  ;;  %v3751_v56 = vpop.f32.mrf.mxu1 }
 0x352   :  { %v3752_v2 = vadd.f32 %v3751_v56, %v3619_v52  ;;  %v3623_v3 = vadd.f32 %v3622_v61, %v8376_v32 }
 0x353   :  { %v3626_v1 = vpop.f32.mrf.mxu0  ;;  %v3753_v48 = vpop.f32.mrf.mxu1  ;;  %3883 = vadd.xlane.f32.xlu1 %v3882_v46 }
 0x354   :  { %3838 = vst.msk [vmem:[%s9199_s7 + $0x48] sm:$0xff] %vm3829_vm2, %v3752_v2  ;;  %v3885_v0 = vsel %vm3829_vm2, %v3752_v2, 0.0  ;;  %v8486_v31 = vadd.f32 %v3753_v48, %v3621_v37  ;;  %v3627_v29 = vadd.f32 %v3626_v1, %v8378_v18 }
 0x355   :  { %v3886_v19 = vadd.f32 %v3885_v0, %v8476_v33  ;;  %v3628_v34 = vpop.f32.mrf.mxu0  ;;  %v3755_v8 = vpop.f32.mrf.mxu1 }
 0x356   :  { %v3756_v4 = vadd.f32 %v3755_v8, %v3623_v3  ;;  %v3629_v32 = vadd.f32 %v3628_v34, %v8380_v42 }
 0x357   :  { %v3630_v35 = vpop.f32.mrf.mxu0  ;;  %v3759_v16 = vpop.f32.mrf.mxu1  ;;  %3887 = vadd.xlane.f32.xlu0 %v3886_v19 }
 0x358   :  { %3840 = vst.msk [vmem:[%s9199_s7 + $0x58] sm:$0xff] %vm3829_vm2, %v3756_v4  ;;  %v3889_v27 = vsel %vm3829_vm2, %v3756_v4, 0.0  ;;  %v8496_v36 = vadd.f32 %v3759_v16, %v3627_v29  ;;  %v3631_v18 = vadd.f32 %v3630_v35, %v8382_v59 }
 0x359   :  { %v3890_v41 = vadd.f32 %v3889_v27, %v8486_v31  ;;  %v3632_v49 = vpop.f32.mrf.mxu0  ;;  %v3761_v53 = vpop.f32.mrf.mxu1 }
 0x35a   :  { %v3762_v43 = vadd.f32 %v3761_v53, %v3629_v32  ;;  %v3633_v42 = vadd.f32 %v3632_v49, %v8384_v21 }
 0x35b   :  { %v3636_v23 = vpop.f32.mrf.mxu0  ;;  %v3763_v10 = vpop.f32.mrf.mxu1  ;;  %3891 = vadd.xlane.f32.xlu1 %v3890_v41 }
 0x35c   :  { %3842 = vst.msk [vmem:[%s9199_s7 + $0x68] sm:$0xff] %vm3829_vm2, %v3762_v43  ;;  %v3893_v51 = vsel %vm3829_vm2, %v3762_v43, 0.0  ;;  %v8506_v46 = vadd.f32 %v3763_v10, %v3631_v18  ;;  %v3637_v59 = vadd.f32 %v3636_v23, %v8386_v57 }
 0x35d   :  { %v3894_v60 = vadd.f32 %v3893_v51, %v8496_v36  ;;  %v3638_v52 = vpop.f32.mrf.mxu0  ;;  %v3765_v11 = vpop.f32.mrf.mxu1 }
 0x35e   :  { %v3766_v54 = vadd.f32 %v3765_v11, %v3633_v42  ;;  %v3639_v21 = vadd.f32 %v3638_v52, %v8388_v5 }
 0x35f   :  { %v3640_v61 = vpop.f32.mrf.mxu0  ;;  %v3769_v56 = vpop.f32.mrf.mxu1  ;;  %3895 = vadd.xlane.f32.xlu0 %v3894_v60 }
 0x360   :  { %3844 = vst.msk [vmem:[%s9199_s7 + $0x78] sm:$0xff] %vm3829_vm2, %v3766_v54  ;;  %v3897_v2 = vsel %vm3829_vm2, %v3766_v54, 0.0  ;;  %v8516_v37 = vadd.f32 %v3769_v56, %v3637_v59  ;;  %v3641_v57 = vadd.f32 %v3640_v61, %v8390_v30 }
 0x361   :  { %v3898_v1 = vadd.f32 %v3897_v2, %v8506_v46  ;;  %v3642_v48 = vpop.f32.mrf.mxu0  ;;  %v3771_v3 = vpop.f32.mrf.mxu1 }
 0x362   :  { %v3772_v0 = vadd.f32 %v3771_v3, %v3639_v21  ;;  %v3643_v5 = vadd.f32 %v3642_v48, %v8392_v28 }
 0x363   :  { %v3646_v19 = vpop.f32.mrf.mxu0  ;;  %v3773_v34 = vpop.f32.mrf.mxu1  ;;  %3899 = vadd.xlane.f32.xlu1 %v3898_v1 }
 0x364   :  { %3846 = vst.msk [vmem:[%s9199_s7 + $0x88] sm:$0xff] %vm3829_vm2, %v3772_v0  ;;  %v3901_v8 = vsel %vm3829_vm2, %v3772_v0, 0.0  ;;  %v8526_v27 = vadd.f32 %v3773_v34, %v3641_v57  ;;  %v3647_v30 = vadd.f32 %v3646_v19, %v8394_v15 }
 0x365   :  { %v3902_v4 = vadd.f32 %v3901_v8, %v8516_v37  ;;  %v3648_v35 = vpop.f32.mrf.mxu0  ;;  %v3775_v16 = vpop.f32.mrf.mxu1 }
 0x366   :  { %v3776_v32 = vadd.f32 %v3775_v16, %v3643_v5  ;;  %v3649_v28 = vadd.f32 %v3648_v35, %v8396_v24 }
 0x367   :  { %v3650_v29 = vpop.f32.mrf.mxu0  ;;  %v3779_v41 = vpop.f32.mrf.mxu1  ;;  %3903 = vadd.xlane.f32.xlu0 %v3902_v4 }
 0x368   :  { %3848 = vst.msk [vmem:[%s9199_s7 + $0x98] sm:$0xff] %vm3829_vm2, %v3776_v32  ;;  %v3905_v49 = vsel %vm3829_vm2, %v3776_v32, 0.0  ;;  %v8536_v42 = vadd.f32 %v3779_v41, %v3647_v30  ;;  %v3651_v15 = vadd.f32 %v3650_v29, %v8398_v12 }
 0x369   :  { %v3906_v53 = vadd.f32 %v3905_v49, %v8526_v27  ;;  %v3652_v43 = vpop.f32.mrf.mxu0  ;;  %v3781_v23 = vpop.f32.mrf.mxu1 }
 0x36a   :  { %v3782_v10 = vadd.f32 %v3781_v23, %v3649_v28  ;;  %v3653_v24 = vadd.f32 %v3652_v43, %v8400_v40 }
 0x36b   :  { %v3656_v51 = vpop.f32.mrf.mxu0  ;;  %v3783_v18 = vpop.f32.mrf.mxu1  ;;  %3907 = vadd.xlane.f32.xlu1 %v3906_v53 }
 0x36c   :  { %3850 = vst.msk [vmem:[%s9199_s7 + $0xa8] sm:$0xff] %vm3829_vm2, %v3782_v10  ;;  %v3909_v60 = vsel %vm3829_vm2, %v3782_v10, 0.0  ;;  %v8546_v56 = vadd.f32 %v3783_v18, %v3651_v15  ;;  %v3657_v12 = vadd.f32 %v3656_v51, %v8402_v25 }
 0x36d   :  { %v3910_v52 = vadd.f32 %v3909_v60, %v8536_v42  ;;  %v3658_v11 = vpop.f32.mrf.mxu0  ;;  %v3785_v54 = vpop.f32.mrf.mxu1 }
 0x36e   :  { %v3786_v61 = vadd.f32 %v3785_v54, %v3653_v24  ;;  %v3659_v40 = vadd.f32 %v3658_v11, %v8404_v17 }
 0x36f   :  { %v3660_v21 = vpop.f32.mrf.mxu0  ;;  %v3789_v2 = vpop.f32.mrf.mxu1  ;;  %3911 = vadd.xlane.f32.xlu0 %v3910_v52 }
 0x370   :  { %3852 = vst.msk [vmem:[%s9199_s7 + $0xb8] sm:$0xff] %vm3829_vm2, %v3786_v61  ;;  %v3913_v59 = vsel %vm3829_vm2, %v3786_v61, 0.0  ;;  %v8556_v19 = vadd.f32 %v3789_v2, %v3657_v12  ;;  %v3661_v25 = vadd.f32 %v3660_v21, %v8406_v39 }
 0x371   :  { %v3914_v1 = vadd.f32 %v3913_v59, %v8546_v56  ;;  %v3662_v48 = vpop.f32.mrf.mxu0  ;;  %v3791_v3 = vpop.f32.mrf.mxu1 }
 0x372   :  { %v3792_v0 = vadd.f32 %v3791_v3, %v3659_v40  ;;  %v3663_v17 = vadd.f32 %v3662_v48, %v8408_v26 }
 0x373   :  { %v3666_v34 = vpop.f32.mrf.mxu0  ;;  %v3793_v5 = vpop.f32.mrf.mxu1  ;;  %3915 = vadd.xlane.f32.xlu1 %v3914_v1 }
 0x374   :  { %3854 = vst.msk [vmem:[%s9199_s7 + $0xc8] sm:$0xff] %vm3829_vm2, %v3792_v0  ;;  %v3917_v8 = vsel %vm3829_vm2, %v3792_v0, 0.0  ;;  %v8566_v32 = vadd.f32 %v3793_v5, %v3661_v25  ;;  %v3667_v39 = vadd.f32 %v3666_v34, %v8410_v63 }
 0x375   :  { %v3918_v57 = vadd.f32 %v3917_v8, %v8556_v19  ;;  %v3668_v4 = vpop.f32.mrf.mxu0  ;;  %v3795_v35 = vpop.f32.mrf.mxu1 }
 0x376   :  { %v3796_v16 = vadd.f32 %v3795_v35, %v3663_v17  ;;  %9222 = vst [vmem:[#allocation2_spill] sm:$0xff] %v8566_v32  ;;  %v3669_v26 = vadd.f32 %v3668_v4, %v8412_v22 }
 0x377   :  { %v3670_v29 = vpop.f32.mrf.mxu0  ;;  %v3799_v41 = vpop.f32.mrf.mxu1  ;;  %3919 = vadd.xlane.f32.xlu0 %v3918_v57 }
 0x378   :  { %3856 = vst.msk [vmem:[%s9199_s7 + $0xd8] sm:$0xff] %vm3829_vm2, %v3796_v16  ;;  %v3921_v28 = vsel %vm3829_vm2, %v3796_v16, 0.0  ;;  %v8576_v23 = vadd.f32 %v3799_v41, %v3667_v39  ;;  %v3671_v63 = vadd.f32 %v3670_v29, %v8414_v13 }
 0x379   :  { %v3922_v49 = vadd.f32 %v3921_v28, %v8566_v32  ;;  %v3672_v30 = vpop.f32.mrf.mxu0  ;;  %v3801_v53 = vpop.f32.mrf.mxu1 }
 0x37a   :  { %v3802_v43 = vadd.f32 %v3801_v53, %v3669_v26  ;;  %9223 = vst [vmem:[#allocation3_spill] sm:$0xff] %v8576_v23  ;;  %v3673_v22 = vadd.f32 %v3672_v30, %v8416_v50 }
 0x37b   :  { %v3676_v10 = vpop.f32.mrf.mxu0  ;;  %v3803_v51 = vpop.f32.mrf.mxu1  ;;  %3923 = vadd.xlane.f32.xlu1 %v3922_v49 }
 0x37c   :  { %3858 = vst.msk [vmem:[%s9199_s7 + $0xe8] sm:$0xff] %vm3829_vm2, %v3802_v43  ;;  %v3925_v18 = vsel %vm3829_vm2, %v3802_v43, 0.0  ;;  %v8586_v11 = vadd.f32 %v3803_v51, %v3671_v63  ;;  %v3677_v13 = vadd.f32 %v3676_v10, %v8418_v7 }
 0x37d   :  { %v3926_v24 = vadd.f32 %v3925_v18, %v8576_v23  ;;  %v3678_v60 = vpop.f32.mrf.mxu0  ;;  %v3805_v15 = vpop.f32.mrf.mxu1 }
 0x37e   :  { %v3806_v52 = vadd.f32 %v3805_v15, %v3673_v22  ;;  %9224 = vst [vmem:[#allocation4_spill] sm:$0xff] %v8586_v11  ;;  %v3679_v50 = vadd.f32 %v3678_v60, %v8420_v20 }
 0x37f   :  { %v3680_v54 = vpop.f32.mrf.mxu0  ;;  %v3809_v61 = vpop.f32.mrf.mxu1  ;;  %3927 = vadd.xlane.f32.xlu0 %v3926_v24 }
 0x380   :  { %3860 = vst.msk [vmem:[%s9199_s7 + $0xf8] sm:$0xff] %vm3829_vm2, %v3806_v52  ;;  %v3929_v21 = vsel %vm3829_vm2, %v3806_v52, 0.0  ;;  %v8596_v1 = vadd.f32 %v3809_v61, %v3677_v13  ;;  %v3681_v7 = vadd.f32 %v3680_v54, %v8422_v6  ;;  %v8650_v61 = vld [vmem:[%s9199_s7 + $0x18] sm:$0xff] }
 0x381   :  { %v3930_v2 = vadd.f32 %v3929_v21, %v8586_v11  ;;  %v3682_v40 = vpop.f32.mrf.mxu0  ;;  %v3811_v59 = vpop.f32.mrf.mxu1 }
 0x382   :  { %v3812_v12 = vadd.f32 %v3811_v59, %v3679_v50  ;;  %9225 = vst [vmem:[#allocation5_spill] sm:$0xff] %v8596_v1  ;;  %v3683_v20 = vadd.f32 %v3682_v40, %v8424_v45 }
 0x383   :  { %v3686_v48 = vpop.f32.mrf.mxu0  ;;  %v3813_v3 = vpop.f32.mrf.mxu1  ;;  %3931 = vadd.xlane.f32.xlu1 %v3930_v2 }
 0x384   :  { %3862 = vst.msk [vmem:[%s9199_s7 + $0x108] sm:$0xff] %vm3829_vm2, %v3812_v12  ;;  %v3933_v0 = vsel %vm3829_vm2, %v3812_v12, 0.0  ;;  %v8606_v25 = vadd.f32 %v3813_v3, %v3681_v7  ;;  %v3687_v6 = vadd.f32 %v3686_v48, %v8426_v58  ;;  %v8662_v3 = vld [vmem:[%s9199_s7 + $0x28] sm:$0xff] }
 0x385   :  { %v3934_v34 = vadd.f32 %v3933_v0, %v8596_v1  ;;  %v3688_v5 = vpop.f32.mrf.mxu0  ;;  %v3815_v17 = vpop.f32.mrf.mxu1 }
 0x386   :  { %v3816_v8 = vadd.f32 %v3815_v17, %v3683_v20  ;;  %9226 = vst [vmem:[#allocation6_spill] sm:$0xff] %v8606_v25  ;;  %v3689_v45 = vadd.f32 %v3688_v5, %v8428_v47 }
 0x387   :  { %v3690_v57 = vpop.f32.mrf.mxu0  ;;  %v3819_v4 = vpop.f32.mrf.mxu1  ;;  %3935 = vadd.xlane.f32.xlu0 %v3934_v34 }
 0x388   :  { %3864 = vst.msk [vmem:[%s9199_s7 + $0x118] sm:$0xff] %vm3829_vm2, %v3816_v8  ;;  %v3937_v35 = vsel %vm3829_vm2, %v3816_v8, 0.0  ;;  %v8616_v28 = vadd.f32 %v3819_v4, %v3687_v6  ;;  %v3691_v58 = vadd.f32 %v3690_v57, %v8430_v44  ;;  %v8639_v44 = vld [vmem:[%s9199_s7 + $0x8] sm:$0xff]  ;;  %v8674_v4 = vld [vmem:[%s9199_s7 + $0x38] sm:$0xff] }
 0x389   :  { %v3938_v16 = vadd.f32 %v3937_v35, %v8606_v25  ;;  %v3692_v29 = vpop.f32.mrf.mxu0  ;;  %v3821_v41 = vpop.f32.mrf.mxu1 }
 0x38a   :  { %v3822_v26 = vadd.f32 %v3821_v41, %v3689_v45  ;;  %9227 = vst [vmem:[#allocation7_spill] sm:$0xff] %v8616_v28  ;;  %v3693_v47 = vadd.f32 %v3692_v29, %v8432_v55 }
 0x38b   :  { %v3823_v39 = vpop.f32.mrf.mxu1  ;;  %3939 = vadd.xlane.f32.xlu1 %v3938_v16 }
 0x38c   :  { %3866 = vst.msk [vmem:[%s9199_s7 + $0x128] sm:$0xff] %vm3829_vm2, %v3822_v26  ;;  %v3941_v49 = vsel %vm3829_vm2, %v3822_v26, 0.0  ;;  %v8626_v10 = vadd.f32 %v3823_v39, %v3691_v58 }
 0x38d   :  { %v3942_v30 = vadd.f32 %v3941_v49, %v8616_v28  ;;  %v3825_v53 = vpop.f32.mrf.mxu1 }
 0x38e   :  { %v3826_v43 = vadd.f32 %v3825_v53, %v3693_v47  ;;  %9228 = vst [vmem:[#allocation8_spill] sm:$0xff] %v8626_v10  ;;  %v8686_v47 = vld [vmem:[%s9199_s7 + $0x48] sm:$0xff] }
 0x38f   :  { %3943 = vadd.xlane.f32.xlu0 %v3942_v30 }
 0x390   :  { %3868 = vst.msk [vmem:[%s9199_s7 + $0x138] sm:$0xff] %vm3829_vm2, %v3826_v43  ;;  %v3945_v55 = vsel %vm3829_vm2, %v3826_v43, 0.0 }
 0x391   :  { %v3946_v51 = vadd.f32 %v3945_v55, %v8626_v10 }
 0x393   :  { %3947 = vadd.xlane.f32.xlu1 %v3946_v51 }
 0x3d0   :  { %v3872_v22 = vpop.xlane.xlu1 %3871 }
 0x3d1   :  { %v8634_v18 = vmul.f32 0.0051020407, %v3872_v22 }
 0x3d3   :  { %v4029_v63 = vsub.f32 %v8436_v14, %v8634_v18  ;;  %v4030_v24 = vsub.f32 %v8639_v44, %v8634_v18 }
 0x3d4   :  { %v3876_v60 = vpop.xlane.xlu0 %3875 }
 0x3d5   :  { %v4069_v15 = vmul.f32 %v4029_v63, %v4029_v63  ;;  %v4070_v52 = vmul.f32 %v4030_v24, %v4030_v24  ;;  %v8645_v54 = vmul.f32 0.0051020407, %v3876_v60  ;;  %v8698_v63 = vld [vmem:[%s9199_s7 + $0x58] sm:$0xff] }
 0x3d7   :  { %v4031_v50 = vsub.f32 %v8446_v62, %v8645_v54  ;;  %v4032_v21 = vsub.f32 %v8650_v61, %v8645_v54  ;;  %v4109_v13 = vsel %vm3829_vm2, %v4070_v52, 0.0 }
 0x3d8   :  { %v3880_v2 = vpop.xlane.xlu0 %3879  ;;  %v4110_v40 = vadd.f32 %v4109_v13, %v4069_v15 }
 0x3d9   :  { %v4071_v59 = vmul.f32 %v4031_v50, %v4031_v50  ;;  %v4072_v12 = vmul.f32 %v4032_v21, %v4032_v21  ;;  %v8657_v48 = vmul.f32 0.0051020407, %v3880_v2 }
 0x3da   :  { %4111 = vadd.xlane.f32.xlu0 %v4110_v40  ;;  %v8710_v40 = vld [vmem:[%s9199_s7 + $0x68] sm:$0xff] }
 0x3db   :  { %v4033_v20 = vsub.f32 %v8456_v9, %v8657_v48  ;;  %v4034_v0 = vsub.f32 %v8662_v3, %v8657_v48  ;;  %v4113_v7 = vsel %vm3829_vm2, %v4072_v12, 0.0 }
 0x3dc   :  { %v3884_v34 = vpop.xlane.xlu1 %3883  ;;  %v4114_v5 = vadd.f32 %v4113_v7, %v4071_v59 }
 0x3dd   :  { %v4073_v17 = vmul.f32 %v4033_v20, %v4033_v20  ;;  %v4074_v8 = vmul.f32 %v4034_v0, %v4034_v0  ;;  %v8669_v57 = vmul.f32 0.0051020407, %v3884_v34 }
 0x3de   :  { %4115 = vadd.xlane.f32.xlu1 %v4114_v5 }
 0x3df   :  { %v4035_v45 = vsub.f32 %v8466_v38, %v8669_v57  ;;  %v4036_v35 = vsub.f32 %v8674_v4, %v8669_v57  ;;  %v4117_v6 = vsel %vm3829_vm2, %v4074_v8, 0.0  ;;  %v8722_v8 = vld [vmem:[%s9199_s7 + $0x78] sm:$0xff] }
 0x3e0   :  { %v3888_v16 = vpop.xlane.xlu0 %3887  ;;  %v4118_v29 = vadd.f32 %v4117_v6, %v4073_v17 }
 0x3e1   :  { %v4075_v41 = vmul.f32 %v4035_v45, %v4035_v45  ;;  %v4076_v26 = vmul.f32 %v4036_v35, %v4036_v35  ;;  %v8681_v39 = vmul.f32 0.0051020407, %v3888_v16 }
 0x3e2   :  { %4119 = vadd.xlane.f32.xlu0 %v4118_v29 }
 0x3e3   :  { %v4037_v49 = vsub.f32 %v8476_v33, %v8681_v39  ;;  %v4038_v58 = vsub.f32 %v8686_v47, %v8681_v39  ;;  %v4121_v30 = vsel %vm3829_vm2, %v4076_v26, 0.0 }
 0x3e4   :  { %v3892_v53 = vpop.xlane.xlu1 %3891  ;;  %v4122_v43 = vadd.f32 %v4121_v30, %v4075_v41 }
 0x3e5   :  { %v4077_v55 = vmul.f32 %v4037_v49, %v4037_v49  ;;  %v4078_v51 = vmul.f32 %v4038_v58, %v4038_v58  ;;  %v8693_v22 = vmul.f32 0.0051020407, %v3892_v53  ;;  %v8734_v58 = vld [vmem:[%s9199_s7 + $0x88] sm:$0xff] }
 0x3e6   :  { %4123 = vadd.xlane.f32.xlu1 %v4122_v43 }
 0x3e7   :  { %v4039_v24 = vsub.f32 %v8486_v31, %v8693_v22  ;;  %v4040_v60 = vsub.f32 %v8698_v63, %v8693_v22  ;;  %v4125_v15 = vsel %vm3829_vm2, %v4078_v51, 0.0 }
 0x3e8   :  { %v3896_v52 = vpop.xlane.xlu0 %3895  ;;  %v4126_v50 = vadd.f32 %v4125_v15, %v4077_v55 }
 0x3e9   :  { %v4079_v21 = vmul.f32 %v4039_v24, %v4039_v24  ;;  %v4080_v13 = vmul.f32 %v4040_v60, %v4040_v60  ;;  %v8705_v2 = vmul.f32 0.0051020407, %v3896_v52  ;;  %v8746_v52 = vld [vmem:[%s9199_s7 + $0x98] sm:$0xff] }
 0x3ea   :  { %4127 = vadd.xlane.f32.xlu0 %v4126_v50 }
 0x3eb   :  { %v4041_v59 = vsub.f32 %v8496_v36, %v8705_v2  ;;  %v4042_v12 = vsub.f32 %v8710_v40, %v8705_v2  ;;  %v4129_v20 = vsel %vm3829_vm2, %v4080_v13, 0.0 }
 0x3ec   :  { %v3900_v0 = vpop.xlane.xlu1 %3899  ;;  %v4130_v7 = vadd.f32 %v4129_v20, %v4079_v21 }
 0x3ed   :  { %v4081_v34 = vmul.f32 %v4041_v59, %v4041_v59  ;;  %v4082_v5 = vmul.f32 %v4042_v12, %v4042_v12  ;;  %v8717_v17 = vmul.f32 0.0051020407, %v3900_v0 }
 0x3ee   :  { %4131 = vadd.xlane.f32.xlu1 %v4130_v7 }
 0x3ef   :  { %v4043_v45 = vsub.f32 %v8506_v46, %v8717_v17  ;;  %v4044_v35 = vsub.f32 %v8722_v8, %v8717_v17  ;;  %v4133_v6 = vsel %vm3829_vm2, %v4082_v5, 0.0 }
 0x3f0   :  { %v3904_v16 = vpop.xlane.xlu0 %3903  ;;  %v4134_v29 = vadd.f32 %v4133_v6, %v4081_v34  ;;  %v8758_v34 = vld [vmem:[%s9199_s7 + $0xa8] sm:$0xff] }
 0x3f1   :  { %v4083_v41 = vmul.f32 %v4043_v45, %v4043_v45  ;;  %v4084_v26 = vmul.f32 %v4044_v35, %v4044_v35  ;;  %v8729_v49 = vmul.f32 0.0051020407, %v3904_v16 }
 0x3f2   :  { %4135 = vadd.xlane.f32.xlu0 %v4134_v29 }
 0x3f3   :  { %v4045_v30 = vsub.f32 %v8516_v37, %v8729_v49  ;;  %v4046_v53 = vsub.f32 %v8734_v58, %v8729_v49  ;;  %v4137_v43 = vsel %vm3829_vm2, %v4084_v26, 0.0 }
 0x3f4   :  { %v3908_v55 = vpop.xlane.xlu1 %3907  ;;  %v4138_v51 = vadd.f32 %v4137_v43, %v4083_v41 }
 0x3f5   :  { %v4085_v24 = vmul.f32 %v4045_v30, %v4045_v30  ;;  %v4086_v60 = vmul.f32 %v4046_v53, %v4046_v53  ;;  %v8741_v15 = vmul.f32 0.0051020407, %v3908_v55  ;;  %v8770_v30 = vld [vmem:[%s9199_s7 + $0xb8] sm:$0xff] }
 0x3f6   :  { %4139 = vadd.xlane.f32.xlu1 %v4138_v51 }
 0x3f7   :  { %v4047_v50 = vsub.f32 %v8526_v27, %v8741_v15  ;;  %v4048_v21 = vsub.f32 %v8746_v52, %v8741_v15  ;;  %v4141_v13 = vsel %vm3829_vm2, %v4086_v60, 0.0 }
 0x3f8   :  { %v3912_v59 = vpop.xlane.xlu0 %3911  ;;  %v4142_v12 = vadd.f32 %v4141_v13, %v4085_v24  ;;  %v8782_v13 = vld [vmem:[%s9199_s7 + $0xc8] sm:$0xff] }
 0x3f9   :  { %v4087_v20 = vmul.f32 %v4047_v50, %v4047_v50  ;;  %v4088_v0 = vmul.f32 %v4048_v21, %v4048_v21  ;;  %v8753_v7 = vmul.f32 0.0051020407, %v3912_v59  ;;  %9229 = vst [vmem:[#allocation9_spill] sm:$0xff] %v8782_v13 }
 0x3fa   :  { %4143 = vadd.xlane.f32.xlu0 %v4142_v12 }
 0x3fb   :  { %v4049_v5 = vsub.f32 %v8536_v42, %v8753_v7  ;;  %v4050_v45 = vsub.f32 %v8758_v34, %v8753_v7  ;;  %v4145_v35 = vsel %vm3829_vm2, %v4088_v0, 0.0 }
 0x3fc   :  { %v3916_v6 = vpop.xlane.xlu1 %3915  ;;  %v4146_v16 = vadd.f32 %v4145_v35, %v4087_v20 }
 0x3fd   :  { %v4089_v29 = vmul.f32 %v4049_v5, %v4049_v5  ;;  %v4090_v41 = vmul.f32 %v4050_v45, %v4050_v45  ;;  %v8765_v26 = vmul.f32 0.0051020407, %v3916_v6 }
 0x3fe   :  { %4147 = vadd.xlane.f32.xlu1 %v4146_v16  ;;  %v8794_v16 = vld [vmem:[%s9199_s7 + $0xd8] sm:$0xff] }
 0x3ff   :  { %v4051_v53 = vsub.f32 %v8546_v56, %v8765_v26  ;;  %v4052_v43 = vsub.f32 %v8770_v30, %v8765_v26  ;;  %v4149_v55 = vsel %vm3829_vm2, %v4090_v41, 0.0  ;;  %9230 = vst [vmem:[#allocation10_spill] sm:$0xff] %v8794_v16 }
 0x400   :  { %v3920_v51 = vpop.xlane.xlu0 %3919  ;;  %v4150_v24 = vadd.f32 %v4149_v55, %v4089_v29 }
 0x401   :  { %v4091_v60 = vmul.f32 %v4051_v53, %v4051_v53  ;;  %v4092_v50 = vmul.f32 %v4052_v43, %v4052_v43  ;;  %v8777_v21 = vmul.f32 0.0051020407, %v3920_v51 }
 0x402   :  { %4151 = vadd.xlane.f32.xlu0 %v4150_v24 }
 0x403   :  { %v4053_v59 = vsub.f32 %v8556_v19, %v8777_v21  ;;  %v4054_v12 = vsub.f32 %v8782_v13, %v8777_v21  ;;  %v4153_v20 = vsel %vm3829_vm2, %v4092_v50, 0.0  ;;  %v8806_v50 = vld [vmem:[%s9199_s7 + $0xe8] sm:$0xff] }
 0x404   :  { %v3924_v0 = vpop.xlane.xlu1 %3923  ;;  %v4154_v5 = vadd.f32 %v4153_v20, %v4091_v60  ;;  %9231 = vst [vmem:[#allocation11_spill] sm:$0xff] %v8806_v50 }
 0x405   :  { %v4093_v45 = vmul.f32 %v4053_v59, %v4053_v59  ;;  %v4094_v35 = vmul.f32 %v4054_v12, %v4054_v12  ;;  %v8789_v6 = vmul.f32 0.0051020407, %v3924_v0 }
 0x406   :  { %4155 = vadd.xlane.f32.xlu1 %v4154_v5 }
 0x407   :  { %v4055_v29 = vsub.f32 %v8566_v32, %v8789_v6  ;;  %v4056_v41 = vsub.f32 %v8794_v16, %v8789_v6  ;;  %v4157_v53 = vsel %vm3829_vm2, %v4094_v35, 0.0 }
 0x408   :  { %v3928_v43 = vpop.xlane.xlu0 %3927  ;;  %v4158_v55 = vadd.f32 %v4157_v53, %v4093_v45 }
 0x409   :  { %v4095_v51 = vmul.f32 %v4055_v29, %v4055_v29  ;;  %v4096_v24 = vmul.f32 %v4056_v41, %v4056_v41  ;;  %v8801_v60 = vmul.f32 0.0051020407, %v3928_v43  ;;  %v8818_v41 = vld [vmem:[%s9199_s7 + $0xf8] sm:$0xff] }
 0x40a   :  { %4159 = vadd.xlane.f32.xlu0 %v4158_v55  ;;  %9232 = vst [vmem:[#allocation12_spill] sm:$0xff] %v8818_v41 }
 0x40b   :  { %v4057_v59 = vsub.f32 %v8576_v23, %v8801_v60  ;;  %v4058_v12 = vsub.f32 %v8806_v50, %v8801_v60  ;;  %v4161_v20 = vsel %vm3829_vm2, %v4096_v24, 0.0 }
 0x40c   :  { %v3932_v0 = vpop.xlane.xlu1 %3931  ;;  %v4162_v5 = vadd.f32 %v4161_v20, %v4095_v51 }
 0x40d   :  { %v4097_v45 = vmul.f32 %v4057_v59, %v4057_v59  ;;  %v4098_v35 = vmul.f32 %v4058_v12, %v4058_v12  ;;  %v8813_v29 = vmul.f32 0.0051020407, %v3932_v0  ;;  %v8830_v0 = vld [vmem:[%s9199_s7 + $0x108] sm:$0xff] }
 0x40e   :  { %4163 = vadd.xlane.f32.xlu1 %v4162_v5  ;;  %9233 = vst [vmem:[#allocation13_spill] sm:$0xff] %v8830_v0 }
 0x40f   :  { %v4059_v53 = vsub.f32 %v8586_v11, %v8813_v29  ;;  %v4060_v43 = vsub.f32 %v8818_v41, %v8813_v29  ;;  %v4165_v55 = vsel %vm3829_vm2, %v4098_v35, 0.0 }
 0x410   :  { %v3936_v24 = vpop.xlane.xlu0 %3935  ;;  %v4166_v51 = vadd.f32 %v4165_v55, %v4097_v45 }
 0x411   :  { %v4099_v59 = vmul.f32 %v4059_v53, %v4059_v53  ;;  %v4100_v12 = vmul.f32 %v4060_v43, %v4060_v43  ;;  %v8825_v20 = vmul.f32 0.0051020407, %v3936_v24  ;;  %v8842_v24 = vld [vmem:[%s9199_s7 + $0x118] sm:$0xff] }
 0x412   :  { %4167 = vadd.xlane.f32.xlu0 %v4166_v51  ;;  %9234 = vst [vmem:[#allocation14_spill] sm:$0xff] %v8842_v24 }
 0x413   :  { %v4061_v5 = vsub.f32 %v8596_v1, %v8825_v20  ;;  %v4062_v41 = vsub.f32 %v8830_v0, %v8825_v20  ;;  %v4169_v35 = vsel %vm3829_vm2, %v4100_v12, 0.0 }
 0x414   :  { %v3940_v11 = vpop.xlane.xlu1 %3939  ;;  %v4170_v45 = vadd.f32 %v4169_v35, %v4099_v59  ;;  %v8854_v35 = vld [vmem:[%s9199_s7 + $0x128] sm:$0xff] }
 0x415   :  { %v4101_v53 = vmul.f32 %v4061_v5, %v4061_v5  ;;  %v4102_v43 = vmul.f32 %v4062_v41, %v4062_v41  ;;  %v8837_v55 = vmul.f32 0.0051020407, %v3940_v11  ;;  %9235 = vst [vmem:[#allocation15_spill] sm:$0xff] %v8854_v35 }
 0x416   :  { %4171 = vadd.xlane.f32.xlu1 %v4170_v45 }
 0x417   :  { %v4063_v51 = vsub.f32 %v8606_v25, %v8837_v55  ;;  %v4064_v0 = vsub.f32 %v8842_v24, %v8837_v55  ;;  %v4173_v12 = vsel %vm3829_vm2, %v4102_v43, 0.0 }
 0x418   :  { %v3944_v1 = vpop.xlane.xlu0 %3943  ;;  %v4174_v59 = vadd.f32 %v4173_v12, %v4101_v53  ;;  %v8866_v12 = vld [vmem:[%s9199_s7 + $0x138] sm:$0xff] }
 0x419   :  { %v4103_v5 = vmul.f32 %v4063_v51, %v4063_v51  ;;  %v4104_v41 = vmul.f32 %v4064_v0, %v4064_v0  ;;  %v8849_v11 = vmul.f32 0.0051020407, %v3944_v1  ;;  %9236 = vst [vmem:[#allocation16_spill] sm:$0xff] %v8866_v12 }
 0x41a   :  { %4175 = vadd.xlane.f32.xlu0 %v4174_v59 }
 0x41b   :  { %v4065_v45 = vsub.f32 %v8616_v28, %v8849_v11  ;;  %v4066_v24 = vsub.f32 %v8854_v35, %v8849_v11  ;;  %v4177_v43 = vsel %vm3829_vm2, %v4104_v41, 0.0 }
 0x41c   :  { %v3948_v25 = vpop.xlane.xlu1 %3947  ;;  %v4178_v53 = vadd.f32 %v4177_v43, %v4103_v5 }
 0x41d   :  { %v4105_v51 = vmul.f32 %v4065_v45, %v4065_v45  ;;  %v4106_v0 = vmul.f32 %v4066_v24, %v4066_v24  ;;  %v8861_v1 = vmul.f32 0.0051020407, %v3948_v25 }
 0x41e   :  { %4179 = vadd.xlane.f32.xlu1 %v4178_v53 }
 0x41f   :  { %v4067_v59 = vsub.f32 %v8626_v10, %v8861_v1  ;;  %v4068_v35 = vsub.f32 %v8866_v12, %v8861_v1  ;;  %v4181_v41 = vsel %vm3829_vm2, %v4106_v0, 0.0 }
 0x420   :  { %v4182_v28 = vadd.f32 %v4181_v41, %v4105_v51 }
 0x421   :  { %v4107_v5 = vmul.f32 %v4067_v59, %v4067_v59  ;;  %v4108_v45 = vmul.f32 %v4068_v35, %v4068_v35  ;;  %v4269_v59 = vld [vmem:[%s9200_s5] sm:$0xff] }
 0x422   :  { %4183 = vadd.xlane.f32.xlu0 %v4182_v28 }
 0x423   :  { %v4185_v25 = vsel %vm3829_vm2, %v4108_v45, 0.0 }
 0x424   :  { %v4186_v24 = vadd.f32 %v4185_v25, %v4107_v5 }
 0x426   :  { %4187 = vadd.xlane.f32.xlu1 %v4186_v24 }
 0x463   :  { %v4112_v43 = vpop.xlane.xlu0 %4111 }
 0x464   :  { %v4209_v50 = vmul.f32 0.0051020407, %v4112_v43  ;;  %v4310_v43 = vld [vmem:[%s9201_s6 + $0x8] sm:$0xff] }
 0x466   :  { %v4229_v23 = vadd.f32 0.001, %v4209_v50 }
 0x467   :  { %v4116_v53 = vpop.xlane.xlu1 %4115 }
 0x468   :  { %5387 = vrsqrt.f32 %v4229_v23  ;;  %v4210_v16 = vmul.f32 0.0051020407, %v4116_v53  ;;  %v4309_v53 = vld [vmem:[%s9201_s6] sm:$0xff] }
 0x46a   :  { %v4230_v10 = vadd.f32 0.001, %v4210_v16 }
 0x46b   :  { %v4120_v32 = vpop.xlane.xlu0 %4119 }
 0x46c   :  { %5389 = vrsqrt.f32 %v4230_v10  ;;  %v4211_v12 = vmul.f32 0.0051020407, %v4120_v32  ;;  %v4270_v32 = vld [vmem:[%s9200_s5 + $0x8] sm:$0xff] }
 0x46e   :  { %v4231_v13 = vadd.f32 0.001, %v4211_v12 }
 0x46f   :  { %v4124_v0 = vpop.xlane.xlu1 %4123 }
 0x470   :  { %5391 = vrsqrt.f32 %v4231_v13  ;;  %v4212_v51 = vmul.f32 0.0051020407, %v4124_v0  ;;  %v4271_v0 = vld [vmem:[%s9200_s5 + $0x10] sm:$0xff] }
 0x472   :  { %v4232_v35 = vadd.f32 0.001, %v4212_v51 }
 0x473   :  { %v4128_v28 = vpop.xlane.xlu0 %4127 }
 0x474   :  { %5393 = vrsqrt.f32 %v4232_v35  ;;  %v4213_v41 = vmul.f32 0.0051020407, %v4128_v28 }
 0x475   :  { %v5388_v50 = vpop.eup %5387 }
 0x476   :  { %v4233_v5 = vadd.f32 0.001, %v4213_v41  ;;  %v4289_v23 = vmul.f32 %v5388_v50, %v4269_v59 }
 0x477   :  { %v4132_v45 = vpop.xlane.xlu1 %4131 }
 0x478   :  { %5395 = vrsqrt.f32 %v4233_v5  ;;  %v4214_v10 = vmul.f32 0.0051020407, %v4132_v45  ;;  %4371 = vperm.xlu0 %4905, %v4289_v23   ;;  %v4329_v25 = vmul.f32 %v4289_v23, %v8634_v18  ;;  %v4272_v23 = vld [vmem:[%s9200_s5 + $0x18] sm:$0xff] }
 0x479   :  { %v5390_v13 = vpop.eup %5389 }
 0x47a   :  { %v4234_v16 = vadd.f32 0.001, %v4214_v10  ;;  %v4290_v12 = vmul.f32 %v5390_v13, %v4270_v32  ;;  %v4349_v41 = vsub.f32 %v4309_v53, %v4329_v25  ;;  %v4311_v25 = vld [vmem:[%s9201_s6 + $0x10] sm:$0xff] }
 0x47b   :  { %v4136_v24 = vpop.xlane.xlu0 %4135 }
 0x47c   :  { %5397 = vrsqrt.f32 %v4234_v16  ;;  %v4215_v51 = vmul.f32 0.0051020407, %v4136_v24  ;;  %4376 = vperm.xlu1 %4906, %v4290_v12   ;;  %v4330_v35 = vmul.f32 %v4290_v12, %v8645_v54  ;;  %v4312_v12 = vld [vmem:[%s9201_s6 + $0x18] sm:$0xff]  ;;  %v4273_v24 = vld [vmem:[%s9200_s5 + $0x20] sm:$0xff] }
 0x47d   :  { %v5392_v28 = vpop.eup %5391 }
 0x47e   :  { %v4235_v18 = vadd.f32 0.001, %v4215_v51  ;;  %v4350_v59 = vsub.f32 %v4310_v43, %v4330_v35  ;;  %v4291_v50 = vmul.f32 %v5392_v28, %v4271_v0 }
 0x47f   :  { %v4140_v5 = vpop.xlane.xlu1 %4139 }
 0x480   :  { %5399 = vrsqrt.f32 %v4235_v18  ;;  %v4216_v45 = vmul.f32 0.0051020407, %v4140_v5  ;;  %4516 = vperm.xlu0 %4905, %v4350_v59   ;;  %4511 = vperm.xlu1 %4906, %v4349_v41   ;;  %v4331_v16 = vmul.f32 %v4291_v50, %v8657_v48  ;;  %v4274_v59 = vld [vmem:[%s9200_s5 + $0x28] sm:$0xff] }
 0x481   :  { %v5394_v32 = vpop.eup %5393 }
 0x482   :  { %v4236_v10 = vadd.f32 0.001, %v4216_v45  ;;  %v4292_v13 = vmul.f32 %v5394_v32, %v4272_v23  ;;  %v4351_v35 = vsub.f32 %v4311_v25, %v4331_v16  ;;  %v4314_v32 = vld [vmem:[%s9201_s6 + $0x28] sm:$0xff] }
 0x483   :  { %v4144_v54 = vpop.xlane.xlu0 %4143 }
 0x484   :  { %5401 = vrsqrt.f32 %v4236_v10  ;;  %v4217_v43 = vmul.f32 0.0051020407, %v4144_v54  ;;  %4386 = vperm.xlu0 %4905, %v4292_v13   ;;  %4381 = vperm.xlu1 %4906, %v4291_v50   ;;  %v4332_v53 = vmul.f32 %v4292_v13, %v8669_v57  ;;  %v4313_v10 = vld [vmem:[%s9201_s6 + $0x20] sm:$0xff]  ;;  %v4275_v13 = vld [vmem:[%s9200_s5 + $0x30] sm:$0xff] }
 0x485   :  { %v5396_v48 = vpop.eup %5395 }
 0x486   :  { %v4237_v0 = vadd.f32 0.001, %v4217_v43  ;;  %v4352_v51 = vsub.f32 %v4312_v12, %v4332_v53  ;;  %v4293_v28 = vmul.f32 %v5396_v48, %v4273_v24  ;;  %v4276_v48 = vld [vmem:[%s9200_s5 + $0x38] sm:$0xff] }
 0x487   :  { %v4148_v18 = vpop.xlane.xlu1 %4147 }
 0x488   :  { %5403 = vrsqrt.f32 %v4237_v0  ;;  %v4218_v41 = vmul.f32 0.0051020407, %v4148_v18  ;;  %4526 = vperm.xlu0 %4905, %v4352_v51   ;;  %4521 = vperm.xlu1 %4906, %v4351_v35   ;;  %v4333_v50 = vmul.f32 %v4293_v28, %v8681_v39 }
 0x489   :  { %v5398_v5 = vpop.eup %5397 }
 0x48a   :  { %v4238_v23 = vadd.f32 0.001, %v4218_v41  ;;  %v4294_v45 = vmul.f32 %v5398_v5, %v4274_v59  ;;  %v4353_v24 = vsub.f32 %v4313_v10, %v4333_v50  ;;  %v4316_v59 = vld [vmem:[%s9201_s6 + $0x38] sm:$0xff]  ;;  %v4315_v41 = vld [vmem:[%s9201_s6 + $0x30] sm:$0xff]  ;;  %v4277_v5 = vld [vmem:[%s9200_s5 + $0x40] sm:$0xff] }
 0x48b   :  { %v4152_v57 = vpop.xlane.xlu0 %4151 }
 0x48c   :  { %5405 = vrsqrt.f32 %v4238_v23  ;;  %v4219_v16 = vmul.f32 0.0051020407, %v4152_v57  ;;  %4396 = vperm.xlu0 %4905, %v4294_v45   ;;  %4391 = vperm.xlu1 %4906, %v4293_v28   ;;  %v4334_v54 = vmul.f32 %v4294_v45, %v8693_v22 }
 0x48d   :  { %v5400_v39 = vpop.eup %5399 }
 0x48e   :  { %v4239_v12 = vadd.f32 0.001, %v4219_v16  ;;  %v4354_v25 = vsub.f32 %v4314_v32, %v4334_v54  ;;  %v4295_v43 = vmul.f32 %v5400_v39, %v4275_v13  ;;  %v4278_v16 = vld [vmem:[%s9200_s5 + $0x48] sm:$0xff] }
 0x48f   :  { %v4156_v53 = vpop.xlane.xlu1 %4155 }
 0x490   :  { %5407 = vrsqrt.f32 %v4239_v12  ;;  %v4220_v0 = vmul.f32 0.0051020407, %v4156_v53  ;;  %4536 = vperm.xlu0 %4905, %v4354_v25   ;;  %4531 = vperm.xlu1 %4906, %v4353_v24   ;;  %v4335_v28 = vmul.f32 %v4295_v43, %v8705_v2  ;;  %v4317_v53 = vld [vmem:[%s9201_s6 + $0x40] sm:$0xff] }
 0x491   :  { %v5402_v51 = vpop.eup %5401 }
 0x492   :  { %v4240_v35 = vadd.f32 0.001, %v4220_v0  ;;  %v4296_v18 = vmul.f32 %v5402_v51, %v4276_v48  ;;  %v4355_v32 = vsub.f32 %v4315_v41, %v4335_v28  ;;  %v4279_v48 = vld [vmem:[%s9200_s5 + $0x50] sm:$0xff]  ;;  %v4280_v41 = vld [vmem:[%s9200_s5 + $0x58] sm:$0xff] }
 0x493   :  { %v4160_v22 = vpop.xlane.xlu0 %4159 }
 0x494   :  { %5409 = vrsqrt.f32 %v4240_v35  ;;  %v4221_v23 = vmul.f32 0.0051020407, %v4160_v22  ;;  %4406 = vperm.xlu0 %4905, %v4296_v18   ;;  %4401 = vperm.xlu1 %4906, %v4295_v43   ;;  %v4336_v45 = vmul.f32 %v4296_v18, %v8717_v17  ;;  %v4318_v43 = vld [vmem:[%s9201_s6 + $0x48] sm:$0xff] }
 0x495   :  { %v5404_v2 = vpop.eup %5403 }
 0x496   :  { %v4241_v50 = vadd.f32 0.001, %v4221_v23  ;;  %v4356_v57 = vsub.f32 %v4316_v59, %v4336_v45  ;;  %v4297_v10 = vmul.f32 %v5404_v2, %v4277_v5 }
 0x497   :  { %v4164_v13 = vpop.xlane.xlu1 %4163 }
 0x498   :  { %5411 = vrsqrt.f32 %v4241_v50  ;;  %v4222_v54 = vmul.f32 0.0051020407, %v4164_v13  ;;  %4546 = vperm.xlu0 %4905, %v4356_v57   ;;  %4541 = vperm.xlu1 %4906, %v4355_v32   ;;  %v4337_v24 = vmul.f32 %v4297_v10, %v8729_v49  ;;  %v4320_v57 = vld [vmem:[%s9201_s6 + $0x58] sm:$0xff]  ;;  %v4319_v32 = vld [vmem:[%s9201_s6 + $0x50] sm:$0xff] }
 0x499   :  { %v5406_v39 = vpop.eup %5405 }
 0x49a   :  { %v4242_v12 = vadd.f32 0.001, %v4222_v54  ;;  %v4298_v25 = vmul.f32 %v5406_v39, %v4278_v16  ;;  %v4357_v28 = vsub.f32 %v4317_v53, %v4337_v24 }
 0x49b   :  { %v4168_v17 = vpop.xlane.xlu0 %4167 }
 0x49c   :  { %5413 = vrsqrt.f32 %v4242_v12  ;;  %v4223_v0 = vmul.f32 0.0051020407, %v4168_v17  ;;  %4416 = vperm.xlu0 %4905, %v4298_v25   ;;  %4411 = vperm.xlu1 %4906, %v4297_v10   ;;  %v4338_v51 = vmul.f32 %v4298_v25, %v8741_v15  ;;  %v4281_v10 = vld [vmem:[%s9200_s5 + $0x60] sm:$0xff]  ;;  %v4282_v17 = vld [vmem:[%s9200_s5 + $0x68] sm:$0xff] }
 0x49d   :  { %v5408_v49 = vpop.eup %5407 }
 0x49e   :  { %v4243_v35 = vadd.f32 0.001, %v4223_v0  ;;  %v4358_v18 = vsub.f32 %v4318_v43, %v4338_v51  ;;  %v4299_v22 = vmul.f32 %v5408_v49, %v4279_v48  ;;  %v4322_v49 = vld [vmem:[%s9201_s6 + $0x68] sm:$0xff] }
 0x49f   :  { %v4172_v59 = vpop.xlane.xlu1 %4171 }
 0x4a0   :  { %5415 = vrsqrt.f32 %v4243_v35  ;;  %v4224_v5 = vmul.f32 0.0051020407, %v4172_v59  ;;  %4556 = vperm.xlu0 %4905, %v4358_v18   ;;  %4551 = vperm.xlu1 %4906, %v4357_v28   ;;  %v4339_v50 = vmul.f32 %v4299_v22, %v8753_v7  ;;  %v4321_v35 = vld [vmem:[%s9201_s6 + $0x60] sm:$0xff]  ;;  %v4283_v18 = vld [vmem:[%s9200_s5 + $0x70] sm:$0xff] }
 0x4a1   :  { %v5410_v23 = vpop.eup %5409 }
 0x4a2   :  { %v4244_v45 = vadd.f32 0.001, %v4224_v5  ;;  %v4300_v2 = vmul.f32 %v5410_v23, %v4280_v41  ;;  %v4359_v12 = vsub.f32 %v4319_v32, %v4339_v50 }
 0x4a3   :  { %v4176_v15 = vpop.xlane.xlu0 %4175 }
 0x4a4   :  { %5417 = vrsqrt.f32 %v4244_v45  ;;  %v4225_v13 = vmul.f32 0.0051020407, %v4176_v15  ;;  %4426 = vperm.xlu0 %4905, %v4300_v2   ;;  %4421 = vperm.xlu1 %4906, %v4299_v22   ;;  %v4340_v16 = vmul.f32 %v4300_v2, %v8765_v26  ;;  %v4284_v2 = vld [vmem:[%s9200_s5 + $0x78] sm:$0xff] }
 0x4a5   :  { %v5412_v7 = vpop.eup %5411 }
 0x4a6   :  { %v4245_v54 = vadd.f32 0.001, %v4225_v13  ;;  %v4360_v39 = vsub.f32 %v4320_v57, %v4340_v16  ;;  %v4301_v25 = vmul.f32 %v5412_v7, %v4281_v10  ;;  %v4323_v13 = vld [vmem:[%s9201_s6 + $0x70] sm:$0xff]  ;;  %v4285_v16 = vld [vmem:[%s9200_s5 + $0x80] sm:$0xff] }
 0x4a7   :  { %v4180_v24 = vpop.xlane.xlu1 %4179 }
 0x4a8   :  { %5419 = vrsqrt.f32 %v4245_v54  ;;  %v4226_v43 = vmul.f32 0.0051020407, %v4180_v24  ;;  %4566 = vperm.xlu0 %4905, %v4360_v39   ;;  %4561 = vperm.xlu1 %4906, %v4359_v12   ;;  %v4341_v51 = vmul.f32 %v4301_v25, %v8777_v21 }
 0x4a9   :  { %v5414_v53 = vpop.eup %5413 }
 0x4aa   :  { %v4246_v48 = vadd.f32 0.001, %v4226_v43  ;;  %v4302_v0 = vmul.f32 %v5414_v53, %v4282_v17  ;;  %v4361_v5 = vsub.f32 %v4321_v35, %v4341_v51  ;;  %v4326_v53 = vld [vmem:[%s9201_s6 + $0x88] sm:$0xff]  ;;  %v4288_v35 = vld [vmem:[%s9200_s5 + $0x98] sm:$0xff] }
 0x4ab   :  { %v4184_v26 = vpop.xlane.xlu0 %4183 }
 0x4ac   :  { %5421 = vrsqrt.f32 %v4246_v48  ;;  %v4227_v28 = vmul.f32 0.0051020407, %v4184_v26  ;;  %4436 = vperm.xlu0 %4905, %v4302_v0   ;;  %4431 = vperm.xlu1 %4906, %v4301_v25   ;;  %v4342_v22 = vmul.f32 %v4302_v0, %v8789_v6  ;;  %v4324_v6 = vld [vmem:[%s9201_s6 + $0x78] sm:$0xff]  ;;  %v4286_v25 = vld [vmem:[%s9200_s5 + $0x88] sm:$0xff]  ;;  %v4287_v48 = vld [vmem:[%s9200_s5 + $0x90] sm:$0xff] }
 0x4ad   :  { %v5416_v21 = vpop.eup %5415 }
 0x4ae   :  { %v4247_v59 = vadd.f32 0.001, %v4227_v28  ;;  %v4362_v41 = vsub.f32 %v4322_v49, %v4342_v22  ;;  %v4303_v23 = vmul.f32 %v5416_v21, %v4283_v18  ;;  %v4328_v21 = vld [vmem:[%s9201_s6 + $0x98] sm:$0xff] }
 0x4af   :  { %v4188_v45 = vpop.xlane.xlu1 %4187 }
 0x4b0   :  { %5423 = vrsqrt.f32 %v4247_v59  ;;  %v4228_v50 = vmul.f32 0.0051020407, %v4188_v45  ;;  %4576 = vperm.xlu0 %4905, %v4362_v41   ;;  %4571 = vperm.xlu1 %4906, %v4361_v5   ;;  %v4343_v10 = vmul.f32 %v4303_v23, %v8801_v60 }
 0x4b1   :  { %v5418_v15 = vpop.eup %5417 }
 0x4b2   :  { %v4248_v57 = vadd.f32 0.001, %v4228_v50  ;;  %v4304_v32 = vmul.f32 %v5418_v15, %v4284_v2  ;;  %v4363_v60 = vsub.f32 %v4323_v13, %v4343_v10 }
 0x4b4   :  { %5425 = vrsqrt.f32 %v4248_v57  ;;  %4446 = vperm.xlu0 %4905, %v4304_v32   ;;  %4441 = vperm.xlu1 %4906, %v4303_v23   ;;  %v4344_v7 = vmul.f32 %v4304_v32, %v8813_v29  ;;  %v4325_v29 = vld [vmem:[%s9201_s6 + $0x80] sm:$0xff] }
 0x4b5   :  { %v5420_v54 = vpop.eup %5419 }
 0x4b6   :  { %v4364_v39 = vsub.f32 %v4324_v6, %v4344_v7  ;;  %v4305_v12 = vmul.f32 %v5420_v54, %v4285_v16 }
 0x4b8   :  { %4586 = vperm.xlu0 %4905, %v4364_v39   ;;  %4581 = vperm.xlu1 %4906, %v4363_v60   ;;  %v4345_v43 = vmul.f32 %v4305_v12, %v8825_v20 }
 0x4b9   :  { %v5422_v24 = vpop.eup %5421 }
 0x4ba   :  { %v4306_v17 = vmul.f32 %v5422_v24, %v4286_v25  ;;  %v4365_v49 = vsub.f32 %v4325_v29, %v4345_v43 }
 0x4bc   :  { %4456 = vperm.xlu0 %4905, %v4306_v17   ;;  %4451 = vperm.xlu1 %4906, %v4305_v12   ;;  %v4346_v0 = vmul.f32 %v4306_v17, %v8837_v55  ;;  %v4327_v55 = vld [vmem:[%s9201_s6 + $0x90] sm:$0xff] }
 0x4bd   :  { %v5424_v51 = vpop.eup %5423 }
 0x4be   :  { %v4366_v26 = vsub.f32 %v4326_v53, %v4346_v0  ;;  %v4307_v20 = vmul.f32 %v5424_v51, %v4287_v48 }
 0x4c0   :  { %4596 = vperm.xlu0 %4905, %v4366_v26   ;;  %4591 = vperm.xlu1 %4906, %v4365_v49   ;;  %v4347_v22 = vmul.f32 %v4307_v20, %v8849_v11 }
 0x4c1   :  { %v5426_v18 = vpop.eup %5425 }
 0x4c2   :  { %v4308_v28 = vmul.f32 %v5426_v18, %v4288_v35  ;;  %v4367_v5 = vsub.f32 %v4327_v55, %v4347_v22 }
 0x4c4   :  { %4466 = vperm.xlu0 %4905, %v4308_v28   ;;  %4461 = vperm.xlu1 %4906, %v4307_v20   ;;  %v4348_v59 = vmul.f32 %v4308_v28, %v8861_v1 }
 0x4c6   :  { %v4368_v41 = vsub.f32 %v4328_v21, %v4348_v59 }
 0x4c8   :  { %4606 = vperm.xlu0 %4905, %v4368_v41   ;;  %4601 = vperm.xlu1 %4906, %v4367_v5  }
 0x4f3   :  { %v4372_v23 = vpop.permute.xlu0 %4371 }
 0x4f4   :  { %v4469_v11 = vmul.f32 %v4372_v23, %v8436_v14  ;;  %v4470_v2 = vmul.f32 %v4372_v23, %v8639_v44 }
 0x4f7   :  { %v4377_v45 = vpop.permute.xlu1 %4376 }
 0x4f8   :  { %v4471_v50 = vmul.f32 %v4377_v45, %v8446_v62  ;;  %v4472_v15 = vmul.f32 %v4377_v45, %v8650_v61 }
 0x4fb   :  { %v4512_v57 = vpop.permute.xlu1 %4511  ;;  %v4517_v32 = vpop.permute.xlu0 %4516 }
 0x4fc   :  { %v4609_v10 = vadd.f32 %v4512_v57, %v4469_v11  ;;  %v4610_v6 = vadd.f32 %v4512_v57, %v4470_v2  ;;  %v4611_v13 = vadd.f32 %v4517_v32, %v4471_v50  ;;  %v4612_v1 = vadd.f32 %v4517_v32, %v4472_v15 }
 0x4fe   :  { %4649 = vst [vmem:[%s9199_s7] sm:$0xff] %v4609_v10  ;;  %4650 = vst.msk [vmem:[%s9199_s7 + $0x8] sm:$0xff] %vm3829_vm2, %v4610_v6 }
 0x4ff   :  { %4651 = vst [vmem:[%s9199_s7 + $0x10] sm:$0xff] %v4611_v13  ;;  %4652 = vst.msk [vmem:[%s9199_s7 + $0x18] sm:$0xff] %vm3829_vm2, %v4612_v1  ;;  %v4382_v14 = vpop.permute.xlu1 %4381  ;;  %v4387_v62 = vpop.permute.xlu0 %4386 }
 0x500   :  { %v4473_v44 = vmul.f32 %v4382_v14, %v8456_v9  ;;  %v4474_v61 = vmul.f32 %v4382_v14, %v8662_v3  ;;  %v4475_v16 = vmul.f32 %v4387_v62, %v8466_v38  ;;  %v4476_v7 = vmul.f32 %v4387_v62, %v8674_v4 }
 0x503   :  { %v4522_v54 = vpop.permute.xlu1 %4521  ;;  %v4527_v39 = vpop.permute.xlu0 %4526 }
 0x504   :  { %v4613_v60 = vadd.f32 %v4522_v54, %v4473_v44  ;;  %v4614_v12 = vadd.f32 %v4522_v54, %v4474_v61  ;;  %v4615_v25 = vadd.f32 %v4527_v39, %v4475_v16  ;;  %v4616_v24 = vadd.f32 %v4527_v39, %v4476_v7  ;;  %v9238_v44 = vld [vmem:[#allocation2_spill] sm:$0xff] }
 0x505   :  { %v9239_v16 = vld [vmem:[#allocation10_spill] sm:$0xff] }
 0x506   :  { %4653 = vst [vmem:[%s9199_s7 + $0x20] sm:$0xff] %v4613_v60  ;;  %4654 = vst.msk [vmem:[%s9199_s7 + $0x28] sm:$0xff] %vm3829_vm2, %v4614_v12 }
 0x507   :  { %4655 = vst [vmem:[%s9199_s7 + $0x30] sm:$0xff] %v4615_v25  ;;  %4656 = vst.msk [vmem:[%s9199_s7 + $0x38] sm:$0xff] %vm3829_vm2, %v4616_v24  ;;  %v4392_v9 = vpop.permute.xlu1 %4391  ;;  %v4397_v38 = vpop.permute.xlu0 %4396 }
 0x508   :  { %v4477_v3 = vmul.f32 %v4392_v9, %v8476_v33  ;;  %v4478_v4 = vmul.f32 %v4392_v9, %v8686_v47  ;;  %v4479_v17 = vmul.f32 %v4397_v38, %v8486_v31  ;;  %v4480_v43 = vmul.f32 %v4397_v38, %v8698_v63  ;;  %v9240_v38 = vld [vmem:[#allocation3_spill] sm:$0xff] }
 0x50b   :  { %v4532_v53 = vpop.permute.xlu1 %4531  ;;  %v4537_v29 = vpop.permute.xlu0 %4536 }
 0x50c   :  { %v4617_v48 = vadd.f32 %v4532_v53, %v4477_v3  ;;  %v4618_v0 = vadd.f32 %v4532_v53, %v4478_v4  ;;  %v4619_v51 = vadd.f32 %v4537_v29, %v4479_v17  ;;  %v4620_v26 = vadd.f32 %v4537_v29, %v4480_v43  ;;  %v9241_v4 = vld [vmem:[#allocation11_spill] sm:$0xff]  ;;  %v9242_v43 = vld [vmem:[#allocation4_spill] sm:$0xff] }
 0x50d   :  { %v9243_v29 = vld [vmem:[#allocation12_spill] sm:$0xff] }
 0x50e   :  { %4657 = vst [vmem:[%s9199_s7 + $0x40] sm:$0xff] %v4617_v48  ;;  %4658 = vst.msk [vmem:[%s9199_s7 + $0x48] sm:$0xff] %vm3829_vm2, %v4618_v0 }
 0x50f   :  { %4659 = vst [vmem:[%s9199_s7 + $0x50] sm:$0xff] %v4619_v51  ;;  %4660 = vst.msk [vmem:[%s9199_s7 + $0x58] sm:$0xff] %vm3829_vm2, %v4620_v26  ;;  %v4402_v33 = vpop.permute.xlu1 %4401  ;;  %v4407_v31 = vpop.permute.xlu0 %4406 }
 0x510   :  { %v4481_v47 = vmul.f32 %v4402_v33, %v8496_v36  ;;  %v4482_v63 = vmul.f32 %v4402_v33, %v8710_v40  ;;  %v4483_v49 = vmul.f32 %v4407_v31, %v8506_v46  ;;  %v4484_v20 = vmul.f32 %v4407_v31, %v8722_v8 }
 0x513   :  { %v4542_v35 = vpop.permute.xlu1 %4541  ;;  %v4547_v18 = vpop.permute.xlu0 %4546 }
 0x514   :  { %v4621_v28 = vadd.f32 %v4542_v35, %v4481_v47  ;;  %v4622_v22 = vadd.f32 %v4542_v35, %v4482_v63  ;;  %v4623_v21 = vadd.f32 %v4547_v18, %v4483_v49  ;;  %v4624_v55 = vadd.f32 %v4547_v18, %v4484_v20  ;;  %v9244_v20 = vld [vmem:[#allocation5_spill] sm:$0xff] }
 0x515   :  { %v9245_v18 = vld [vmem:[#allocation13_spill] sm:$0xff] }
 0x516   :  { %4661 = vst [vmem:[%s9199_s7 + $0x60] sm:$0xff] %v4621_v28  ;;  %4662 = vst.msk [vmem:[%s9199_s7 + $0x68] sm:$0xff] %vm3829_vm2, %v4622_v22  ;;  %v9246_v22 = vld [vmem:[#allocation6_spill] sm:$0xff] }
 0x517   :  { %4663 = vst [vmem:[%s9199_s7 + $0x70] sm:$0xff] %v4623_v21  ;;  %4664 = vst.msk [vmem:[%s9199_s7 + $0x78] sm:$0xff] %vm3829_vm2, %v4624_v55  ;;  %v4412_v36 = vpop.permute.xlu1 %4411  ;;  %v4417_v46 = vpop.permute.xlu0 %4416  ;;  %v9247_v55 = vld [vmem:[#allocation14_spill] sm:$0xff] }
 0x518   :  { %v4485_v40 = vmul.f32 %v4412_v36, %v8516_v37  ;;  %v4486_v8 = vmul.f32 %v4412_v36, %v8734_v58  ;;  %v4487_v59 = vmul.f32 %v4417_v46, %v8526_v27  ;;  %v4488_v41 = vmul.f32 %v4417_v46, %v8746_v52 }
 0x51b   :  { %v4552_v5 = vpop.permute.xlu1 %4551  ;;  %v4557_v23 = vpop.permute.xlu0 %4556 }
 0x51c   :  { %v4625_v45 = vadd.f32 %v4552_v5, %v4485_v40  ;;  %v4626_v11 = vadd.f32 %v4552_v5, %v4486_v8  ;;  %v4627_v2 = vadd.f32 %v4557_v23, %v4487_v59  ;;  %v4628_v50 = vadd.f32 %v4557_v23, %v4488_v41 }
 0x51e   :  { %4665 = vst [vmem:[%s9199_s7 + $0x80] sm:$0xff] %v4625_v45  ;;  %4666 = vst.msk [vmem:[%s9199_s7 + $0x88] sm:$0xff] %vm3829_vm2, %v4626_v11  ;;  %v9248_v11 = vld [vmem:[#allocation7_spill] sm:$0xff] }
 0x51f   :  { %4667 = vst [vmem:[%s9199_s7 + $0x90] sm:$0xff] %v4627_v2  ;;  %4668 = vst.msk [vmem:[%s9199_s7 + $0x98] sm:$0xff] %vm3829_vm2, %v4628_v50  ;;  %v4422_v37 = vpop.permute.xlu1 %4421  ;;  %v4427_v27 = vpop.permute.xlu0 %4426  ;;  %v9249_v50 = vld [vmem:[#allocation15_spill] sm:$0xff] }
 0x520   :  { %v4489_v58 = vmul.f32 %v4422_v37, %v8536_v42  ;;  %v4490_v52 = vmul.f32 %v4422_v37, %v8758_v34  ;;  %v4491_v15 = vmul.f32 %v4427_v27, %v8546_v56  ;;  %v4492_v57 = vmul.f32 %v4427_v27, %v8770_v30  ;;  %v9237_v30 = vld [vmem:[#allocation9_spill] sm:$0xff]  ;;  %v9250_v27 = vld [vmem:[#allocation8_spill] sm:$0xff] }
 0x523   :  { %v4562_v32 = vpop.permute.xlu1 %4561  ;;  %v4567_v10 = vpop.permute.xlu0 %4566 }
 0x524   :  { %v4629_v6 = vadd.f32 %v4562_v32, %v4489_v58  ;;  %v4630_v13 = vadd.f32 %v4562_v32, %v4490_v52  ;;  %v4631_v1 = vadd.f32 %v4567_v10, %v4491_v15  ;;  %v4632_v14 = vadd.f32 %v4567_v10, %v4492_v57  ;;  %v9251_v52 = vld [vmem:[#allocation16_spill] sm:$0xff] }
 0x526   :  { %4669 = vst [vmem:[%s9199_s7 + $0xa0] sm:$0xff] %v4629_v6  ;;  %4670 = vst.msk [vmem:[%s9199_s7 + $0xa8] sm:$0xff] %vm3829_vm2, %v4630_v13 }
 0x527   :  { %4671 = vst [vmem:[%s9199_s7 + $0xb0] sm:$0xff] %v4631_v1  ;;  %4672 = vst.msk [vmem:[%s9199_s7 + $0xb8] sm:$0xff] %vm3829_vm2, %v4632_v14  ;;  %v4432_v42 = vpop.permute.xlu1 %4431  ;;  %v4437_v56 = vpop.permute.xlu0 %4436 }
 0x528   :  { %v4493_v34 = vmul.f32 %v4432_v42, %v8556_v19  ;;  %v4494_v62 = vmul.f32 %v4432_v42, %v9237_v30  ;;  %v4495_v61 = vmul.f32 %v4437_v56, %v9238_v44  ;;  %v4496_v7 = vmul.f32 %v4437_v56, %v9239_v16 }
 0x52b   :  { %v4572_v54 = vpop.permute.xlu1 %4571  ;;  %v4577_v39 = vpop.permute.xlu0 %4576 }
 0x52c   :  { %v4633_v60 = vadd.f32 %v4572_v54, %v4493_v34  ;;  %v4634_v12 = vadd.f32 %v4572_v54, %v4494_v62  ;;  %v4635_v25 = vadd.f32 %v4577_v39, %v4495_v61  ;;  %v4636_v24 = vadd.f32 %v4577_v39, %v4496_v7 }
 0x52e   :  { %4673 = vst [vmem:[%s9199_s7 + $0xc0] sm:$0xff] %v4633_v60  ;;  %4674 = vst.msk [vmem:[%s9199_s7 + $0xc8] sm:$0xff] %vm3829_vm2, %v4634_v12 }
 0x52f   :  { %4675 = vst [vmem:[%s9199_s7 + $0xd0] sm:$0xff] %v4635_v25  ;;  %4676 = vst.msk [vmem:[%s9199_s7 + $0xd8] sm:$0xff] %vm3829_vm2, %v4636_v24  ;;  %v4442_v19 = vpop.permute.xlu1 %4441  ;;  %v4447_v9 = vpop.permute.xlu0 %4446 }
 0x530   :  { %v4497_v3 = vmul.f32 %v4442_v19, %v9240_v38  ;;  %v4498_v17 = vmul.f32 %v4442_v19, %v9241_v4  ;;  %v4499_v53 = vmul.f32 %v4447_v9, %v9242_v43  ;;  %v4500_v48 = vmul.f32 %v4447_v9, %v9243_v29 }
 0x533   :  { %v4582_v0 = vpop.permute.xlu1 %4581  ;;  %v4587_v51 = vpop.permute.xlu0 %4586 }
 0x534   :  { %v4637_v26 = vadd.f32 %v4582_v0, %v4497_v3  ;;  %v4638_v33 = vadd.f32 %v4582_v0, %v4498_v17  ;;  %v4639_v31 = vadd.f32 %v4587_v51, %v4499_v53  ;;  %v4640_v47 = vadd.f32 %v4587_v51, %v4500_v48 }
 0x536   :  { %4677 = vst [vmem:[%s9199_s7 + $0xe0] sm:$0xff] %v4637_v26  ;;  %4678 = vst.msk [vmem:[%s9199_s7 + $0xe8] sm:$0xff] %vm3829_vm2, %v4638_v33 }
 0x537   :  { %4679 = vst [vmem:[%s9199_s7 + $0xf0] sm:$0xff] %v4639_v31  ;;  %4680 = vst.msk [vmem:[%s9199_s7 + $0xf8] sm:$0xff] %vm3829_vm2, %v4640_v47  ;;  %v4452_v63 = vpop.permute.xlu1 %4451  ;;  %v4457_v49 = vpop.permute.xlu0 %4456 }
 0x538   :  { %v4501_v35 = vmul.f32 %v4452_v63, %v9244_v20  ;;  %v4502_v28 = vmul.f32 %v4452_v63, %v9245_v18  ;;  %v4503_v21 = vmul.f32 %v4457_v49, %v9246_v22  ;;  %v4504_v36 = vmul.f32 %v4457_v49, %v9247_v55 }
 0x53b   :  { %v4592_v46 = vpop.permute.xlu1 %4591  ;;  %v4597_v40 = vpop.permute.xlu0 %4596 }
 0x53c   :  { %v4641_v8 = vadd.f32 %v4592_v46, %v4501_v35  ;;  %v4642_v59 = vadd.f32 %v4592_v46, %v4502_v28  ;;  %v4643_v41 = vadd.f32 %v4597_v40, %v4503_v21  ;;  %v4644_v5 = vadd.f32 %v4597_v40, %v4504_v36 }
 0x53e   :  { %4681 = vst [vmem:[%s9199_s7 + $0x100] sm:$0xff] %v4641_v8  ;;  %4682 = vst.msk [vmem:[%s9199_s7 + $0x108] sm:$0xff] %vm3829_vm2, %v4642_v59 }
 0x53f   :  { %4683 = vst [vmem:[%s9199_s7 + $0x110] sm:$0xff] %v4643_v41  ;;  %4684 = vst.msk [vmem:[%s9199_s7 + $0x118] sm:$0xff] %vm3829_vm2, %v4644_v5  ;;  %v4462_v23 = vpop.permute.xlu1 %4461  ;;  %v4467_v45 = vpop.permute.xlu0 %4466 }
 0x540   :  { %v4505_v2 = vmul.f32 %v4462_v23, %v9248_v11  ;;  %v4506_v37 = vmul.f32 %v4462_v23, %v9249_v50  ;;  %v4507_v58 = vmul.f32 %v4467_v45, %v9250_v27  ;;  %v4508_v15 = vmul.f32 %v4467_v45, %v9251_v52 }
 0x543   :  { %v4602_v57 = vpop.permute.xlu1 %4601  ;;  %v4607_v32 = vpop.permute.xlu0 %4606 }
 0x544   :  { %v4645_v10 = vadd.f32 %v4602_v57, %v4505_v2  ;;  %v4646_v6 = vadd.f32 %v4602_v57, %v4506_v37  ;;  %v4647_v13 = vadd.f32 %v4607_v32, %v4507_v58  ;;  %v4648_v1 = vadd.f32 %v4607_v32, %v4508_v15 }
 0x546   :  { %4685 = vst [vmem:[%s9199_s7 + $0x120] sm:$0xff] %v4645_v10  ;;  %4686 = vst.msk [vmem:[%s9199_s7 + $0x128] sm:$0xff] %vm3829_vm2, %v4646_v6 }
 0x547   :  { %4687 = vst [vmem:[%s9199_s7 + $0x130] sm:$0xff] %v4647_v13  ;;  %4688 = vst.msk [vmem:[%s9199_s7 + $0x138] sm:$0xff] %vm3829_vm2, %v4648_v1 }

</bundles_post_ra>
